<compile_context>
chip_gen: v6e
topology: v6e:2x2x1
jax: 0.10.0
libtpu: 0.0.40
codegen_flags: <defaults>
</compile_context>

<pallas_src>
import functools

import jax
import jax.numpy as jnp
from jax.experimental import pallas as pl
from jax.experimental.pallas import tpu as pltpu


LANE = 128  # coordinates and hidden dim are zero-padded to this lane width


def _default_edge_dtype():
    """bf16 elementwise math on chips with a bf16 VPU/EUP (v6e/v7x), else f32."""
    try:
        kind = jax.devices()[0].device_kind.lower()
    except Exception:  # pragma: no cover - defensive
        return jnp.float32
    for old in ("v2", "v3", "v4", "v5"):
        if old in kind:
            return jnp.float32
    return jnp.bfloat16


def _auto_graphs_per_block(batch, n):
    """Largest divisor of `batch` keeping roughly <=128 node rows per block."""
    target = max(1, 128 // max(n, 1))
    g = 1
    for cand in range(1, batch + 1):
        if batch % cand == 0 and cand <= target:
            g = cand
    return g


# ----------------------------------------------------------------------------
# One dense EGCL layer for a block of G fully connected graphs (in-kernel).
#   x_all: (G, N, LANE) f32  padded coordinates (cols >= 3 are zero)
#   h_all: (G, N, Hp)   f32  padded node features (cols >= H are zero)
#   w_ref: (6, Hp, Hp)  bf16 [w1_hi, w1_hj, w2, wh1_h, wh1_m, wh2]
#   v_ref: (6, Hp)      f32  [w1_d,  b1,    b2, wx,    bh1,   bh2]
# ----------------------------------------------------------------------------
def _egcl_layer(x_all, h_all, w_ref, v_ref, edge_dtype):
    g, n, lane = x_all.shape
    hp = h_all.shape[-1]
    gn = g * n

    v = v_ref[...]
    w1_d = v[0:1, :].reshape(1, 1, hp).astype(edge_dtype)
    b1 = v[1:2, :]
    b2 = v[2:3, :]
    wx = v[3:4, :].reshape(1, 1, hp).astype(edge_dtype)
    bh1 = v[4:5, :]
    bh2 = v[5:6, :]

    # ---- node-level matmuls, batched across all G graphs (G*N MXU rows) ----
    h_flat = h_all.reshape(gn, hp)
    hb = h_flat.astype(jnp.bfloat16)
    a_flat = jnp.dot(hb, w_ref[0], preferred_element_type=jnp.float32)   # (GN,Hp)
    b_flat = jnp.dot(hb, w_ref[1], preferred_element_type=jnp.float32)   # (GN,Hp)
    th_flat = jnp.dot(hb, w_ref[3], preferred_element_type=jnp.float32)  # (GN,Hp)

    # self-edge message (i == j, d2 == 0), batched; used to drop the diagonal
    # from the message aggregation without an (N,N,Hp) mask.
    m1_s = jax.nn.silu((a_flat + b_flat + b1).astype(edge_dtype))
    m2_s = jax.nn.silu(
        (jnp.dot(m1_s.astype(jnp.bfloat16), w_ref[2],
                 preferred_element_type=jnp.float32) + b2).astype(edge_dtype)
    ).astype(jnp.float32)                                                 # (GN,Hp)

    a_all = a_flat.reshape(g, n, hp)
    b_all = b_flat.reshape(g, n, hp)
    m2_s_all = m2_s.reshape(g, n, hp)

    ones_row = jnp.ones((1, lane), jnp.float32)
    b1_e = b1.astype(edge_dtype).reshape(1, 1, hp)

    # ---- edge-level work, per graph (messages / coord update / aggregate) --
    x_new_list = []
    m_agg_list = []
    for gi in range(g):  # static unroll; per-graph temporaries are consumed
        x = x_all[gi]                                        # (N, LANE) f32
        a = a_all[gi].astype(edge_dtype)                     # (N, Hp)
        b = b_all[gi].astype(edge_dtype)                     # (N, Hp)

        # squared pairwise distances via the gram identity (no (N,N,3) tensors)
        gram = jax.lax.dot_general(x, x, (((1,), (1,)), ((), ())),
                                   preferred_element_type=jnp.float32)   # (N,N)
        x2 = x * x
        sq_i = jnp.sum(x2, axis=-1, keepdims=True)                        # (N,1)
        sq_j = jax.lax.dot_general(ones_row, x2, (((1,), (1,)), ((), ())),
                                   preferred_element_type=jnp.float32)   # (1,N)
        d2 = jnp.maximum(sq_i + sq_j - 2.0 * gram, 0.0)                   # (N,N)

        # edge MLP; big (N,N,Hp) tensors built/kept in edge_dtype
        # (bf16 on v6e/v7x => half the VPU traffic & VMEM; f32 on v5e).
        m1 = (a[:, None, :] + b[None, :, :]
              + d2.astype(edge_dtype)[:, :, None] * w1_d
              + b1_e)                                                     # (N,N,Hp)
        m1_flat = jax.nn.silu(m1.reshape(n * n, hp))
        m2_pre = (jnp.dot(m1_flat.astype(jnp.bfloat16), w_ref[2],
                          preferred_element_type=jnp.float32)
                  + b2).reshape(n, n, hp)                                 # f32
        m2 = jax.nn.silu(m2_pre.astype(edge_dtype))                       # (N,N,Hp)

        # coordinate update: sum_{j!=i} e_ij (x_i - x_j)
        #                    = rowsum(e) * x_i - (e @ x)_i  (diag cancels)
        e = jnp.sum(m2 * wx, axis=-1, dtype=jnp.float32)                  # (N,N)
        e_row = jnp.sum(e, axis=-1, keepdims=True)                        # (N,1)
        x_new = x + e_row * x - jnp.dot(e, x,
                                        preferred_element_type=jnp.float32)

        # message aggregation over j != i (subtract the analytic self message)
        m_agg = jnp.sum(m2, axis=1, dtype=jnp.float32) - m2_s_all[gi]     # (N,Hp)

        x_new_list.append(x_new)
        m_agg_list.append(m_agg)

    x_new_all = jnp.stack(x_new_list, axis=0)                             # (G,N,LANE)
    m_agg_flat = jnp.concatenate(m_agg_list, axis=0)                      # (GN,Hp)

    # ---- node feature update, batched across all G graphs ------------------
    t = jax.nn.silu(th_flat
                    + jnp.dot(m_agg_flat.astype(jnp.bfloat16), w_ref[4],
                              preferred_element_type=jnp.float32)
                    + bh1)
    h_new_flat = (h_flat
                  + jnp.dot(t.astype(jnp.bfloat16), w_ref[5],
                            preferred_element_type=jnp.float32)
                  + bh2)
    return x_new_all, h_new_flat.reshape(g, n, hp)


# ----------------------------------------------------------------------------
# Fused AE kernel: encoder EGCL + decoder EGCL, G graphs per grid step.
# ----------------------------------------------------------------------------
def _ae_kernel(x_ref, h_ref, we_ref, ve_ref, wd_ref, vd_ref,
               zx_ref, zh_ref, xo_ref, ho_ref, *, edge_dtype):
    x0 = x_ref[...]                                          # (G, N, LANE) f32
    h0 = h_ref[...]                                          # (G, N, Hp)   f32
    zx, zh = _egcl_layer(x0, h0, we_ref, ve_ref, edge_dtype)  # encoder
    xd, hd = _egcl_layer(zx, zh, wd_ref, vd_ref, edge_dtype)  # decoder (VMEM-res)
    zx_ref[...] = zx.astype(zx_ref.dtype)
    zh_ref[...] = zh.astype(zh_ref.dtype)
    xo_ref[...] = xd.astype(xo_ref.dtype)
    ho_ref[...] = hd.astype(ho_ref.dtype)


# ----------------------------------------------------------------------------
# Host-side wrapper: padding, parameter packing, pallas_call plumbing.
# ----------------------------------------------------------------------------
def _pack_params(p, hidden, hp):
    """Pack per-layer params into (6,Hp,Hp) bf16 matrices + (6,Hp) f32 vectors.

    Zero-padding to Hp is exact: padded feature columns stay zero through both
    EGCL layers (silu(0)=0 and padded weight rows/cols are zero)."""
    pad_m = lambda w: jnp.pad(w.astype(jnp.float32),
                              ((0, hp - hidden), (0, hp - hidden)))
    pad_v = lambda w: jnp.pad(w.astype(jnp.float32).reshape(-1),
                              (0, hp - hidden))
    W = jnp.stack([pad_m(p["w1_hi"]), pad_m(p["w1_hj"]), pad_m(p["w2"]),
                   pad_m(p["wh1_h"]), pad_m(p["wh1_m"]), pad_m(p["wh2"])],
                  axis=0).astype(jnp.bfloat16)
    V = jnp.stack([pad_v(p["w1_d"]), pad_v(p["b1"]), pad_v(p["b2"]),
                   pad_v(p["wx"]), pad_v(p["bh1"]), pad_v(p["bh2"])], axis=0)
    return W, V


def ae_forward_impl(pos, h, enc_params, dec_params, *,
                    graphs_per_block=None, edge_dtype=None):
    """AE.forward: returns ((decoded_x, decoded_h), zx, zh)."""
    B, N, C = pos.shape
    H = h.shape[-1]
    Hp = max(LANE, ((H + LANE - 1) // LANE) * LANE)
    G = (graphs_per_block if graphs_per_block is not None
         else _auto_graphs_per_block(B, N))
    assert B % G == 0
    ed = edge_dtype if edge_dtype is not None else _default_edge_dtype()

    # lane-dense padding for coordinates and features (exact, pads stay zero)
    xp = jnp.pad(pos.astype(jnp.float32), ((0, 0), (0, 0), (0, LANE - C)))
    hpad = jnp.pad(h.astype(jnp.float32), ((0, 0), (0, 0), (0, Hp - H)))

    We, Ve = _pack_params(enc_params, H, Hp)
    Wd, Vd = _pack_params(dec_params, H, Hp)

    node_spec = lambda last: pl.BlockSpec((G, N, last), lambda b: (b, 0, 0))
    w_spec = pl.BlockSpec((6, Hp, Hp), lambda b: (0, 0, 0))
    v_spec = pl.BlockSpec((6, Hp), lambda b: (0, 0))

    # rough per-step working-set estimate -> scoped VMEM limit (matters as N/H
    # grow; v7x has only 64 MiB physical so the cap stays below that).
    eb = 2 if ed == jnp.bfloat16 else 4
    edge_ws = N * N * Hp * (2 * eb + 4) + 4 * N * N * 4   # m1/m2/m2_pre + (N,N) f32
    node_ws = 16 * G * N * (LANE + Hp) * 4                # node blocks, double-buf
    weight_ws = 2 * (6 * Hp * Hp * 2 + 6 * Hp * 4)
    vmem_limit = int(min(100 * 2**20,
                         max(32 * 2**20, 2 * (edge_ws + node_ws) + weight_ws)))

    kernel = functools.partial(_ae_kernel, edge_dtype=ed)

    # TODO(synk): emit zh/ho as bf16 (and/or narrower pads) to cut writeback
    # bytes at large B; kept f32 here for fidelity with the PyTorch reference.
    zx_p, zh_p, xo_p, ho_p = pl.pallas_call(
        kernel,
        out_shape=(jax.ShapeDtypeStruct((B, N, LANE), jnp.float32),
                   jax.ShapeDtypeStruct((B, N, Hp), jnp.float32),
                   jax.ShapeDtypeStruct((B, N, LANE), jnp.float32),
                   jax.ShapeDtypeStruct((B, N, Hp), jnp.float32)),
        grid_spec=pltpu.PrefetchScalarGridSpec(
            num_scalar_prefetch=0,
            grid=(B // G,),
            in_specs=[node_spec(LANE), node_spec(Hp),
                      w_spec, v_spec, w_spec, v_spec],
            out_specs=[node_spec(LANE), node_spec(Hp),
                       node_spec(LANE), node_spec(Hp)],
        ),
        compiler_params=pltpu.CompilerParams(
            dimension_semantics=("parallel",),
            vmem_limit_bytes=vmem_limit),
    )(xp, hpad, We, Ve, Wd, Vd)

    zx = zx_p[..., :C]
    zh = zh_p[..., :H]
    dec_x = xo_p[..., :C]
    dec_h = ho_p[..., :H]
    return (dec_x, dec_h), zx, zh


ae_forward = jax.jit(ae_forward_impl,
                     static_argnames=("graphs_per_block", "edge_dtype"))


# ----------------------------------------------------------------------------
# Deterministic synthetic parameter init (dense EGCL).
# ----------------------------------------------------------------------------
def init_egcl_params(key, hidden):
    ks = jax.random.split(key, 8)
    s_hh = 1.0 / jnp.sqrt(jnp.float32(hidden))
    return {
        "w1_hi": jax.random.normal(ks[0], (hidden, hidden), jnp.float32) * s_hh,
        "w1_hj": jax.random.normal(ks[1], (hidden, hidden), jnp.float32) * s_hh,
        "w1_d":  jax.random.normal(ks[2], (1, hidden), jnp.float32) * 0.1,
        "b1":    jnp.zeros((1, hidden), jnp.float32),
        "w2":    jax.random.normal(ks[3], (hidden, hidden), jnp.float32) * s_hh,
        "b2":    jnp.zeros((1, hidden), jnp.float32),
        "wx":    jax.random.normal(ks[4], (1, hidden), jnp.float32) * s_hh * 0.1,
        "wh1_h": jax.random.normal(ks[5], (hidden, hidden), jnp.float32) * s_hh,
        "wh1_m": jax.random.normal(ks[6], (hidden, hidden), jnp.float32) * s_hh,
        "bh1":   jnp.zeros((1, hidden), jnp.float32),
        "wh2":   jax.random.normal(ks[7], (hidden, hidden), jnp.float32) * s_hh,
        "bh2":   jnp.zeros((1, hidden), jnp.float32),
    }


if __name__ == "__main__":
    # TODO(synk): torch_geometric's sparse `batch`/edge_index bookkeeping has no
    # direct JAX analogue; a dense fully-connected graph per batch entry is used
    # (the dense-EGNN convention).
    B, N, H = 2, 8, 32   # graphs, nodes per graph, hidden dim

    key = jax.random.PRNGKey(0)
    k_pos, k_h, k_enc, k_dec = jax.random.split(key, 4)

    pos = jax.random.normal(k_pos, (B, N, 3), jnp.float32)
    h = jax.random.normal(k_h, (B, N, H), jnp.float32)

    enc_params = init_egcl_params(k_enc, H)
    dec_params = init_egcl_params(k_dec, H)

    (dec_x, dec_h), zx, zh = ae_forward(pos, h, enc_params, dec_params)
    jax.block_until_ready((dec_x, dec_h, zx, zh))

    assert dec_x.shape == (B, N, 3) and dec_h.shape == (B, N, H)
    assert zx.shape == (B, N, 3) and zh.shape == (B, N, H)
    assert bool(jnp.all(jnp.isfinite(dec_x))) and bool(jnp.all(jnp.isfinite(dec_h)))
    print("KERNEL_OK")
</pallas_src>

<mosaic_0001>
module attributes {stable_mosaic.version = 11 : i64} {
  func.func @_ae_kernel(%arg0: i32, %arg1: memref<2x8x128xf32, #tpu.memory_space<vmem>>, %arg2: memref<2x8x128xf32, #tpu.memory_space<vmem>>, %arg3: memref<6x128x128xbf16, #tpu.memory_space<vmem>>, %arg4: memref<6x128xf32, #tpu.memory_space<vmem>>, %arg5: memref<6x128x128xbf16, #tpu.memory_space<vmem>>, %arg6: memref<6x128xf32, #tpu.memory_space<vmem>>, %arg7: memref<2x8x128xf32, #tpu.memory_space<vmem>>, %arg8: memref<2x8x128xf32, #tpu.memory_space<vmem>>, %arg9: memref<2x8x128xf32, #tpu.memory_space<vmem>>, %arg10: memref<2x8x128xf32, #tpu.memory_space<vmem>>) attributes {dimension_semantics = [#tpu.dimension_semantics<parallel>], iteration_bounds = array<i64: 1>, scalar_prefetch = 0 : i64, scratch_operands = 0 : i64, tpu.core_type = #tpu.core_type<tc>, window_params = [{transform_indices = @transform_0, window_bounds = array<i64: 2, 8, 128>}, {transform_indices = @transform_1, window_bounds = array<i64: 2, 8, 128>}, {pipeline_mode = #tpu.pipeline_mode<synchronous>, transform_indices = @transform_2, window_bounds = array<i64: 6, 128, 128>}, {pipeline_mode = #tpu.pipeline_mode<synchronous>, transform_indices = @transform_3, window_bounds = array<i64: 6, 128>}, {pipeline_mode = #tpu.pipeline_mode<synchronous>, transform_indices = @transform_4, window_bounds = array<i64: 6, 128, 128>}, {pipeline_mode = #tpu.pipeline_mode<synchronous>, transform_indices = @transform_5, window_bounds = array<i64: 6, 128>}, {transform_indices = @transform_6, window_bounds = array<i64: 2, 8, 128>}, {transform_indices = @transform_7, window_bounds = array<i64: 2, 8, 128>}, {transform_indices = @transform_8, window_bounds = array<i64: 2, 8, 128>}, {transform_indices = @transform_9, window_bounds = array<i64: 2, 8, 128>}]} {
    %c0 = arith.constant 0 : index
    %c0_0 = arith.constant 0 : index
    %c0_1 = arith.constant 0 : index
    %0 = vector.load %arg1[%c0, %c0_0, %c0_1] : memref<2x8x128xf32, #tpu.memory_space<vmem>>, vector<2x8x128xf32>
    %c0_2 = arith.constant 0 : index
    %c0_3 = arith.constant 0 : index
    %c0_4 = arith.constant 0 : index
    %1 = vector.load %arg2[%c0_2, %c0_3, %c0_4] : memref<2x8x128xf32, #tpu.memory_space<vmem>>, vector<2x8x128xf32>
    %c0_5 = arith.constant 0 : index
    %c0_6 = arith.constant 0 : index
    %2 = vector.load %arg4[%c0_5, %c0_6] : memref<6x128xf32, #tpu.memory_space<vmem>>, vector<6x128xf32>
    %3 = vector.extract_strided_slice %2 {offsets = [0, 0], sizes = [1, 128], strides = [1, 1]} : vector<6x128xf32> to vector<1x128xf32>
    %4 = vector.shape_cast %3 : vector<1x128xf32> to vector<1x1x128xf32>
    %5 = arith.truncf %4 : vector<1x1x128xf32> to vector<1x1x128xbf16>
    %6 = vector.extract_strided_slice %2 {offsets = [1, 0], sizes = [1, 128], strides = [1, 1]} : vector<6x128xf32> to vector<1x128xf32>
    %7 = vector.extract_strided_slice %2 {offsets = [2, 0], sizes = [1, 128], strides = [1, 1]} : vector<6x128xf32> to vector<1x128xf32>
    %8 = vector.extract_strided_slice %2 {offsets = [3, 0], sizes = [1, 128], strides = [1, 1]} : vector<6x128xf32> to vector<1x128xf32>
    %9 = vector.shape_cast %8 : vector<1x128xf32> to vector<1x1x128xf32>
    %10 = arith.truncf %9 : vector<1x1x128xf32> to vector<1x1x128xbf16>
    %11 = vector.extract_strided_slice %2 {offsets = [4, 0], sizes = [1, 128], strides = [1, 1]} : vector<6x128xf32> to vector<1x128xf32>
    %12 = vector.extract_strided_slice %2 {offsets = [5, 0], sizes = [1, 128], strides = [1, 1]} : vector<6x128xf32> to vector<1x128xf32>
    %13 = vector.shape_cast %1 : vector<2x8x128xf32> to vector<16x128xf32>
    %14 = arith.truncf %13 : vector<16x128xf32> to vector<16x128xbf16>
    %c0_7 = arith.constant 0 : index
    %c0_8 = arith.constant 0 : index
    %c0_9 = arith.constant 0 : index
    %15 = vector.load %arg3[%c0_7, %c0_8, %c0_9] : memref<6x128x128xbf16, #tpu.memory_space<vmem>>, vector<1x128x128xbf16>
    %16 = vector.shape_cast %15 : vector<1x128x128xbf16> to vector<128x128xbf16>
    %cst = arith.constant dense<0.000000e+00> : vector<16x128xf32>
    %17 = tpu.matmul %14, %16, %cst {dimension_numbers = #tpu.dot_dimension_numbers<[1], [0], [0], [1], [0, 0, 1, 1], [], []>} : vector<16x128xbf16>, vector<128x128xbf16>, vector<16x128xf32> -> vector<16x128xf32>
    %c1 = arith.constant 1 : index
    %c0_10 = arith.constant 0 : index
    %c0_11 = arith.constant 0 : index
    %18 = vector.load %arg3[%c1, %c0_10, %c0_11] : memref<6x128x128xbf16, #tpu.memory_space<vmem>>, vector<1x128x128xbf16>
    %19 = vector.shape_cast %18 : vector<1x128x128xbf16> to vector<128x128xbf16>
    %cst_12 = arith.constant dense<0.000000e+00> : vector<16x128xf32>
    %20 = tpu.matmul %14, %19, %cst_12 {dimension_numbers = #tpu.dot_dimension_numbers<[1], [0], [0], [1], [0, 0, 1, 1], [], []>} : vector<16x128xbf16>, vector<128x128xbf16>, vector<16x128xf32> -> vector<16x128xf32>
    %c3 = arith.constant 3 : index
    %c0_13 = arith.constant 0 : index
    %c0_14 = arith.constant 0 : index
    %21 = vector.load %arg3[%c3, %c0_13, %c0_14] : memref<6x128x128xbf16, #tpu.memory_space<vmem>>, vector<1x128x128xbf16>
    %22 = vector.shape_cast %21 : vector<1x128x128xbf16> to vector<128x128xbf16>
    %cst_15 = arith.constant dense<0.000000e+00> : vector<16x128xf32>
    %23 = tpu.matmul %14, %22, %cst_15 {dimension_numbers = #tpu.dot_dimension_numbers<[1], [0], [0], [1], [0, 0, 1, 1], [], []>} : vector<16x128xbf16>, vector<128x128xbf16>, vector<16x128xf32> -> vector<16x128xf32>
    %24 = arith.addf %17, %20 : vector<16x128xf32>
    %25 = vector.broadcast %6 : vector<1x128xf32> to vector<16x128xf32>
    %26 = arith.addf %24, %25 : vector<16x128xf32>
    %27 = arith.truncf %26 : vector<16x128xf32> to vector<16x128xbf16>
    %28 = arith.negf %27 : vector<16x128xbf16>
    %29 = math.exp %28 : vector<16x128xbf16>
    %cst_16 = arith.constant 1.000000e+00 : bf16
    %30 = vector.broadcast %cst_16 : bf16 to vector<16x128xbf16>
    %31 = arith.addf %30, %29 : vector<16x128xbf16>
    %32 = arith.divf %30, %31 : vector<16x128xbf16>
    %33 = arith.mulf %27, %32 : vector<16x128xbf16>
    %c2 = arith.constant 2 : index
    %c0_17 = arith.constant 0 : index
    %c0_18 = arith.constant 0 : index
    %34 = vector.load %arg3[%c2, %c0_17, %c0_18] : memref<6x128x128xbf16, #tpu.memory_space<vmem>>, vector<1x128x128xbf16>
    %35 = vector.shape_cast %34 : vector<1x128x128xbf16> to vector<128x128xbf16>
    %cst_19 = arith.constant dense<0.000000e+00> : vector<16x128xf32>
    %36 = tpu.matmul %33, %35, %cst_19 {dimension_numbers = #tpu.dot_dimension_numbers<[1], [0], [0], [1], [0, 0, 1, 1], [], []>} : vector<16x128xbf16>, vector<128x128xbf16>, vector<16x128xf32> -> vector<16x128xf32>
    %37 = vector.broadcast %7 : vector<1x128xf32> to vector<16x128xf32>
    %38 = arith.addf %36, %37 : vector<16x128xf32>
    %39 = arith.truncf %38 : vector<16x128xf32> to vector<16x128xbf16>
    %40 = arith.negf %39 : vector<16x128xbf16>
    %41 = math.exp %40 : vector<16x128xbf16>
    %cst_20 = arith.constant 1.000000e+00 : bf16
    %42 = vector.broadcast %cst_20 : bf16 to vector<16x128xbf16>
    %43 = arith.addf %42, %41 : vector<16x128xbf16>
    %44 = arith.divf %42, %43 : vector<16x128xbf16>
    %45 = arith.mulf %39, %44 : vector<16x128xbf16>
    %46 = arith.extf %45 : vector<16x128xbf16> to vector<16x128xf32>
    %47 = vector.shape_cast %17 : vector<16x128xf32> to vector<2x8x128xf32>
    %48 = vector.shape_cast %20 : vector<16x128xf32> to vector<2x8x128xf32>
    %49 = vector.shape_cast %46 : vector<16x128xf32> to vector<2x8x128xf32>
    %cst_21 = arith.constant 1.000000e+00 : f32
    %50 = vector.broadcast %cst_21 : f32 to vector<1x128xf32>
    %51 = arith.truncf %6 : vector<1x128xf32> to vector<1x128xbf16>
    %52 = vector.shape_cast %51 : vector<1x128xbf16> to vector<1x1x128xbf16>
    %53 = vector.extract_strided_slice %0 {offsets = [0, 0, 0], sizes = [1, 8, 128], strides = [1, 1, 1]} : vector<2x8x128xf32> to vector<1x8x128xf32>
    %54 = vector.shape_cast %53 : vector<1x8x128xf32> to vector<8x128xf32>
    %55 = vector.extract_strided_slice %47 {offsets = [0, 0, 0], sizes = [1, 8, 128], strides = [1, 1, 1]} : vector<2x8x128xf32> to vector<1x8x128xf32>
    %56 = vector.shape_cast %55 : vector<1x8x128xf32> to vector<8x128xf32>
    %57 = arith.truncf %56 : vector<8x128xf32> to vector<8x128xbf16>
    %58 = vector.extract_strided_slice %48 {offsets = [0, 0, 0], sizes = [1, 8, 128], strides = [1, 1, 1]} : vector<2x8x128xf32> to vector<1x8x128xf32>
    %59 = vector.shape_cast %58 : vector<1x8x128xf32> to vector<8x128xf32>
    %60 = arith.truncf %59 : vector<8x128xf32> to vector<8x128xbf16>
    %cst_22 = arith.constant dense<0.000000e+00> : vector<8x8xf32>
    %61 = tpu.matmul %54, %54, %cst_22 {dimension_numbers = #tpu.dot_dimension_numbers<[1], [1], [0], [0], [0, 0, 1, 0], [], []>} : vector<8x128xf32>, vector<8x128xf32>, vector<8x8xf32> -> vector<8x8xf32>
    %62 = arith.mulf %54, %54 : vector<8x128xf32>
    %cst_23 = arith.constant dense<0.000000e+00> : vector<8xf32>
    %63 = vector.multi_reduction <add>, %62, %cst_23 [1] : vector<8x128xf32> to vector<8xf32>
    %64 = vector.shape_cast %63 : vector<8xf32> to vector<8x1xf32>
    %cst_24 = arith.constant dense<0.000000e+00> : vector<1x8xf32>
    %65 = tpu.matmul %50, %62, %cst_24 {dimension_numbers = #tpu.dot_dimension_numbers<[1], [1], [0], [0], [0, 0, 1, 0], [], []>} : vector<1x128xf32>, vector<8x128xf32>, vector<1x8xf32> -> vector<1x8xf32>
    %66 = vector.broadcast %64 : vector<8x1xf32> to vector<8x8xf32>
    %67 = vector.broadcast %65 : vector<1x8xf32> to vector<8x8xf32>
    %68 = arith.addf %66, %67 : vector<8x8xf32>
    %cst_25 = arith.constant 2.000000e+00 : f32
    %69 = vector.broadcast %cst_25 : f32 to vector<8x8xf32>
    %70 = arith.mulf %69, %61 : vector<8x8xf32>
    %71 = arith.subf %68, %70 : vector<8x8xf32>
    %cst_26 = arith.constant 0.000000e+00 : f32
    %72 = vector.broadcast %cst_26 : f32 to vector<8x8xf32>
    %73 = arith.maximumf %71, %72 : vector<8x8xf32>
    %74 = vector.shape_cast %57 : vector<8x128xbf16> to vector<8x1x128xbf16>
    %75 = vector.shape_cast %60 : vector<8x128xbf16> to vector<1x8x128xbf16>
    %76 = vector.broadcast %74 : vector<8x1x128xbf16> to vector<8x8x128xbf16>
    %77 = vector.broadcast %75 : vector<1x8x128xbf16> to vector<8x8x128xbf16>
    %78 = arith.addf %76, %77 : vector<8x8x128xbf16>
    %79 = arith.truncf %73 : vector<8x8xf32> to vector<8x8xbf16>
    %80 = vector.shape_cast %79 : vector<8x8xbf16> to vector<8x8x1xbf16>
    %81 = vector.broadcast %80 : vector<8x8x1xbf16> to vector<8x8x128xbf16>
    %82 = vector.broadcast %5 : vector<1x1x128xbf16> to vector<8x8x128xbf16>
    %83 = arith.mulf %81, %82 : vector<8x8x128xbf16>
    %84 = arith.addf %78, %83 : vector<8x8x128xbf16>
    %85 = vector.broadcast %52 : vector<1x1x128xbf16> to vector<8x8x128xbf16>
    %86 = arith.addf %84, %85 : vector<8x8x128xbf16>
    %87 = vector.shape_cast %86 : vector<8x8x128xbf16> to vector<64x128xbf16>
    %88 = arith.negf %87 : vector<64x128xbf16>
    %89 = math.exp %88 : vector<64x128xbf16>
    %cst_27 = arith.constant 1.000000e+00 : bf16
    %90 = vector.broadcast %cst_27 : bf16 to vector<64x128xbf16>
    %91 = arith.addf %90, %89 : vector<64x128xbf16>
    %92 = arith.divf %90, %91 : vector<64x128xbf16>
    %93 = arith.mulf %87, %92 : vector<64x128xbf16>
    %c2_28 = arith.constant 2 : index
    %c0_29 = arith.constant 0 : index
    %c0_30 = arith.constant 0 : index
    %94 = vector.load %arg3[%c2_28, %c0_29, %c0_30] : memref<6x128x128xbf16, #tpu.memory_space<vmem>>, vector<1x128x128xbf16>
    %95 = vector.shape_cast %94 : vector<1x128x128xbf16> to vector<128x128xbf16>
    %cst_31 = arith.constant dense<0.000000e+00> : vector<64x128xf32>
    %96 = tpu.matmul %93, %95, %cst_31 {dimension_numbers = #tpu.dot_dimension_numbers<[1], [0], [0], [1], [0, 0, 1, 1], [], []>} : vector<64x128xbf16>, vector<128x128xbf16>, vector<64x128xf32> -> vector<64x128xf32>
    %97 = vector.broadcast %7 : vector<1x128xf32> to vector<64x128xf32>
    %98 = arith.addf %96, %97 : vector<64x128xf32>
    %99 = vector.shape_cast %98 : vector<64x128xf32> to vector<8x8x128xf32>
    %100 = arith.truncf %99 : vector<8x8x128xf32> to vector<8x8x128xbf16>
    %101 = arith.negf %100 : vector<8x8x128xbf16>
    %102 = math.exp %101 : vector<8x8x128xbf16>
    %cst_32 = arith.constant 1.000000e+00 : bf16
    %103 = vector.broadcast %cst_32 : bf16 to vector<8x8x128xbf16>
    %104 = arith.addf %103, %102 : vector<8x8x128xbf16>
    %105 = arith.divf %103, %104 : vector<8x8x128xbf16>
    %106 = arith.mulf %100, %105 : vector<8x8x128xbf16>
    %107 = vector.broadcast %10 : vector<1x1x128xbf16> to vector<8x8x128xbf16>
    %108 = arith.mulf %106, %107 : vector<8x8x128xbf16>
    %109 = arith.extf %108 : vector<8x8x128xbf16> to vector<8x8x128xf32>
    %cst_33 = arith.constant dense<0.000000e+00> : vector<8x8xf32>
    %110 = vector.multi_reduction <add>, %109, %cst_33 [2] : vector<8x8x128xf32> to vector<8x8xf32>
    %cst_34 = arith.constant dense<0.000000e+00> : vector<8xf32>
    %111 = vector.multi_reduction <add>, %110, %cst_34 [1] : vector<8x8xf32> to vector<8xf32>
    %112 = vector.shape_cast %111 : vector<8xf32> to vector<8x1xf32>
    %113 = vector.broadcast %112 : vector<8x1xf32> to vector<8x128xf32>
    %114 = arith.mulf %113, %54 : vector<8x128xf32>
    %115 = arith.addf %54, %114 : vector<8x128xf32>
    %cst_35 = arith.constant dense<0.000000e+00> : vector<8x128xf32>
    %116 = tpu.matmul %110, %54, %cst_35 {dimension_numbers = #tpu.dot_dimension_numbers<[1], [0], [0], [1], [0, 0, 1, 1], [], []>} : vector<8x8xf32>, vector<8x128xf32>, vector<8x128xf32> -> vector<8x128xf32>
    %117 = arith.subf %115, %116 : vector<8x128xf32>
    %118 = arith.extf %106 : vector<8x8x128xbf16> to vector<8x8x128xf32>
    %cst_36 = arith.constant dense<0.000000e+00> : vector<8x128xf32>
    %119 = vector.multi_reduction <add>, %118, %cst_36 [1] : vector<8x8x128xf32> to vector<8x128xf32>
    %120 = vector.extract_strided_slice %49 {offsets = [0, 0, 0], sizes = [1, 8, 128], strides = [1, 1, 1]} : vector<2x8x128xf32> to vector<1x8x128xf32>
    %121 = vector.shape_cast %120 : vector<1x8x128xf32> to vector<8x128xf32>
    %122 = arith.subf %119, %121 : vector<8x128xf32>
    %123 = vector.extract_strided_slice %0 {offsets = [1, 0, 0], sizes = [1, 8, 128], strides = [1, 1, 1]} : vector<2x8x128xf32> to vector<1x8x128xf32>
    %124 = vector.shape_cast %123 : vector<1x8x128xf32> to vector<8x128xf32>
    %125 = vector.extract_strided_slice %47 {offsets = [1, 0, 0], sizes = [1, 8, 128], strides = [1, 1, 1]} : vector<2x8x128xf32> to vector<1x8x128xf32>
    %126 = vector.shape_cast %125 : vector<1x8x128xf32> to vector<8x128xf32>
    %127 = arith.truncf %126 : vector<8x128xf32> to vector<8x128xbf16>
    %128 = vector.extract_strided_slice %48 {offsets = [1, 0, 0], sizes = [1, 8, 128], strides = [1, 1, 1]} : vector<2x8x128xf32> to vector<1x8x128xf32>
    %129 = vector.shape_cast %128 : vector<1x8x128xf32> to vector<8x128xf32>
    %130 = arith.truncf %129 : vector<8x128xf32> to vector<8x128xbf16>
    %cst_37 = arith.constant dense<0.000000e+00> : vector<8x8xf32>
    %131 = tpu.matmul %124, %124, %cst_37 {dimension_numbers = #tpu.dot_dimension_numbers<[1], [1], [0], [0], [0, 0, 1, 0], [], []>} : vector<8x128xf32>, vector<8x128xf32>, vector<8x8xf32> -> vector<8x8xf32>
    %132 = arith.mulf %124, %124 : vector<8x128xf32>
    %cst_38 = arith.constant dense<0.000000e+00> : vector<8xf32>
    %133 = vector.multi_reduction <add>, %132, %cst_38 [1] : vector<8x128xf32> to vector<8xf32>
    %134 = vector.shape_cast %133 : vector<8xf32> to vector<8x1xf32>
    %cst_39 = arith.constant dense<0.000000e+00> : vector<1x8xf32>
    %135 = tpu.matmul %50, %132, %cst_39 {dimension_numbers = #tpu.dot_dimension_numbers<[1], [1], [0], [0], [0, 0, 1, 0], [], []>} : vector<1x128xf32>, vector<8x128xf32>, vector<1x8xf32> -> vector<1x8xf32>
    %136 = vector.broadcast %134 : vector<8x1xf32> to vector<8x8xf32>
    %137 = vector.broadcast %135 : vector<1x8xf32> to vector<8x8xf32>
    %138 = arith.addf %136, %137 : vector<8x8xf32>
    %cst_40 = arith.constant 2.000000e+00 : f32
    %139 = vector.broadcast %cst_40 : f32 to vector<8x8xf32>
    %140 = arith.mulf %139, %131 : vector<8x8xf32>
    %141 = arith.subf %138, %140 : vector<8x8xf32>
    %cst_41 = arith.constant 0.000000e+00 : f32
    %142 = vector.broadcast %cst_41 : f32 to vector<8x8xf32>
    %143 = arith.maximumf %141, %142 : vector<8x8xf32>
    %144 = vector.shape_cast %127 : vector<8x128xbf16> to vector<8x1x128xbf16>
    %145 = vector.shape_cast %130 : vector<8x128xbf16> to vector<1x8x128xbf16>
    %146 = vector.broadcast %144 : vector<8x1x128xbf16> to vector<8x8x128xbf16>
    %147 = vector.broadcast %145 : vector<1x8x128xbf16> to vector<8x8x128xbf16>
    %148 = arith.addf %146, %147 : vector<8x8x128xbf16>
    %149 = arith.truncf %143 : vector<8x8xf32> to vector<8x8xbf16>
    %150 = vector.shape_cast %149 : vector<8x8xbf16> to vector<8x8x1xbf16>
    %151 = vector.broadcast %150 : vector<8x8x1xbf16> to vector<8x8x128xbf16>
    %152 = vector.broadcast %5 : vector<1x1x128xbf16> to vector<8x8x128xbf16>
    %153 = arith.mulf %151, %152 : vector<8x8x128xbf16>
    %154 = arith.addf %148, %153 : vector<8x8x128xbf16>
    %155 = vector.broadcast %52 : vector<1x1x128xbf16> to vector<8x8x128xbf16>
    %156 = arith.addf %154, %155 : vector<8x8x128xbf16>
    %157 = vector.shape_cast %156 : vector<8x8x128xbf16> to vector<64x128xbf16>
    %158 = arith.negf %157 : vector<64x128xbf16>
    %159 = math.exp %158 : vector<64x128xbf16>
    %cst_42 = arith.constant 1.000000e+00 : bf16
    %160 = vector.broadcast %cst_42 : bf16 to vector<64x128xbf16>
    %161 = arith.addf %160, %159 : vector<64x128xbf16>
    %162 = arith.divf %160, %161 : vector<64x128xbf16>
    %163 = arith.mulf %157, %162 : vector<64x128xbf16>
    %c2_43 = arith.constant 2 : index
    %c0_44 = arith.constant 0 : index
    %c0_45 = arith.constant 0 : index
    %164 = vector.load %arg3[%c2_43, %c0_44, %c0_45] : memref<6x128x128xbf16, #tpu.memory_space<vmem>>, vector<1x128x128xbf16>
    %165 = vector.shape_cast %164 : vector<1x128x128xbf16> to vector<128x128xbf16>
    %cst_46 = arith.constant dense<0.000000e+00> : vector<64x128xf32>
    %166 = tpu.matmul %163, %165, %cst_46 {dimension_numbers = #tpu.dot_dimension_numbers<[1], [0], [0], [1], [0, 0, 1, 1], [], []>} : vector<64x128xbf16>, vector<128x128xbf16>, vector<64x128xf32> -> vector<64x128xf32>
    %167 = vector.broadcast %7 : vector<1x128xf32> to vector<64x128xf32>
    %168 = arith.addf %166, %167 : vector<64x128xf32>
    %169 = vector.shape_cast %168 : vector<64x128xf32> to vector<8x8x128xf32>
    %170 = arith.truncf %169 : vector<8x8x128xf32> to vector<8x8x128xbf16>
    %171 = arith.negf %170 : vector<8x8x128xbf16>
    %172 = math.exp %171 : vector<8x8x128xbf16>
    %cst_47 = arith.constant 1.000000e+00 : bf16
    %173 = vector.broadcast %cst_47 : bf16 to vector<8x8x128xbf16>
    %174 = arith.addf %173, %172 : vector<8x8x128xbf16>
    %175 = arith.divf %173, %174 : vector<8x8x128xbf16>
    %176 = arith.mulf %170, %175 : vector<8x8x128xbf16>
    %177 = vector.broadcast %10 : vector<1x1x128xbf16> to vector<8x8x128xbf16>
    %178 = arith.mulf %176, %177 : vector<8x8x128xbf16>
    %179 = arith.extf %178 : vector<8x8x128xbf16> to vector<8x8x128xf32>
    %cst_48 = arith.constant dense<0.000000e+00> : vector<8x8xf32>
    %180 = vector.multi_reduction <add>, %179, %cst_48 [2] : vector<8x8x128xf32> to vector<8x8xf32>
    %cst_49 = arith.constant dense<0.000000e+00> : vector<8xf32>
    %181 = vector.multi_reduction <add>, %180, %cst_49 [1] : vector<8x8xf32> to vector<8xf32>
    %182 = vector.shape_cast %181 : vector<8xf32> to vector<8x1xf32>
    %183 = vector.broadcast %182 : vector<8x1xf32> to vector<8x128xf32>
    %184 = arith.mulf %183, %124 : vector<8x128xf32>
    %185 = arith.addf %124, %184 : vector<8x128xf32>
    %cst_50 = arith.constant dense<0.000000e+00> : vector<8x128xf32>
    %186 = tpu.matmul %180, %124, %cst_50 {dimension_numbers = #tpu.dot_dimension_numbers<[1], [0], [0], [1], [0, 0, 1, 1], [], []>} : vector<8x8xf32>, vector<8x128xf32>, vector<8x128xf32> -> vector<8x128xf32>
    %187 = arith.subf %185, %186 : vector<8x128xf32>
    %188 = arith.extf %176 : vector<8x8x128xbf16> to vector<8x8x128xf32>
    %cst_51 = arith.constant dense<0.000000e+00> : vector<8x128xf32>
    %189 = vector.multi_reduction <add>, %188, %cst_51 [1] : vector<8x8x128xf32> to vector<8x128xf32>
    %190 = vector.extract_strided_slice %49 {offsets = [1, 0, 0], sizes = [1, 8, 128], strides = [1, 1, 1]} : vector<2x8x128xf32> to vector<1x8x128xf32>
    %191 = vector.shape_cast %190 : vector<1x8x128xf32> to vector<8x128xf32>
    %192 = arith.subf %189, %191 : vector<8x128xf32>
    %193 = vector.shape_cast %117 : vector<8x128xf32> to vector<1x8x128xf32>
    %194 = vector.shape_cast %187 : vector<8x128xf32> to vector<1x8x128xf32>
    %195 = tpu.concatenate %193, %194 in 0 : vector<1x8x128xf32>, vector<1x8x128xf32> -> vector<2x8x128xf32>
    %196 = tpu.concatenate %122, %192 in 0 : vector<8x128xf32>, vector<8x128xf32> -> vector<16x128xf32>
    %197 = arith.truncf %196 : vector<16x128xf32> to vector<16x128xbf16>
    %c4 = arith.constant 4 : index
    %c0_52 = arith.constant 0 : index
    %c0_53 = arith.constant 0 : index
    %198 = vector.load %arg3[%c4, %c0_52, %c0_53] : memref<6x128x128xbf16, #tpu.memory_space<vmem>>, vector<1x128x128xbf16>
    %199 = vector.shape_cast %198 : vector<1x128x128xbf16> to vector<128x128xbf16>
    %cst_54 = arith.constant dense<0.000000e+00> : vector<16x128xf32>
    %200 = tpu.matmul %197, %199, %cst_54 {dimension_numbers = #tpu.dot_dimension_numbers<[1], [0], [0], [1], [0, 0, 1, 1], [], []>} : vector<16x128xbf16>, vector<128x128xbf16>, vector<16x128xf32> -> vector<16x128xf32>
    %201 = arith.addf %23, %200 : vector<16x128xf32>
    %202 = vector.broadcast %11 : vector<1x128xf32> to vector<16x128xf32>
    %203 = arith.addf %201, %202 : vector<16x128xf32>
    %204 = arith.negf %203 : vector<16x128xf32>
    %205 = math.exp %204 : vector<16x128xf32>
    %cst_55 = arith.constant 1.000000e+00 : f32
    %206 = vector.broadcast %cst_55 : f32 to vector<16x128xf32>
    %207 = arith.addf %206, %205 : vector<16x128xf32>
    %208 = arith.divf %206, %207 : vector<16x128xf32>
    %209 = arith.mulf %203, %208 : vector<16x128xf32>
    %210 = arith.truncf %209 : vector<16x128xf32> to vector<16x128xbf16>
    %c5 = arith.constant 5 : index
    %c0_56 = arith.constant 0 : index
    %c0_57 = arith.constant 0 : index
    %211 = vector.load %arg3[%c5, %c0_56, %c0_57] : memref<6x128x128xbf16, #tpu.memory_space<vmem>>, vector<1x128x128xbf16>
    %212 = vector.shape_cast %211 : vector<1x128x128xbf16> to vector<128x128xbf16>
    %cst_58 = arith.constant dense<0.000000e+00> : vector<16x128xf32>
    %213 = tpu.matmul %210, %212, %cst_58 {dimension_numbers = #tpu.dot_dimension_numbers<[1], [0], [0], [1], [0, 0, 1, 1], [], []>} : vector<16x128xbf16>, vector<128x128xbf16>, vector<16x128xf32> -> vector<16x128xf32>
    %214 = arith.addf %13, %213 : vector<16x128xf32>
    %215 = vector.broadcast %12 : vector<1x128xf32> to vector<16x128xf32>
    %216 = arith.addf %214, %215 : vector<16x128xf32>
    %217 = vector.shape_cast %216 : vector<16x128xf32> to vector<2x8x128xf32>
    %c0_59 = arith.constant 0 : index
    %c0_60 = arith.constant 0 : index
    %218 = vector.load %arg6[%c0_59, %c0_60] : memref<6x128xf32, #tpu.memory_space<vmem>>, vector<6x128xf32>
    %219 = vector.extract_strided_slice %218 {offsets = [0, 0], sizes = [1, 128], strides = [1, 1]} : vector<6x128xf32> to vector<1x128xf32>
    %220 = vector.shape_cast %219 : vector<1x128xf32> to vector<1x1x128xf32>
    %221 = arith.truncf %220 : vector<1x1x128xf32> to vector<1x1x128xbf16>
    %222 = vector.extract_strided_slice %218 {offsets = [1, 0], sizes = [1, 128], strides = [1, 1]} : vector<6x128xf32> to vector<1x128xf32>
    %223 = vector.extract_strided_slice %218 {offsets = [2, 0], sizes = [1, 128], strides = [1, 1]} : vector<6x128xf32> to vector<1x128xf32>
    %224 = vector.extract_strided_slice %218 {offsets = [3, 0], sizes = [1, 128], strides = [1, 1]} : vector<6x128xf32> to vector<1x128xf32>
    %225 = vector.shape_cast %224 : vector<1x128xf32> to vector<1x1x128xf32>
    %226 = arith.truncf %225 : vector<1x1x128xf32> to vector<1x1x128xbf16>
    %227 = vector.extract_strided_slice %218 {offsets = [4, 0], sizes = [1, 128], strides = [1, 1]} : vector<6x128xf32> to vector<1x128xf32>
    %228 = vector.extract_strided_slice %218 {offsets = [5, 0], sizes = [1, 128], strides = [1, 1]} : vector<6x128xf32> to vector<1x128xf32>
    %229 = vector.shape_cast %217 : vector<2x8x128xf32> to vector<16x128xf32>
    %230 = arith.truncf %229 : vector<16x128xf32> to vector<16x128xbf16>
    %c0_61 = arith.constant 0 : index
    %c0_62 = arith.constant 0 : index
    %c0_63 = arith.constant 0 : index
    %231 = vector.load %arg5[%c0_61, %c0_62, %c0_63] : memref<6x128x128xbf16, #tpu.memory_space<vmem>>, vector<1x128x128xbf16>
    %232 = vector.shape_cast %231 : vector<1x128x128xbf16> to vector<128x128xbf16>
    %cst_64 = arith.constant dense<0.000000e+00> : vector<16x128xf32>
    %233 = tpu.matmul %230, %232, %cst_64 {dimension_numbers = #tpu.dot_dimension_numbers<[1], [0], [0], [1], [0, 0, 1, 1], [], []>} : vector<16x128xbf16>, vector<128x128xbf16>, vector<16x128xf32> -> vector<16x128xf32>
    %c1_65 = arith.constant 1 : index
    %c0_66 = arith.constant 0 : index
    %c0_67 = arith.constant 0 : index
    %234 = vector.load %arg5[%c1_65, %c0_66, %c0_67] : memref<6x128x128xbf16, #tpu.memory_space<vmem>>, vector<1x128x128xbf16>
    %235 = vector.shape_cast %234 : vector<1x128x128xbf16> to vector<128x128xbf16>
    %cst_68 = arith.constant dense<0.000000e+00> : vector<16x128xf32>
    %236 = tpu.matmul %230, %235, %cst_68 {dimension_numbers = #tpu.dot_dimension_numbers<[1], [0], [0], [1], [0, 0, 1, 1], [], []>} : vector<16x128xbf16>, vector<128x128xbf16>, vector<16x128xf32> -> vector<16x128xf32>
    %c3_69 = arith.constant 3 : index
    %c0_70 = arith.constant 0 : index
    %c0_71 = arith.constant 0 : index
    %237 = vector.load %arg5[%c3_69, %c0_70, %c0_71] : memref<6x128x128xbf16, #tpu.memory_space<vmem>>, vector<1x128x128xbf16>
    %238 = vector.shape_cast %237 : vector<1x128x128xbf16> to vector<128x128xbf16>
    %cst_72 = arith.constant dense<0.000000e+00> : vector<16x128xf32>
    %239 = tpu.matmul %230, %238, %cst_72 {dimension_numbers = #tpu.dot_dimension_numbers<[1], [0], [0], [1], [0, 0, 1, 1], [], []>} : vector<16x128xbf16>, vector<128x128xbf16>, vector<16x128xf32> -> vector<16x128xf32>
    %240 = arith.addf %233, %236 : vector<16x128xf32>
    %241 = vector.broadcast %222 : vector<1x128xf32> to vector<16x128xf32>
    %242 = arith.addf %240, %241 : vector<16x128xf32>
    %243 = arith.truncf %242 : vector<16x128xf32> to vector<16x128xbf16>
    %244 = arith.negf %243 : vector<16x128xbf16>
    %245 = math.exp %244 : vector<16x128xbf16>
    %cst_73 = arith.constant 1.000000e+00 : bf16
    %246 = vector.broadcast %cst_73 : bf16 to vector<16x128xbf16>
    %247 = arith.addf %246, %245 : vector<16x128xbf16>
    %248 = arith.divf %246, %247 : vector<16x128xbf16>
    %249 = arith.mulf %243, %248 : vector<16x128xbf16>
    %c2_74 = arith.constant 2 : index
    %c0_75 = arith.constant 0 : index
    %c0_76 = arith.constant 0 : index
    %250 = vector.load %arg5[%c2_74, %c0_75, %c0_76] : memref<6x128x128xbf16, #tpu.memory_space<vmem>>, vector<1x128x128xbf16>
    %251 = vector.shape_cast %250 : vector<1x128x128xbf16> to vector<128x128xbf16>
    %cst_77 = arith.constant dense<0.000000e+00> : vector<16x128xf32>
    %252 = tpu.matmul %249, %251, %cst_77 {dimension_numbers = #tpu.dot_dimension_numbers<[1], [0], [0], [1], [0, 0, 1, 1], [], []>} : vector<16x128xbf16>, vector<128x128xbf16>, vector<16x128xf32> -> vector<16x128xf32>
    %253 = vector.broadcast %223 : vector<1x128xf32> to vector<16x128xf32>
    %254 = arith.addf %252, %253 : vector<16x128xf32>
    %255 = arith.truncf %254 : vector<16x128xf32> to vector<16x128xbf16>
    %256 = arith.negf %255 : vector<16x128xbf16>
    %257 = math.exp %256 : vector<16x128xbf16>
    %cst_78 = arith.constant 1.000000e+00 : bf16
    %258 = vector.broadcast %cst_78 : bf16 to vector<16x128xbf16>
    %259 = arith.addf %258, %257 : vector<16x128xbf16>
    %260 = arith.divf %258, %259 : vector<16x128xbf16>
    %261 = arith.mulf %255, %260 : vector<16x128xbf16>
    %262 = arith.extf %261 : vector<16x128xbf16> to vector<16x128xf32>
    %263 = vector.shape_cast %233 : vector<16x128xf32> to vector<2x8x128xf32>
    %264 = vector.shape_cast %236 : vector<16x128xf32> to vector<2x8x128xf32>
    %265 = vector.shape_cast %262 : vector<16x128xf32> to vector<2x8x128xf32>
    %cst_79 = arith.constant 1.000000e+00 : f32
    %266 = vector.broadcast %cst_79 : f32 to vector<1x128xf32>
    %267 = arith.truncf %222 : vector<1x128xf32> to vector<1x128xbf16>
    %268 = vector.shape_cast %267 : vector<1x128xbf16> to vector<1x1x128xbf16>
    %269 = vector.extract_strided_slice %195 {offsets = [0, 0, 0], sizes = [1, 8, 128], strides = [1, 1, 1]} : vector<2x8x128xf32> to vector<1x8x128xf32>
    %270 = vector.shape_cast %269 : vector<1x8x128xf32> to vector<8x128xf32>
    %271 = vector.extract_strided_slice %263 {offsets = [0, 0, 0], sizes = [1, 8, 128], strides = [1, 1, 1]} : vector<2x8x128xf32> to vector<1x8x128xf32>
    %272 = vector.shape_cast %271 : vector<1x8x128xf32> to vector<8x128xf32>
    %273 = arith.truncf %272 : vector<8x128xf32> to vector<8x128xbf16>
    %274 = vector.extract_strided_slice %264 {offsets = [0, 0, 0], sizes = [1, 8, 128], strides = [1, 1, 1]} : vector<2x8x128xf32> to vector<1x8x128xf32>
    %275 = vector.shape_cast %274 : vector<1x8x128xf32> to vector<8x128xf32>
    %276 = arith.truncf %275 : vector<8x128xf32> to vector<8x128xbf16>
    %cst_80 = arith.constant dense<0.000000e+00> : vector<8x8xf32>
    %277 = tpu.matmul %270, %270, %cst_80 {dimension_numbers = #tpu.dot_dimension_numbers<[1], [1], [0], [0], [0, 0, 1, 0], [], []>} : vector<8x128xf32>, vector<8x128xf32>, vector<8x8xf32> -> vector<8x8xf32>
    %278 = arith.mulf %270, %270 : vector<8x128xf32>
    %cst_81 = arith.constant dense<0.000000e+00> : vector<8xf32>
    %279 = vector.multi_reduction <add>, %278, %cst_81 [1] : vector<8x128xf32> to vector<8xf32>
    %280 = vector.shape_cast %279 : vector<8xf32> to vector<8x1xf32>
    %cst_82 = arith.constant dense<0.000000e+00> : vector<1x8xf32>
    %281 = tpu.matmul %266, %278, %cst_82 {dimension_numbers = #tpu.dot_dimension_numbers<[1], [1], [0], [0], [0, 0, 1, 0], [], []>} : vector<1x128xf32>, vector<8x128xf32>, vector<1x8xf32> -> vector<1x8xf32>
    %282 = vector.broadcast %280 : vector<8x1xf32> to vector<8x8xf32>
    %283 = vector.broadcast %281 : vector<1x8xf32> to vector<8x8xf32>
    %284 = arith.addf %282, %283 : vector<8x8xf32>
    %cst_83 = arith.constant 2.000000e+00 : f32
    %285 = vector.broadcast %cst_83 : f32 to vector<8x8xf32>
    %286 = arith.mulf %285, %277 : vector<8x8xf32>
    %287 = arith.subf %284, %286 : vector<8x8xf32>
    %cst_84 = arith.constant 0.000000e+00 : f32
    %288 = vector.broadcast %cst_84 : f32 to vector<8x8xf32>
    %289 = arith.maximumf %287, %288 : vector<8x8xf32>
    %290 = vector.shape_cast %273 : vector<8x128xbf16> to vector<8x1x128xbf16>
    %291 = vector.shape_cast %276 : vector<8x128xbf16> to vector<1x8x128xbf16>
    %292 = vector.broadcast %290 : vector<8x1x128xbf16> to vector<8x8x128xbf16>
    %293 = vector.broadcast %291 : vector<1x8x128xbf16> to vector<8x8x128xbf16>
    %294 = arith.addf %292, %293 : vector<8x8x128xbf16>
    %295 = arith.truncf %289 : vector<8x8xf32> to vector<8x8xbf16>
    %296 = vector.shape_cast %295 : vector<8x8xbf16> to vector<8x8x1xbf16>
    %297 = vector.broadcast %296 : vector<8x8x1xbf16> to vector<8x8x128xbf16>
    %298 = vector.broadcast %221 : vector<1x1x128xbf16> to vector<8x8x128xbf16>
    %299 = arith.mulf %297, %298 : vector<8x8x128xbf16>
    %300 = arith.addf %294, %299 : vector<8x8x128xbf16>
    %301 = vector.broadcast %268 : vector<1x1x128xbf16> to vector<8x8x128xbf16>
    %302 = arith.addf %300, %301 : vector<8x8x128xbf16>
    %303 = vector.shape_cast %302 : vector<8x8x128xbf16> to vector<64x128xbf16>
    %304 = arith.negf %303 : vector<64x128xbf16>
    %305 = math.exp %304 : vector<64x128xbf16>
    %cst_85 = arith.constant 1.000000e+00 : bf16
    %306 = vector.broadcast %cst_85 : bf16 to vector<64x128xbf16>
    %307 = arith.addf %306, %305 : vector<64x128xbf16>
    %308 = arith.divf %306, %307 : vector<64x128xbf16>
    %309 = arith.mulf %303, %308 : vector<64x128xbf16>
    %c2_86 = arith.constant 2 : index
    %c0_87 = arith.constant 0 : index
    %c0_88 = arith.constant 0 : index
    %310 = vector.load %arg5[%c2_86, %c0_87, %c0_88] : memref<6x128x128xbf16, #tpu.memory_space<vmem>>, vector<1x128x128xbf16>
    %311 = vector.shape_cast %310 : vector<1x128x128xbf16> to vector<128x128xbf16>
    %cst_89 = arith.constant dense<0.000000e+00> : vector<64x128xf32>
    %312 = tpu.matmul %309, %311, %cst_89 {dimension_numbers = #tpu.dot_dimension_numbers<[1], [0], [0], [1], [0, 0, 1, 1], [], []>} : vector<64x128xbf16>, vector<128x128xbf16>, vector<64x128xf32> -> vector<64x128xf32>
    %313 = vector.broadcast %223 : vector<1x128xf32> to vector<64x128xf32>
    %314 = arith.addf %312, %313 : vector<64x128xf32>
    %315 = vector.shape_cast %314 : vector<64x128xf32> to vector<8x8x128xf32>
    %316 = arith.truncf %315 : vector<8x8x128xf32> to vector<8x8x128xbf16>
    %317 = arith.negf %316 : vector<8x8x128xbf16>
    %318 = math.exp %317 : vector<8x8x128xbf16>
    %cst_90 = arith.constant 1.000000e+00 : bf16
    %319 = vector.broadcast %cst_90 : bf16 to vector<8x8x128xbf16>
    %320 = arith.addf %319, %318 : vector<8x8x128xbf16>
    %321 = arith.divf %319, %320 : vector<8x8x128xbf16>
    %322 = arith.mulf %316, %321 : vector<8x8x128xbf16>
    %323 = vector.broadcast %226 : vector<1x1x128xbf16> to vector<8x8x128xbf16>
    %324 = arith.mulf %322, %323 : vector<8x8x128xbf16>
    %325 = arith.extf %324 : vector<8x8x128xbf16> to vector<8x8x128xf32>
    %cst_91 = arith.constant dense<0.000000e+00> : vector<8x8xf32>
    %326 = vector.multi_reduction <add>, %325, %cst_91 [2] : vector<8x8x128xf32> to vector<8x8xf32>
    %cst_92 = arith.constant dense<0.000000e+00> : vector<8xf32>
    %327 = vector.multi_reduction <add>, %326, %cst_92 [1] : vector<8x8xf32> to vector<8xf32>
    %328 = vector.shape_cast %327 : vector<8xf32> to vector<8x1xf32>
    %329 = vector.broadcast %328 : vector<8x1xf32> to vector<8x128xf32>
    %330 = arith.mulf %329, %270 : vector<8x128xf32>
    %331 = arith.addf %270, %330 : vector<8x128xf32>
    %cst_93 = arith.constant dense<0.000000e+00> : vector<8x128xf32>
    %332 = tpu.matmul %326, %270, %cst_93 {dimension_numbers = #tpu.dot_dimension_numbers<[1], [0], [0], [1], [0, 0, 1, 1], [], []>} : vector<8x8xf32>, vector<8x128xf32>, vector<8x128xf32> -> vector<8x128xf32>
    %333 = arith.subf %331, %332 : vector<8x128xf32>
    %334 = arith.extf %322 : vector<8x8x128xbf16> to vector<8x8x128xf32>
    %cst_94 = arith.constant dense<0.000000e+00> : vector<8x128xf32>
    %335 = vector.multi_reduction <add>, %334, %cst_94 [1] : vector<8x8x128xf32> to vector<8x128xf32>
    %336 = vector.extract_strided_slice %265 {offsets = [0, 0, 0], sizes = [1, 8, 128], strides = [1, 1, 1]} : vector<2x8x128xf32> to vector<1x8x128xf32>
    %337 = vector.shape_cast %336 : vector<1x8x128xf32> to vector<8x128xf32>
    %338 = arith.subf %335, %337 : vector<8x128xf32>
    %339 = vector.extract_strided_slice %195 {offsets = [1, 0, 0], sizes = [1, 8, 128], strides = [1, 1, 1]} : vector<2x8x128xf32> to vector<1x8x128xf32>
    %340 = vector.shape_cast %339 : vector<1x8x128xf32> to vector<8x128xf32>
    %341 = vector.extract_strided_slice %263 {offsets = [1, 0, 0], sizes = [1, 8, 128], strides = [1, 1, 1]} : vector<2x8x128xf32> to vector<1x8x128xf32>
    %342 = vector.shape_cast %341 : vector<1x8x128xf32> to vector<8x128xf32>
    %343 = arith.truncf %342 : vector<8x128xf32> to vector<8x128xbf16>
    %344 = vector.extract_strided_slice %264 {offsets = [1, 0, 0], sizes = [1, 8, 128], strides = [1, 1, 1]} : vector<2x8x128xf32> to vector<1x8x128xf32>
    %345 = vector.shape_cast %344 : vector<1x8x128xf32> to vector<8x128xf32>
    %346 = arith.truncf %345 : vector<8x128xf32> to vector<8x128xbf16>
    %cst_95 = arith.constant dense<0.000000e+00> : vector<8x8xf32>
    %347 = tpu.matmul %340, %340, %cst_95 {dimension_numbers = #tpu.dot_dimension_numbers<[1], [1], [0], [0], [0, 0, 1, 0], [], []>} : vector<8x128xf32>, vector<8x128xf32>, vector<8x8xf32> -> vector<8x8xf32>
    %348 = arith.mulf %340, %340 : vector<8x128xf32>
    %cst_96 = arith.constant dense<0.000000e+00> : vector<8xf32>
    %349 = vector.multi_reduction <add>, %348, %cst_96 [1] : vector<8x128xf32> to vector<8xf32>
    %350 = vector.shape_cast %349 : vector<8xf32> to vector<8x1xf32>
    %cst_97 = arith.constant dense<0.000000e+00> : vector<1x8xf32>
    %351 = tpu.matmul %266, %348, %cst_97 {dimension_numbers = #tpu.dot_dimension_numbers<[1], [1], [0], [0], [0, 0, 1, 0], [], []>} : vector<1x128xf32>, vector<8x128xf32>, vector<1x8xf32> -> vector<1x8xf32>
    %352 = vector.broadcast %350 : vector<8x1xf32> to vector<8x8xf32>
    %353 = vector.broadcast %351 : vector<1x8xf32> to vector<8x8xf32>
    %354 = arith.addf %352, %353 : vector<8x8xf32>
    %cst_98 = arith.constant 2.000000e+00 : f32
    %355 = vector.broadcast %cst_98 : f32 to vector<8x8xf32>
    %356 = arith.mulf %355, %347 : vector<8x8xf32>
    %357 = arith.subf %354, %356 : vector<8x8xf32>
    %cst_99 = arith.constant 0.000000e+00 : f32
    %358 = vector.broadcast %cst_99 : f32 to vector<8x8xf32>
    %359 = arith.maximumf %357, %358 : vector<8x8xf32>
    %360 = vector.shape_cast %343 : vector<8x128xbf16> to vector<8x1x128xbf16>
    %361 = vector.shape_cast %346 : vector<8x128xbf16> to vector<1x8x128xbf16>
    %362 = vector.broadcast %360 : vector<8x1x128xbf16> to vector<8x8x128xbf16>
    %363 = vector.broadcast %361 : vector<1x8x128xbf16> to vector<8x8x128xbf16>
    %364 = arith.addf %362, %363 : vector<8x8x128xbf16>
    %365 = arith.truncf %359 : vector<8x8xf32> to vector<8x8xbf16>
    %366 = vector.shape_cast %365 : vector<8x8xbf16> to vector<8x8x1xbf16>
    %367 = vector.broadcast %366 : vector<8x8x1xbf16> to vector<8x8x128xbf16>
    %368 = vector.broadcast %221 : vector<1x1x128xbf16> to vector<8x8x128xbf16>
    %369 = arith.mulf %367, %368 : vector<8x8x128xbf16>
    %370 = arith.addf %364, %369 : vector<8x8x128xbf16>
    %371 = vector.broadcast %268 : vector<1x1x128xbf16> to vector<8x8x128xbf16>
    %372 = arith.addf %370, %371 : vector<8x8x128xbf16>
    %373 = vector.shape_cast %372 : vector<8x8x128xbf16> to vector<64x128xbf16>
    %374 = arith.negf %373 : vector<64x128xbf16>
    %375 = math.exp %374 : vector<64x128xbf16>
    %cst_100 = arith.constant 1.000000e+00 : bf16
    %376 = vector.broadcast %cst_100 : bf16 to vector<64x128xbf16>
    %377 = arith.addf %376, %375 : vector<64x128xbf16>
    %378 = arith.divf %376, %377 : vector<64x128xbf16>
    %379 = arith.mulf %373, %378 : vector<64x128xbf16>
    %c2_101 = arith.constant 2 : index
    %c0_102 = arith.constant 0 : index
    %c0_103 = arith.constant 0 : index
    %380 = vector.load %arg5[%c2_101, %c0_102, %c0_103] : memref<6x128x128xbf16, #tpu.memory_space<vmem>>, vector<1x128x128xbf16>
    %381 = vector.shape_cast %380 : vector<1x128x128xbf16> to vector<128x128xbf16>
    %cst_104 = arith.constant dense<0.000000e+00> : vector<64x128xf32>
    %382 = tpu.matmul %379, %381, %cst_104 {dimension_numbers = #tpu.dot_dimension_numbers<[1], [0], [0], [1], [0, 0, 1, 1], [], []>} : vector<64x128xbf16>, vector<128x128xbf16>, vector<64x128xf32> -> vector<64x128xf32>
    %383 = vector.broadcast %223 : vector<1x128xf32> to vector<64x128xf32>
    %384 = arith.addf %382, %383 : vector<64x128xf32>
    %385 = vector.shape_cast %384 : vector<64x128xf32> to vector<8x8x128xf32>
    %386 = arith.truncf %385 : vector<8x8x128xf32> to vector<8x8x128xbf16>
    %387 = arith.negf %386 : vector<8x8x128xbf16>
    %388 = math.exp %387 : vector<8x8x128xbf16>
    %cst_105 = arith.constant 1.000000e+00 : bf16
    %389 = vector.broadcast %cst_105 : bf16 to vector<8x8x128xbf16>
    %390 = arith.addf %389, %388 : vector<8x8x128xbf16>
    %391 = arith.divf %389, %390 : vector<8x8x128xbf16>
    %392 = arith.mulf %386, %391 : vector<8x8x128xbf16>
    %393 = vector.broadcast %226 : vector<1x1x128xbf16> to vector<8x8x128xbf16>
    %394 = arith.mulf %392, %393 : vector<8x8x128xbf16>
    %395 = arith.extf %394 : vector<8x8x128xbf16> to vector<8x8x128xf32>
    %cst_106 = arith.constant dense<0.000000e+00> : vector<8x8xf32>
    %396 = vector.multi_reduction <add>, %395, %cst_106 [2] : vector<8x8x128xf32> to vector<8x8xf32>
    %cst_107 = arith.constant dense<0.000000e+00> : vector<8xf32>
    %397 = vector.multi_reduction <add>, %396, %cst_107 [1] : vector<8x8xf32> to vector<8xf32>
    %398 = vector.shape_cast %397 : vector<8xf32> to vector<8x1xf32>
    %399 = vector.broadcast %398 : vector<8x1xf32> to vector<8x128xf32>
    %400 = arith.mulf %399, %340 : vector<8x128xf32>
    %401 = arith.addf %340, %400 : vector<8x128xf32>
    %cst_108 = arith.constant dense<0.000000e+00> : vector<8x128xf32>
    %402 = tpu.matmul %396, %340, %cst_108 {dimension_numbers = #tpu.dot_dimension_numbers<[1], [0], [0], [1], [0, 0, 1, 1], [], []>} : vector<8x8xf32>, vector<8x128xf32>, vector<8x128xf32> -> vector<8x128xf32>
    %403 = arith.subf %401, %402 : vector<8x128xf32>
    %404 = arith.extf %392 : vector<8x8x128xbf16> to vector<8x8x128xf32>
    %cst_109 = arith.constant dense<0.000000e+00> : vector<8x128xf32>
    %405 = vector.multi_reduction <add>, %404, %cst_109 [1] : vector<8x8x128xf32> to vector<8x128xf32>
    %406 = vector.extract_strided_slice %265 {offsets = [1, 0, 0], sizes = [1, 8, 128], strides = [1, 1, 1]} : vector<2x8x128xf32> to vector<1x8x128xf32>
    %407 = vector.shape_cast %406 : vector<1x8x128xf32> to vector<8x128xf32>
    %408 = arith.subf %405, %407 : vector<8x128xf32>
    %409 = vector.shape_cast %333 : vector<8x128xf32> to vector<1x8x128xf32>
    %410 = vector.shape_cast %403 : vector<8x128xf32> to vector<1x8x128xf32>
    %411 = tpu.concatenate %409, %410 in 0 : vector<1x8x128xf32>, vector<1x8x128xf32> -> vector<2x8x128xf32>
    %412 = tpu.concatenate %338, %408 in 0 : vector<8x128xf32>, vector<8x128xf32> -> vector<16x128xf32>
    %413 = arith.truncf %412 : vector<16x128xf32> to vector<16x128xbf16>
    %c4_110 = arith.constant 4 : index
    %c0_111 = arith.constant 0 : index
    %c0_112 = arith.constant 0 : index
    %414 = vector.load %arg5[%c4_110, %c0_111, %c0_112] : memref<6x128x128xbf16, #tpu.memory_space<vmem>>, vector<1x128x128xbf16>
    %415 = vector.shape_cast %414 : vector<1x128x128xbf16> to vector<128x128xbf16>
    %cst_113 = arith.constant dense<0.000000e+00> : vector<16x128xf32>
    %416 = tpu.matmul %413, %415, %cst_113 {dimension_numbers = #tpu.dot_dimension_numbers<[1], [0], [0], [1], [0, 0, 1, 1], [], []>} : vector<16x128xbf16>, vector<128x128xbf16>, vector<16x128xf32> -> vector<16x128xf32>
    %417 = arith.addf %239, %416 : vector<16x128xf32>
    %418 = vector.broadcast %227 : vector<1x128xf32> to vector<16x128xf32>
    %419 = arith.addf %417, %418 : vector<16x128xf32>
    %420 = arith.negf %419 : vector<16x128xf32>
    %421 = math.exp %420 : vector<16x128xf32>
    %cst_114 = arith.constant 1.000000e+00 : f32
    %422 = vector.broadcast %cst_114 : f32 to vector<16x128xf32>
    %423 = arith.addf %422, %421 : vector<16x128xf32>
    %424 = arith.divf %422, %423 : vector<16x128xf32>
    %425 = arith.mulf %419, %424 : vector<16x128xf32>
    %426 = arith.truncf %425 : vector<16x128xf32> to vector<16x128xbf16>
    %c5_115 = arith.constant 5 : index
    %c0_116 = arith.constant 0 : index
    %c0_117 = arith.constant 0 : index
    %427 = vector.load %arg5[%c5_115, %c0_116, %c0_117] : memref<6x128x128xbf16, #tpu.memory_space<vmem>>, vector<1x128x128xbf16>
    %428 = vector.shape_cast %427 : vector<1x128x128xbf16> to vector<128x128xbf16>
    %cst_118 = arith.constant dense<0.000000e+00> : vector<16x128xf32>
    %429 = tpu.matmul %426, %428, %cst_118 {dimension_numbers = #tpu.dot_dimension_numbers<[1], [0], [0], [1], [0, 0, 1, 1], [], []>} : vector<16x128xbf16>, vector<128x128xbf16>, vector<16x128xf32> -> vector<16x128xf32>
    %430 = arith.addf %229, %429 : vector<16x128xf32>
    %431 = vector.broadcast %228 : vector<1x128xf32> to vector<16x128xf32>
    %432 = arith.addf %430, %431 : vector<16x128xf32>
    %433 = vector.shape_cast %432 : vector<16x128xf32> to vector<2x8x128xf32>
    %c0_119 = arith.constant 0 : index
    %c0_120 = arith.constant 0 : index
    %c0_121 = arith.constant 0 : index
    %434 = vector.load %arg7[%c0_119, %c0_120, %c0_121] : memref<2x8x128xf32, #tpu.memory_space<vmem>>, vector<2x8x128xf32>
    tpu.vector_store %arg7[%c0_119, %c0_120, %c0_121], %195 {strides = array<i32>} : memref<2x8x128xf32, #tpu.memory_space<vmem>>, vector<2x8x128xf32>,
    %c0_122 = arith.constant 0 : index
    %c0_123 = arith.constant 0 : index
    %c0_124 = arith.constant 0 : index
    %435 = vector.load %arg8[%c0_122, %c0_123, %c0_124] : memref<2x8x128xf32, #tpu.memory_space<vmem>>, vector<2x8x128xf32>
    tpu.vector_store %arg8[%c0_122, %c0_123, %c0_124], %217 {strides = array<i32>} : memref<2x8x128xf32, #tpu.memory_space<vmem>>, vector<2x8x128xf32>,
    %c0_125 = arith.constant 0 : index
    %c0_126 = arith.constant 0 : index
    %c0_127 = arith.constant 0 : index
    %436 = vector.load %arg9[%c0_125, %c0_126, %c0_127] : memref<2x8x128xf32, #tpu.memory_space<vmem>>, vector<2x8x128xf32>
    tpu.vector_store %arg9[%c0_125, %c0_126, %c0_127], %411 {strides = array<i32>} : memref<2x8x128xf32, #tpu.memory_space<vmem>>, vector<2x8x128xf32>,
    %c0_128 = arith.constant 0 : index
    %c0_129 = arith.constant 0 : index
    %c0_130 = arith.constant 0 : index
    %437 = vector.load %arg10[%c0_128, %c0_129, %c0_130] : memref<2x8x128xf32, #tpu.memory_space<vmem>>, vector<2x8x128xf32>
    tpu.vector_store %arg10[%c0_128, %c0_129, %c0_130], %433 {strides = array<i32>} : memref<2x8x128xf32, #tpu.memory_space<vmem>>, vector<2x8x128xf32>,
    return
  }
  func.func @transform_0(%arg0: i32) -> (i32, i32, i32) {
    %c0_i32 = arith.constant 0 : i32
    %c0_i32_0 = arith.constant 0 : i32
    %c0_i32_1 = arith.constant 0 : i32
    return %arg0, %c0_i32, %c0_i32_0 : i32, i32, i32
  }
  func.func @transform_1(%arg0: i32) -> (i32, i32, i32) {
    %c0_i32 = arith.constant 0 : i32
    %c0_i32_0 = arith.constant 0 : i32
    %c0_i32_1 = arith.constant 0 : i32
    return %arg0, %c0_i32, %c0_i32_0 : i32, i32, i32
  }
  func.func @transform_2(%arg0: i32) -> (i32, i32, i32) {
    %c0_i32 = arith.constant 0 : i32
    %c0_i32_0 = arith.constant 0 : i32
    %c0_i32_1 = arith.constant 0 : i32
    %c0_i32_2 = arith.constant 0 : i32
    return %c0_i32, %c0_i32_0, %c0_i32_1 : i32, i32, i32
  }
  func.func @transform_3(%arg0: i32) -> (i32, i32) {
    %c0_i32 = arith.constant 0 : i32
    %c0_i32_0 = arith.constant 0 : i32
    %c0_i32_1 = arith.constant 0 : i32
    return %c0_i32, %c0_i32_0 : i32, i32
  }
  func.func @transform_4(%arg0: i32) -> (i32, i32, i32) {
    %c0_i32 = arith.constant 0 : i32
    %c0_i32_0 = arith.constant 0 : i32
    %c0_i32_1 = arith.constant 0 : i32
    %c0_i32_2 = arith.constant 0 : i32
    return %c0_i32, %c0_i32_0, %c0_i32_1 : i32, i32, i32
  }
  func.func @transform_5(%arg0: i32) -> (i32, i32) {
    %c0_i32 = arith.constant 0 : i32
    %c0_i32_0 = arith.constant 0 : i32
    %c0_i32_1 = arith.constant 0 : i32
    return %c0_i32, %c0_i32_0 : i32, i32
  }
  func.func @transform_6(%arg0: i32) -> (i32, i32, i32) {
    %c0_i32 = arith.constant 0 : i32
    %c0_i32_0 = arith.constant 0 : i32
    %c0_i32_1 = arith.constant 0 : i32
    return %arg0, %c0_i32, %c0_i32_0 : i32, i32, i32
  }
  func.func @transform_7(%arg0: i32) -> (i32, i32, i32) {
    %c0_i32 = arith.constant 0 : i32
    %c0_i32_0 = arith.constant 0 : i32
    %c0_i32_1 = arith.constant 0 : i32
    return %arg0, %c0_i32, %c0_i32_0 : i32, i32, i32
  }
  func.func @transform_8(%arg0: i32) -> (i32, i32, i32) {
    %c0_i32 = arith.constant 0 : i32
    %c0_i32_0 = arith.constant 0 : i32
    %c0_i32_1 = arith.constant 0 : i32
    return %arg0, %c0_i32, %c0_i32_0 : i32, i32, i32
  }
  func.func @transform_9(%arg0: i32) -> (i32, i32, i32) {
    %c0_i32 = arith.constant 0 : i32
    %c0_i32_0 = arith.constant 0 : i32
    %c0_i32_1 = arith.constant 0 : i32
    return %arg0, %c0_i32, %c0_i32_0 : i32, i32, i32
  }
}

</mosaic_0001>

<bundles_post_ra>
// kernel: ae_forward_impl.1
= control target key start
LH: loop header
LB: loop body
LE: loop exit
PB: predicated region body
PF: predicated region fallthrough
CT: control target
= control target key end

     0   :  { %15 = vsyncpa [#allocation3], 0  ;;  %v8078_v1 = vmov 0.0   ;;  %vm6383_vm0 = vmmov 0   ;;  %v8076_v22 = vmov 1.0   ;;  %s8066_s0 = inlined_call_operand.vmem [shape: f32[2,8,128], index: 0, kind: input, shape index: {}]   ;;  %s8067_s1 = inlined_call_operand.vmem [shape: f32[2,8,128], index: 1, kind: input, shape index: {}]   ;;  %s8068_s2 = inlined_call_operand.vmem [shape: bf16[6,128,128], index: 2, kind: input, shape index: {}]   ;;  %s8069_s3 = inlined_call_operand.vmem [shape: f32[6,128], index: 3, kind: input, shape index: {}]   ;;  %s8070_s4 = inlined_call_operand.vmem [shape: bf16[6,128,128], index: 4, kind: input, shape index: {}]   ;;  %s8071_s5 = inlined_call_operand.vmem [shape: f32[6,128], index: 5, kind: input, shape index: {}]   ;;  %s8072_s6 = inlined_call_operand.vmem [shape: f32[2,8,128], index: 6, kind: output, shape index: {0}]   ;;  %s8073_s7 = inlined_call_operand.hbm [shape: f32[2,8,128], index: 7, kind: output, shape index: {1}]   ;;  %s8074_s8 = inlined_call_operand.vmem [shape: f32[2,8,128], index: 8, kind: output, shape index: {2}]   ;;  %s8075_s9 = inlined_call_operand.hbm [shape: f32[2,8,128], index: 9, kind: output, shape index: {3}]  }
   0x1   :  { %v5929_v0 = vld [vmem:[%s8068_s2 + $0x38] sm:$0xff]   ;;  %5525 = vmatprep.subr.bf16.mxu0 %v8078_v1  ;;  %5545 = vmatprep.subr.bf16.mxu1 %v8078_v1  ;;  %v5931_v3 = vld [vmem:[%s8068_s2 + $0x30] sm:$0xff]   ;;  %v5933_v5 = vld [vmem:[%s8068_s2 + $0x28] sm:$0xff]  }
   0x2   :  { %v5930_v2 = vld [vmem:[%s8068_s2 + $0x78] sm:$0xff]   ;;  %5526 = vmatpush3.bf16.msra.mxu0 %v5929_v0  ;;  %5541 = vmatprep.mubr.msk.bf16.mxu0 %vm6383_vm0, %v8078_v1  ;;  %v5932_v4 = vld [vmem:[%s8068_s2 + $0x70] sm:$0xff]   ;;  %v5934_v6 = vld [vmem:[%s8068_s2 + $0x68] sm:$0xff]  }
   0x3   :  { %5546 = vmatpush3.bf16.msra.mxu1 %v5930_v2  ;;  %5527 = vmatprep.subr.bf16.mxu0 %v8078_v1  ;;  %v5935_v7 = vld [vmem:[%s8068_s2 + $0x20] sm:$0xff]   ;;  %v5937_v9 = vld [vmem:[%s8068_s2 + $0x18] sm:$0xff]   ;;  %v5939_v11 = vld [vmem:[%s8068_s2 + $0x10] sm:$0xff]  }
   0x4   :  { %5547 = vmatprep.subr.bf16.mxu1 %v8078_v1  ;;  %5561 = vmatprep.mubr.msk.bf16.mxu1 %vm6383_vm0, %v8078_v1  ;;  %v5936_v8 = vld [vmem:[%s8068_s2 + $0x60] sm:$0xff]   ;;  %v5938_v10 = vld [vmem:[%s8068_s2 + $0x58] sm:$0xff]   ;;  %v5940_v13 = vld [vmem:[%s8068_s2 + $0x50] sm:$0xff]  }
   0x5   :  { %v31_v12 = vld [vmem:[%s8066_s0] sm:$0xff]  ;;  %v5941_v15 = vld [vmem:[%s8068_s2 + $0x8] sm:$0xff]  }
   0x6   :  { %5528 = vmatpush3.bf16.msra.mxu0 %v5931_v3  ;;  %v476_v14 = vmul.f32 %v31_v12, %v31_v12  ;;  %v5942_v16 = vld [vmem:[%s8068_s2 + $0x48] sm:$0xff]   ;;  %v5943_v17 = vld [vmem:[%s8068_s2] sm:$0xff]  }
   0x7   :  { %5548 = vmatpush3.bf16.msra.mxu1 %v5932_v4  ;;  %5529 = vmatprep.subr.bf16.mxu0 %v8078_v1  ;;  %v33_v18 = vld [vmem:[%s8067_s1] sm:$0xff]  ;;  %v34_v19 = vld [vmem:[%s8067_s1 + $0x8] sm:$0xff] }
   0x8   :  { %5549 = vmatprep.subr.bf16.mxu1 %v8078_v1  ;;  %477 = vadd.xlane.f32.xlu0 %v476_v14  ;;  %v5944_v20 = vld [vmem:[%s8068_s2 + $0x40] sm:$0xff]   ;;  %v6517_v21 = vpack.c.bf16 %v34_v19, %v33_v18 }
   0xa   :  { %5530 = vmatpush3.bf16.msra.mxu0 %v5933_v5 }
   0xb   :  { %5550 = vmatpush3.bf16.msra.mxu1 %v5934_v6  ;;  %5531 = vmatprep.subr.bf16.mxu0 %v8078_v1 }
   0xc   :  { %5551 = vmatprep.subr.bf16.mxu1 %v8078_v1 }
   0xe   :  { %5532 = vmatpush3.bf16.msra.mxu0 %v5935_v7 }
   0xf   :  { %5552 = vmatpush3.bf16.msra.mxu1 %v5936_v8  ;;  %5533 = vmatprep.subr.bf16.mxu0 %v8078_v1 }
  0x10   :  { %5553 = vmatprep.subr.bf16.mxu1 %v8078_v1 }
  0x12   :  { %5534 = vmatpush3.bf16.msra.mxu0 %v5937_v9 }
  0x13   :  { %5554 = vmatpush3.bf16.msra.mxu1 %v5938_v10  ;;  %5535 = vmatprep.subr.bf16.mxu0 %v8078_v1 }
  0x14   :  { %5555 = vmatprep.subr.bf16.mxu1 %v8078_v1 }
  0x16   :  { %5536 = vmatpush3.bf16.msra.mxu0 %v5939_v11 }
  0x17   :  { %5556 = vmatpush3.bf16.msra.mxu1 %v5940_v13  ;;  %5537 = vmatprep.subr.bf16.mxu0 %v8078_v1 }
  0x18   :  { %5557 = vmatprep.subr.bf16.mxu1 %v8078_v1 }
  0x1a   :  { %5538 = vmatpush3.bf16.msra.mxu0 %v5941_v15 }
  0x1b   :  { %5558 = vmatpush3.bf16.msra.mxu1 %v5942_v16  ;;  %5539 = vmatprep.subr.bf16.mxu0 %v8078_v1 }
  0x1c   :  { %5559 = vmatprep.subr.bf16.mxu1 %v8078_v1 }
  0x1e   :  { %5540 = vmatpush3.bf16.msra.mxu0 %v5943_v17 }
  0x1f   :  { %5560 = vmatpush3.bf16.msra.mxu1 %v5944_v20  ;;  %5565 = vmatprep.subr.bf16.mxu0 %v8078_v1 }
  0x20   :  { %5585 = vmatprep.subr.mxu1 %v8078_v1 }
  0x21   :  { %5542 = vmatmul.mubr.bf16.vlgmr.msra.gmra.mxu0 %v6517_v21 }
  0x22   :  { %5562 = vmatmul.mubr.bf16.vlgmr.msra.gmra.mxu1 %v6517_v21  ;;  %5581 = vmatprep.mubr.msk.bf16.mxu0 %vm6383_vm0, %v8078_v1 }
  0x23   :  { %5586 = vmatpush3.xpose.msra.mxu1 %v31_v12  ;;  %5587 = vmatprep.mubr.msk.f32.mxu1 %vm6383_vm0, %v8078_v1 }
  0x24   :  { %5590 = vmatprep.subr.mxu1 %v8078_v1 }
  0x2a   :  { %5588 = vmatmul.mubr.f32.vlgmr.msra.gmra.mxu1 %v31_v12 }
  0x2b   :  { %5591 = vmatpush3.xpose.msra.mxu1 %v476_v14  ;;  %5592 = vmatprep.mubr.msk.f32.mxu1 %vm6383_vm0, %v8078_v1 }
  0x2e   :  { %5593 = vmatmul.mubr.f32.vlgmr.msra.gmra.mxu1 %v8076_v22 }
  0x2f   :  { %16 = vsyncpa [#allocation5], 0  ;;  %v6534_v23 = vld [vmem:[%s8068_s2 + $0xb8] sm:$0xff]   ;;  %v5946_v24 = vld [vmem:[%s8068_s2 + $0xb0] sm:$0xff]   ;;  %v6385_v31 = vmov 1966171168   ;;  %v268_v33 = vlaneseq }
  0x30   :  { %5566 = vmatpush3.bf16.msra.mxu0 %v6534_v23  ;;  %5595 = vmatprep.subr.bf16.mxu1 %v6534_v23  ;;  %v5947_v25 = vld [vmem:[%s8068_s2 + $0xa8] sm:$0xff]   ;;  %v5948_v26 = vld [vmem:[%s8068_s2 + $0xa0] sm:$0xff]   ;;  %v5949_v27 = vld [vmem:[%s8068_s2 + $0x98] sm:$0xff]   ;;  %v559_v32 = vunpack.c.l.s4 %v6385_v31  ;;  %vm1098_vm1 = vcmask 1041409   ;;  %vm1100_vm2 = vcmask 1042434   ;;  %vm1102_vm3 = vcmask 1043459  }
  0x31   :  { %5567 = vmatprep.subr.bf16.mxu0 %v8078_v1  ;;  %5596 = vmatpush3.bf16.msra.mxu1 %v6534_v23  ;;  %v5950_v28 = vld [vmem:[%s8068_s2 + $0x90] sm:$0xff]   ;;  %v5951_v29 = vld [vmem:[%s8068_s2 + $0x88] sm:$0xff]   ;;  %v5952_v30 = vld [vmem:[%s8068_s2 + $0x80] sm:$0xff]   ;;  %v6570_v35 = vshrl.u32 %v268_v33, 7  ;;  %vm1104_vm4 = vcmask 1044484   ;;  %vm1106_vm5 = vcmask 1045509  }
  0x32   :  { %5597 = vmatprep.subr.bf16.mxu1 %v5946_v24  ;;  %v560_v34 = vunpack.c.0.s8 %v559_v32  ;;  %v6581_v40 = vld [vmem:[%s8069_s3] sm:$0x3f]  ;;  %vm1108_vm6 = vcmask 1046534   ;;  %vm1110_vm7 = vcmask 1047559   ;;  %vm1113_vm8 = vcmask 64512  }
  0x33   :  { %v6576_v38 = vsub.s32 1, %v6570_v35  ;;  %v6588_v50 = vsub.s32 0, %v6570_v35  ;;  %v6592_v58 = vsub.s32 2, %v6570_v35 }
  0x34   :  { %5568 = vmatpush3.bf16.msra.mxu0 %v5946_v24  ;;  %v6573_v36 = vsub.s32 %v560_v34, %v6570_v35 }
  0x35   :  { %5569 = vmatprep.subr.bf16.mxu0 %v8078_v1  ;;  %5598 = vmatpush3.bf16.msra.mxu1 %v5946_v24  ;;  %v271_v46 = vrot.slane %v6581_v40, %v6576_v38 }
  0x36   :  { %5599 = vmatprep.subr.bf16.mxu1 %v5947_v25 }
  0x38   :  { %5570 = vmatpush3.bf16.msra.mxu0 %v5947_v25 }
  0x39   :  { %5571 = vmatprep.subr.bf16.mxu0 %v8078_v1  ;;  %5600 = vmatpush3.bf16.msra.mxu1 %v5947_v25 }
  0x3a   :  { %5601 = vmatprep.subr.bf16.mxu1 %v5948_v26 }
  0x3c   :  { %5572 = vmatpush3.bf16.msra.mxu0 %v5948_v26 }
  0x3d   :  { %5573 = vmatprep.subr.bf16.mxu0 %v8078_v1  ;;  %5602 = vmatpush3.bf16.msra.mxu1 %v5948_v26 }
  0x3e   :  { %5603 = vmatprep.subr.bf16.mxu1 %v5949_v27 }
  0x40   :  { %5574 = vmatpush3.bf16.msra.mxu0 %v5949_v27 }
  0x41   :  { %5575 = vmatprep.subr.bf16.mxu0 %v8078_v1  ;;  %5604 = vmatpush3.bf16.msra.mxu1 %v5949_v27 }
  0x42   :  { %5605 = vmatprep.subr.bf16.mxu1 %v5950_v28 }
  0x44   :  { %5576 = vmatpush3.bf16.msra.mxu0 %v5950_v28 }
  0x45   :  { %5577 = vmatprep.subr.bf16.mxu0 %v8078_v1  ;;  %5606 = vmatpush3.bf16.msra.mxu1 %v5950_v28 }
  0x46   :  { %5607 = vmatprep.subr.bf16.mxu1 %v5951_v29 }
  0x48   :  { %5578 = vmatpush3.bf16.msra.mxu0 %v5951_v29 }
  0x49   :  { %5579 = vmatprep.subr.bf16.mxu0 %v8078_v1  ;;  %5608 = vmatpush3.bf16.msra.mxu1 %v5951_v29 }
  0x4a   :  { %5609 = vmatprep.subr.bf16.mxu1 %v5952_v30 }
  0x4c   :  { %5580 = vmatpush3.bf16.msra.mxu0 %v5952_v30 }
  0x4d   :  { %5624 = vmatprep.subr.mxu0 %v8078_v1  ;;  %5610 = vmatpush3.bf16.msra.mxu1 %v5952_v30 }
  0x4e   :  { %5619 = vmatprep.subr.mxu1 %v8078_v1 }
  0x91   :  { %v478_v24 = vpop.xlane.xlu0 %477 }
  0xe1   :  { %v136_v37 = vpop.f32.mrf.mxu0 }
  0xe2   :  { %v404_v39 = vpack.c.bf16 %v136_v37, %v136_v37  ;;  %v242_v41 = vpop.f32.mrf.mxu1 }
  0xe3   :  { %v5543_v42 = vpop.f32.mrf.mxu0  ;;  %v266_v45 = vadd.f32 %v242_v41, %v136_v37  ;;  %v6595_v2 = vpack.c.bf16 %v242_v41, %v242_v41 }
  0xe4   :  { %v564_v43 = vrot.slane %v404_v39, %v6573_v36  ;;  %v5563_v44 = vpop.f32.mrf.mxu1 }
  0xe5   :  { %v139_v47 = vpop.f32.mrf.mxu0  ;;  %v272_v61 = vadd.f32 %v271_v46, %v266_v45 }
  0xe6   :  { %v565_v48 = vcombine.high %v564_v43, %v564_v43  ;;  %v572_v49 = vrot.slane %v564_v43, %v6573_v36  ;;  %v1272_v51 = vpack.c.bf16 %v139_v47, %v139_v47  ;;  %v245_v52 = vpop.f32.mrf.mxu1 }
  0xe7   :  { %v267_v53 = vadd.f32 %v245_v52, %v139_v47  ;;  %v5544_v54 = vpop.f32.mrf.mxu0  ;;  %v6601_v9 = vpack.c.bf16 %v245_v52, %v245_v52 }
  0xe8   :  { %v579_v55 = vrot.slane %v565_v48, %v6573_v36  ;;  %v580_v56 = vcombine.high %v572_v49, %v572_v49  ;;  %v5055_v57 = vpack.i.b16 %v572_v49, %v572_v49  ;;  %v5564_v59 = vpop.f32.mrf.mxu1  ;;  %v583_v60 = vunpack.i.h.s16 %v572_v49 }
  0xe9   :  { %v1432_v62 = vrot.slane %v1272_v51, %v6573_v36  ;;  %v273_v63 = vadd.f32 %v271_v46, %v267_v53 }
  0xea   :  { %v581_v0 = vcombine.high %v579_v55, %v579_v55  ;;  %v472_v3 = vpop.f32.mrf.mxu1  ;;  %v5056_v4 = vpack.i.b16 %v579_v55, %v579_v55  ;;  %v601_v5 = vrot.slane %v5055_v57, %v6588_v50  ;;  %v5057_v13 = vpack.i.b16 %v580_v56, %v580_v56 }
  0xeb   :  { %v1433_v6 = vcombine.high %v1432_v62, %v1432_v62  ;;  %v1440_v7 = vrot.slane %v1432_v62, %v6573_v36  ;;  %v6599_v8 = vpack.c.bf16 %v273_v63, %v272_v61  ;;  %v591_v15 = vpack.i.b16 %v583_v60, %v583_v60 }
  0xec   :  { %v5589_v10 = vpop.f32.mrf.mxu1  ;;  %v609_v11 = vrot.slane %v5056_v4, %v6588_v50  ;;  %v631_v12 = vpack.i.b16 %v601_v5, %v601_v5  ;;  %v5058_v14 = vpack.i.b16 %v581_v0, %v581_v0  ;;  %v554_v18 = vmul.f32 2.0, %v472_v3 }
  0xed   :  { %v6605_v16 = vrot.slane %v1433_v6, %v6573_v36  ;;  %v1451_v17 = vunpack.i.h.s16 %v1440_v7  ;;  %v5029_v19 = vmul.bf16 3216621497, %v6599_v8  ;;  %v617_v27 = vrot.slane %v5057_v13, %v6588_v50 }
  0xee   :  { %v545_v20 = vpop.f32.mrf.mxu1  ;;  %v645_v25 = vpack.i.b16 %v609_v11, %v609_v11  ;;  %v6609_v26 = vrot.slane %v631_v12, %v6588_v50  ;;  %v5080_v28 = vpack.i.b16 %v1440_v7, %v1440_v7  ;;  %v625_v31 = vrot.slane %v5058_v14, %v6588_v50 }
  0xef   :  { %v1459_v29 = vpack.i.b16 %v1451_v17, %v1451_v17  ;;  %v552_v30 = vrot.slane %v545_v20, %v6588_v50  ;;  %6025 = vpow.bf16 %v5029_v19  ;;  %v659_v39 = vpack.i.b16 %v617_v27, %v617_v27 }
  0xf0   :  { %v5594_v32 = vpop.f32.mrf.mxu1  ;;  %v6615_v34 = vrot.slane %v645_v25, %v6588_v50  ;;  %v686_v37 = vadd.bf16 %v6609_v26, %v6595_v2  ;;  %v673_v42 = vpack.i.b16 %v625_v31, %v625_v31  ;;  %v605_v43 = vrot.slane %v591_v15, %v6588_v50 }
  0xf1   :  { %v553_v41 = vadd.f32 %v552_v30, %v478_v24  ;;  %v585_v44 = vunpack.i.h.s16 %v579_v55  ;;  %v6623_v46 = vrot.slane %v659_v39, %v6588_v50  ;;  %v587_v47 = vunpack.i.h.s16 %v580_v56 }
  0xf2   :  { %v688_v45 = vadd.bf16 %v6615_v34, %v6595_v2  ;;  %v589_v48 = vunpack.i.h.s16 %v581_v0  ;;  %v6626_v51 = vrot.slane %v673_v42, %v6588_v50  ;;  %v638_v52 = vpack.i.b16 %v605_v43, %v605_v43 }
  0xf3   :  { %v555_v49 = vsub.f32 %v553_v41, %v554_v18  ;;  %v593_v53 = vpack.i.b16 %v585_v44, %v585_v44  ;;  %v690_v54 = vadd.bf16 %v6623_v46, %v6595_v2  ;;  %v595_v57 = vpack.i.b16 %v587_v47, %v587_v47 }
  0xf4   :  { %v597_v59 = vpack.i.b16 %v589_v48, %v589_v48  ;;  %v1469_v55 = vrot.slane %v5080_v28, %v6588_v50  ;;  %v692_v61 = vadd.bf16 %v6626_v51, %v6595_v2  ;;  %v6634_v56 = vrot.slane %v638_v52, %v6588_v50 }
  0xf5   :  { %v556_v60 = vmax.f32 %v555_v49, 0.0  ;;  %v613_v62 = vrot.slane %v593_v53, %v6588_v50  ;;  %v621_v63 = vrot.slane %v595_v57, %v6588_v50  ;;  %v1473_v4 = vrot.slane %v1459_v29, %v6588_v50 }
  0xf6   :  { %v629_v0 = vrot.slane %v597_v59, %v6588_v50  ;;  %v1499_v3 = vpack.i.b16 %v1469_v55, %v1469_v55  ;;  %v687_v6 = vadd.bf16 %v6634_v56, %v6595_v2  ;;  %v5081_v11 = vpack.i.b16 %v6605_v16, %v6605_v16 }
  0xf7   :  { %v694_v5 = vpack.c.bf16 %v556_v60, %v556_v60  ;;  %v652_v10 = vpack.i.b16 %v613_v62, %v613_v62  ;;  %v666_v12 = vpack.i.b16 %v621_v63, %v621_v63  ;;  %v1506_v15 = vpack.i.b16 %v1473_v4, %v1473_v4 }
  0xf8   :  { %v680_v13 = vpack.i.b16 %v629_v0, %v629_v0  ;;  %v6645_v14 = vrot.slane %v1499_v3, %v6588_v50  ;;  %v1448_v17 = vcombine.high %v1440_v7, %v1440_v7  ;;  %v1477_v20 = vrot.slane %v5081_v11, %v6588_v50 }
  0xf9   :  { %v696_v18 = vpack.i.b16 %v694_v5, %v694_v5  ;;  %v6648_v19 = vrot.slane %v652_v10, %v6588_v50  ;;  %v6652_v24 = vrot.slane %v666_v12, %v6588_v50  ;;  %v6660_v28 = vrot.slane %v1506_v15, %v6588_v50 }
  0xfa   :  { %v6655_v25 = vrot.slane %v680_v13, %v6588_v50  ;;  %v1554_v27 = vadd.bf16 %v6645_v14, %v6601_v9  ;;  %v1449_v7 = vcombine.high %v6605_v16, %v6605_v16  ;;  %v705_v41 = vshrl.u32 %v694_v5, 16 }
  0xfb   :  { %v718_v29 = vrot.slane %v696_v18, %v6576_v38  ;;  %v701_v30 = vrot.slane %v696_v18, %v6588_v50  ;;  %v689_v31 = vadd.bf16 %v6648_v19, %v6595_v2  ;;  %v691_v32 = vadd.bf16 %v6652_v24, %v6595_v2 }
  0xfc   :  { %v693_v39 = vadd.bf16 %v6655_v25, %v6595_v2  ;;  %v6673_v42 = vsub.s32 3, %v6570_v35  ;;  %v1453_v43 = vunpack.i.h.s16 %v6605_v16  ;;  %v732_v47 = vrot.slane %v696_v18, %v6592_v58 }
  0xfd   :  { %720 = vbcast.lane.c.b16.xlu1 %v718_v29, 256  ;;  %703 = vbcast.lane.c.b16.xlu0 %v701_v30, 256  ;;  %v6026_v44 = vpop.eup %6025  ;;  %v1555_v48 = vadd.bf16 %v6660_v28, %v6601_v9  ;;  %v1513_v49 = vpack.i.b16 %v1477_v20, %v1477_v20  ;;  %v5082_v52 = vpack.i.b16 %v1448_v17, %v1448_v17  ;;  %v1455_v59 = vunpack.i.h.s16 %v1448_v17 }
  0xfe   :  { %v279_v53 = vadd.bf16 1065369472, %v6026_v44  ;;  %v1461_v57 = vpack.i.b16 %v1453_v43, %v1453_v43  ;;  %v5083_v55 = vpack.i.b16 %v1449_v7, %v1449_v7  ;;  %v1457_v63 = vunpack.i.h.s16 %v1449_v7 }
  0xff   :  { %v6680_v60 = vrot.slane %v1513_v49, %v6588_v50  ;;  %v1485_v62 = vrot.slane %v5082_v52, %v6588_v50  ;;  %v1463_v0 = vpack.i.b16 %v1455_v59, %v1455_v59  ;;  %v706_v4 = vpack.i.b16 %v705_v41, %v705_v41 }
 0x100   :  { %6027 = vrcp.bf16 %v279_v53  ;;  %v1481_v16 = vrot.slane %v1461_v57, %v6588_v50  ;;  %v1493_v3 = vrot.slane %v5083_v55, %v6588_v50  ;;  %v1465_v11 = vpack.i.b16 %v1457_v63, %v1457_v63 }
 0x101   :  { %734 = vbcast.lane.c.b16.xlu1 %v732_v47, 256  ;;  %v1556_v5 = vadd.bf16 %v6680_v60, %v6601_v9  ;;  %v1527_v10 = vpack.i.b16 %v1485_v62, %v1485_v62  ;;  %v746_v12 = vrot.slane %v696_v18, %v6673_v42  ;;  %v1489_v15 = vrot.slane %v1463_v0, %v6588_v50  ;;  %v6314_v60 = vld [vmem:[%s8068_s2 + $0xb8] sm:$0xff]  }
 0x102   :  { %v1520_v13 = vpack.i.b16 %v1481_v16, %v1481_v16  ;;  %v1541_v17 = vpack.i.b16 %v1493_v3, %v1493_v3  ;;  %v1497_v7 = vrot.slane %v1465_v11, %v6588_v50  ;;  %v711_v44 = vrot.slane %v706_v4, %v6588_v50  ;;  %v32_v3 = vld [vmem:[%s8066_s0 + $0x8] sm:$0xff] }
 0x103   :  { %v6690_v20 = vrot.slane %v1527_v10, %v6588_v50  ;;  %v1534_v30 = vpack.i.b16 %v1489_v15, %v1489_v15  ;;  %v725_v55 = vrot.slane %v706_v4, %v6576_v38  ;;  %v739_v63 = vrot.slane %v706_v4, %v6592_v58 }
 0x104   :  { %v6694_v29 = vrot.slane %v1520_v13, %v6588_v50  ;;  %v6697_v41 = vrot.slane %v1541_v17, %v6588_v50  ;;  %v1548_v43 = vpack.i.b16 %v1497_v7, %v1497_v7  ;;  %v753_v10 = vrot.slane %v706_v4, %v6673_v42 }
 0x105   :  { %748 = vbcast.lane.c.b16.xlu1 %v746_v12, 256  ;;  %v6705_v49 = vrot.slane %v1534_v30, %v6588_v50  ;;  %v1344_v11 = vmul.f32 %v32_v3, %v32_v3 }
 0x106   :  { %v6710_v53 = vrot.slane %v1548_v43, %v6588_v50 }
 0x109   :  { %713 = vbcast.lane.c.b16.xlu1 %v711_v44, 256 }
 0x10d   :  { %727 = vbcast.lane.c.b16.xlu1 %v725_v55, 256 }
 0x10e   :  { %v6028_v62 = vpop.eup %6027 }
 0x10f   :  { %v281_v16 = vmul.bf16 1065369472, %v6028_v62 }
 0x111   :  { %741 = vbcast.lane.c.b16.xlu1 %v739_v63, 256  ;;  %v282_v0 = vmul.bf16 %v281_v16, %v6599_v8  ;;  %v36_v8 = vpack.c.bf16 %v6581_v40, %v6581_v40 }
 0x113   :  { %5582 = vmatmul.mubr.bf16.vlgmr.msra.gmra.mxu0 %v282_v0  ;;  %v758_v4 = vpack.i.b16 %v36_v8, %v36_v8  ;;  %v780_v12 = vshrl.u32 %v36_v8, 16 }
 0x114   :  { %5625 = vmatpush3.xpose.msra.mxu0 %v32_v3  ;;  %5626 = vmatprep.mubr.msk.f32.mxu0 %vm6383_vm0, %v8078_v1 }
 0x115   :  { %755 = vbcast.lane.c.b16.xlu1 %v753_v10, 256  ;;  %5629 = vmatprep.subr.mxu0 %v8078_v1  ;;  %v6736_v13 = vrot.slane %v758_v4, %v6588_v50  ;;  %v6738_v15 = vpack.i.b16 %v780_v12, %v780_v12 }
 0x117   :  { %v6742_v30 = vrot.slane %v6738_v15, %v6588_v50 }
 0x11b   :  { %5627 = vmatmul.mubr.f32.vlgmr.msra.gmra.mxu0 %v32_v3 }
 0x11c   :  { %1345 = vadd.xlane.f32.xlu0 %v1344_v11  ;;  %5630 = vmatpush3.xpose.msra.mxu0 %v1344_v11 }
 0x11d   :  { %5631 = vmatprep.mubr.msk.f32.mxu0 %vm6383_vm0, %v8078_v1  ;;  %5658 = vmatprep.subr.mxu0 %v8078_v1 }
 0x11f   :  { %5632 = vmatmul.mubr.f32.vlgmr.msra.gmra.mxu0 %v8076_v22 }
 0x120   :  { %5659 = vmatpush3.msra.mxu0 %v32_v3  ;;  %5660 = vmatprep.mubr.msk.f32.mxu0 %vm6383_vm0, %v8078_v1 }
 0x121   :  { %5663 = vmatprep.subr.bf16.mxu0 %v8078_v1 }
 0x16f   :  { %v721_v17 = vpop.permute.xlu1 %720  ;;  %v704_v7 = vpop.permute.xlu0 %703 }
 0x170   :  { %v766_v43 = vmul.bf16 %v6736_v13, %v721_v17  ;;  %v764_v44 = vmul.bf16 %v6736_v13, %v704_v7 }
 0x172   :  { %v772_v55 = vadd.bf16 %v764_v44, %v686_v37  ;;  %v774_v62 = vadd.bf16 %v766_v43, %v688_v45 }
 0x173   :  { %v735_v63 = vpop.permute.xlu1 %734 }
 0x174   :  { %v6753_v16 = vadd.bf16 %v6742_v30, %v772_v55  ;;  %v768_v0 = vmul.bf16 %v6736_v13, %v735_v63  ;;  %v6757_v3 = vadd.bf16 %v6742_v30, %v774_v62 }
 0x176   :  { %v776_v10 = vadd.bf16 %v768_v0, %v690_v54  ;;  %v5059_v26 = vmul.bf16 3216621497, %v6753_v16  ;;  %v5061_v34 = vmul.bf16 3216621497, %v6757_v3 }
 0x177   :  { %v749_v11 = vpop.permute.xlu1 %748 }
 0x178   :  { %v770_v37 = vmul.bf16 %v6736_v13, %v749_v11  ;;  %v6766_v45 = vadd.bf16 %v6742_v30, %v776_v10  ;;  %6029 = vpow.bf16 %v5059_v26 }
 0x179   :  { %6031 = vpow.bf16 %v5061_v34 }
 0x17a   :  { %v778_v8 = vadd.bf16 %v770_v37, %v692_v61  ;;  %v5063_v54 = vmul.bf16 3216621497, %v6766_v45 }
 0x17b   :  { %v714_v4 = vpop.permute.xlu1 %713 }
 0x17c   :  { %v765_v12 = vmul.bf16 %v6736_v13, %v714_v4  ;;  %v6777_v17 = vadd.bf16 %v6742_v30, %v778_v8  ;;  %6033 = vpow.bf16 %v5063_v54 }
 0x17e   :  { %v773_v46 = vadd.bf16 %v765_v12, %v687_v6  ;;  %v5065_v56 = vmul.bf16 3216621497, %v6777_v17 }
 0x17f   :  { %v728_v7 = vpop.permute.xlu1 %727 }
 0x180   :  { %v788_v43 = vadd.bf16 %v6742_v30, %v773_v46  ;;  %v767_v51 = vmul.bf16 %v6736_v13, %v728_v7 }
 0x182   :  { %v5060_v61 = vmul.bf16 3216621497, %v788_v43  ;;  %v775_v44 = vadd.bf16 %v767_v51, %v689_v31 }
 0x183   :  { %v742_v6 = vpop.permute.xlu1 %741 }
 0x184   :  { %6035 = vpow.bf16 %v5060_v61  ;;  %v790_v55 = vadd.bf16 %v6742_v30, %v775_v44  ;;  %v769_v62 = vmul.bf16 %v6736_v13, %v742_v6 }
 0x185   :  { %6037 = vpow.bf16 %v5065_v56 }
 0x186   :  { %v5062_v63 = vmul.bf16 3216621497, %v790_v55  ;;  %v777_v0 = vadd.bf16 %v769_v62, %v691_v32  ;;  %v6030_v11 = vpop.eup %6029 }
 0x187   :  { %v756_v10 = vpop.permute.xlu1 %755  ;;  %v6032_v8 = vpop.eup %6031  ;;  %v827_v4 = vadd.bf16 1065369472, %v6030_v11 }
 0x188   :  { %6039 = vpow.bf16 %v5062_v63  ;;  %v792_v19 = vadd.bf16 %v6742_v30, %v777_v0  ;;  %v771_v31 = vmul.bf16 %v6736_v13, %v756_v10  ;;  %v829_v32 = vadd.bf16 1065369472, %v6032_v8 }
 0x18a   :  { %v5064_v26 = vmul.bf16 3216621497, %v792_v19  ;;  %v779_v37 = vadd.bf16 %v771_v31, %v693_v39  ;;  %v6034_v12 = vpop.eup %6033 }
 0x18b   :  { %v831_v7 = vadd.bf16 1065369472, %v6034_v12 }
 0x18c   :  { %6041 = vpow.bf16 %v5064_v26  ;;  %v794_v34 = vadd.bf16 %v6742_v30, %v779_v37 }
 0x18e   :  { %v5066_v24 = vmul.bf16 3216621497, %v794_v34 }
 0x190   :  { %6043 = vpow.bf16 %v5066_v24 }
 0x191   :  { %6045 = vrcp.bf16 %v827_v4 }
 0x192   :  { %v6036_v46 = vpop.eup %6035  ;;  %6047 = vrcp.bf16 %v829_v32 }
 0x193   :  { %v828_v54 = vadd.bf16 1065369472, %v6036_v46  ;;  %v6038_v51 = vpop.eup %6037 }
 0x194   :  { %v833_v2 = vadd.bf16 1065369472, %v6038_v51 }
 0x195   :  { %6049 = vrcp.bf16 %v828_v54 }
 0x196   :  { %v6040_v61 = vpop.eup %6039  ;;  %6051 = vrcp.bf16 %v831_v7 }
 0x197   :  { %v830_v44 = vadd.bf16 1065369472, %v6040_v61 }
 0x199   :  { %6053 = vrcp.bf16 %v830_v44 }
 0x19a   :  { %v6042_v25 = vpop.eup %6041  ;;  %6055 = vrcp.bf16 %v833_v2 }
 0x19b   :  { %v832_v39 = vadd.bf16 1065369472, %v6042_v25 }
 0x19d   :  { %6057 = vrcp.bf16 %v832_v39 }
 0x19e   :  { %v6044_v56 = vpop.eup %6043 }
 0x19f   :  { %v6046_v6 = vpop.eup %6045  ;;  %v834_v62 = vadd.bf16 1065369472, %v6044_v56 }
 0x1a0   :  { %v6048_v63 = vpop.eup %6047  ;;  %v836_v0 = vmul.bf16 1065369472, %v6046_v6 }
 0x1a1   :  { %6059 = vrcp.bf16 %v834_v62  ;;  %v840_v26 = vmul.bf16 1065369472, %v6048_v63 }
 0x1a2   :  { %v851_v37 = vmul.bf16 %v836_v0, %v6753_v16  ;;  %v6313_v16 = vld [vmem:[%s8066_s0] sm:$0xff] }
 0x1a3   :  { %v6050_v10 = vpop.eup %6049  ;;  %v853_v46 = vmul.bf16 %v840_v26, %v6757_v3 }
 0x1a4   :  { %v838_v31 = vmul.bf16 1065369472, %v6050_v10  ;;  %v6052_v11 = vpop.eup %6051 }
 0x1a5   :  { %v844_v7 = vmul.bf16 1065369472, %v6052_v11 }
 0x1a6   :  { %v852_v8 = vmul.bf16 %v838_v31, %v788_v43 }
 0x1a7   :  { %v6054_v4 = vpop.eup %6053  ;;  %v855_v2 = vmul.bf16 %v844_v7, %v6766_v45 }
 0x1a8   :  { %v842_v24 = vmul.bf16 1065369472, %v6054_v4  ;;  %v5067_v32 = vcombine.low %v851_v37, %v852_v8  ;;  %v6056_v12 = vpop.eup %6055  ;;  %v1346_v37 = vpop.xlane.xlu0 %1345 }
 0x1a9   :  { %v848_v39 = vmul.bf16 1065369472, %v6056_v12 }
 0x1aa   :  { %v854_v54 = vmul.bf16 %v842_v24, %v790_v55  ;;  %5611 = vmatprep.mubr.bf16.mxu1 %v5067_v32 }
 0x1ab   :  { %v6058_v51 = vpop.eup %6057  ;;  %v857_v3 = vmul.bf16 %v848_v39, %v6777_v17 }
 0x1ac   :  { %v5068_v61 = vcombine.low %v853_v46, %v854_v54  ;;  %v846_v44 = vmul.bf16 1065369472, %v6058_v51 }
 0x1ae   :  { %5612 = vmatmul.mubr.bf16.vlgmr.msra.gmra.mxu1 %v5068_v61  ;;  %v856_v25 = vmul.bf16 %v846_v44, %v792_v19  ;;  %v6808_v19 = vrot.slane %v6581_v40, %v6592_v58 }
 0x1af   :  { %v6060_v56 = vpop.eup %6059  ;;  %5620 = vmatpush3.msra.mxu1 %v6313_v16 }
 0x1b0   :  { %v5069_v43 = vcombine.low %v855_v2, %v856_v25  ;;  %v850_v6 = vmul.bf16 1065369472, %v6060_v56  ;;  %5634 = vmatprep.subr.bf16.mxu1 %v6534_v23 }
 0x1b2   :  { %5615 = vmatprep.mubr.bf16.mxu1 %v5069_v43  ;;  %v858_v55 = vmul.bf16 %v850_v6, %v794_v34 }
 0x1b4   :  { %v5070_v62 = vcombine.low %v857_v3, %v858_v55 }
 0x1b6   :  { %5616 = vmatmul.mubr.bf16.gmra.mxu1 %v5070_v62 }
 0x1b7   :  { %5621 = vmatprep.mubr.msk.f32.mxu1 %vm6383_vm0, %v8078_v1 }
 0x1d3   :  { %v386_v45 = vpop.f32.mrf.mxu0 }
 0x1d4   :  { %v387_v10 = vadd.f32 %v386_v45, %v6808_v19 }
 0x1d5   :  { %v5583_v63 = vpop.f32.mrf.mxu0 }
 0x1d7   :  { %v389_v0 = vpop.f32.mrf.mxu0 }
 0x1d8   :  { %v390_v23 = vadd.f32 %v389_v0, %v6808_v19 }
 0x1d9   :  { %v5584_v31 = vpop.f32.mrf.mxu0 }
 0x1da   :  { %v6812_v11 = vpack.c.bf16 %v390_v23, %v387_v10 }
 0x1db   :  { %v1340_v17 = vpop.f32.mrf.mxu0 }
 0x1dc   :  { %v1422_v8 = vmul.f32 2.0, %v1340_v17  ;;  %v5054_v2 = vmul.bf16 3216621497, %v6812_v11 }
 0x1dd   :  { %v5628_v34 = vpop.f32.mrf.mxu0 }
 0x1de   :  { %6061 = vpow.bf16 %v5054_v2 }
 0x1df   :  { %v1413_v26 = vpop.f32.mrf.mxu0 }
 0x1e0   :  { %v1420_v4 = vrot.slane %v1413_v26, %v6588_v50 }
 0x1e1   :  { %v5633_v24 = vpop.f32.mrf.mxu0 }
 0x1e2   :  { %v1421_v32 = vadd.f32 %v1420_v4, %v1346_v37 }
 0x1e4   :  { %v1423_v40 = vsub.f32 %v1421_v32, %v1422_v8 }
 0x1e6   :  { %v1424_v12 = vmax.f32 %v1423_v40, 0.0 }
 0x1e8   :  { %v1562_v46 = vpack.c.bf16 %v1424_v12, %v1424_v12 }
 0x1ea   :  { %v6815_v54 = vpack.i.b16 %v1562_v46, %v1562_v46  ;;  %v1573_v7 = vshrl.u32 %v1562_v46, 16 }
 0x1ec   :  { %v6817_v51 = vpack.i.b16 %v1573_v7, %v1573_v7  ;;  %v1569_v61 = vrot.slane %v6815_v54, %v6588_v50  ;;  %v6062_v28 = vpop.eup %6061 }
 0x1ed   :  { %v398_v4 = vadd.bf16 1065369472, %v6062_v28 }
 0x1ee   :  { %1571 = vbcast.lane.c.b16.xlu1 %v1569_v61, 256  ;;  %v1579_v44 = vrot.slane %v6817_v51, %v6588_v50 }
 0x1f0   :  { %1581 = vbcast.lane.c.b16.xlu0 %v1579_v44, 256 }
 0x260   :  { %v1572_v25 = vpop.permute.xlu1 %1571 }
 0x261   :  { %v1625_v39 = vmul.bf16 %v1572_v25, %v6736_v13 }
 0x262   :  { %v1582_v56 = vpop.permute.xlu0 %1581 }
 0x263   :  { %v1633_v16 = vadd.bf16 %v1625_v39, %v1554_v27  ;;  %v1626_v43 = vmul.bf16 %v1582_v56, %v6736_v13 }
 0x265   :  { %v6830_v6 = vadd.bf16 %v1633_v16, %v6742_v30  ;;  %v1634_v3 = vadd.bf16 %v1626_v43, %v1555_v48 }
 0x267   :  { %v5084_v55 = vmul.bf16 3216621497, %v6830_v6  ;;  %v6837_v62 = vadd.bf16 %v1634_v3, %v6742_v30 }
 0x269   :  { %6063 = vpow.bf16 %v5084_v55  ;;  %v5085_v45 = vmul.bf16 3216621497, %v6837_v62 }
 0x26b   :  { %6065 = vpow.bf16 %v5085_v45 }
 0x26e   :  { %v5613_v14 = vpop.f32.mrf.mxu1 }
 0x26f   :  { %v926_v27 = vadd.f32 %v5613_v14, %v6808_v19 }
 0x270   :  { %v917_v63 = vpop.f32.mrf.mxu1 }
 0x271   :  { %v6841_v0 = vpack.c.bf16 %v926_v27, %v926_v27  ;;  %v918_v10 = vadd.f32 %v917_v63, %v6808_v19 }
 0x272   :  { %v5614_v23 = vpop.f32.mrf.mxu1 }
 0x273   :  { %v5073_v48 = vmul.bf16 3216621497, %v6841_v0  ;;  %v6845_v31 = vpack.c.bf16 %v918_v10, %v918_v10  ;;  %v929_v17 = vadd.f32 %v5614_v23, %v6808_v19 }
 0x274   :  { %v920_v34 = vpop.f32.mrf.mxu1 }
 0x275   :  { %6067 = vpow.bf16 %v5073_v48  ;;  %v5071_v26 = vmul.bf16 3216621497, %v6845_v31  ;;  %v6849_v37 = vpack.c.bf16 %v929_v17, %v929_v17  ;;  %v921_v8 = vadd.f32 %v920_v34, %v6808_v19 }
 0x276   :  { %v5617_v24 = vpop.f32.mrf.mxu1 }
 0x277   :  { %6069 = vpow.bf16 %v5071_v26  ;;  %v5074_v32 = vmul.bf16 3216621497, %v6849_v37  ;;  %v6853_v40 = vpack.c.bf16 %v921_v8, %v921_v8  ;;  %v942_v12 = vadd.f32 %v5617_v24, %v6808_v19  ;;  %v6064_v46 = vpop.eup %6063 }
 0x278   :  { %v933_v7 = vpop.f32.mrf.mxu1  ;;  %v1681_v61 = vadd.bf16 1065369472, %v6064_v46 }
 0x279   :  { %6071 = vpow.bf16 %v5074_v32  ;;  %v5072_v44 = vmul.bf16 3216621497, %v6853_v40  ;;  %v6857_v2 = vpack.c.bf16 %v942_v12, %v942_v12  ;;  %v6066_v25 = vpop.eup %6065  ;;  %v934_v39 = vadd.f32 %v933_v7, %v6808_v19 }
 0x27a   :  { %6073 = vrcp.bf16 %v398_v4  ;;  %v5618_v56 = vpop.f32.mrf.mxu1  ;;  %v1682_v16 = vadd.bf16 1065369472, %v6066_v25 }
 0x27b   :  { %6075 = vrcp.bf16 %v1681_v61  ;;  %v5077_v43 = vmul.bf16 3216621497, %v6857_v2  ;;  %v945_v3 = vadd.f32 %v5618_v56, %v6808_v19  ;;  %v6862_v55 = vpack.c.bf16 %v934_v39, %v934_v39 }
 0x27c   :  { %6077 = vpow.bf16 %v5072_v44  ;;  %v936_v45 = vpop.f32.mrf.mxu1 }
 0x27d   :  { %6079 = vrcp.bf16 %v1682_v16  ;;  %v6864_v14 = vpack.c.bf16 %v945_v3, %v945_v3  ;;  %v937_v27 = vadd.f32 %v936_v45, %v6808_v19  ;;  %v5075_v63 = vmul.bf16 3216621497, %v6862_v55 }
 0x27e   :  { %6081 = vpow.bf16 %v5077_v43 }
 0x27f   :  { %v5078_v10 = vmul.bf16 3216621497, %v6864_v14  ;;  %v6869_v23 = vpack.c.bf16 %v937_v27, %v937_v27  ;;  %6083 = vpow.bf16 %v5075_v63 }
 0x281   :  { %6085 = vpow.bf16 %v5078_v10  ;;  %v5076_v28 = vmul.bf16 3216621497, %v6869_v23 }
 0x283   :  { %v6068_v48 = vpop.eup %6067  ;;  %6087 = vpow.bf16 %v5076_v28 }
 0x284   :  { %v990_v17 = vadd.bf16 1065369472, %v6068_v48 }
 0x285   :  { %v6070_v34 = vpop.eup %6069 }
 0x286   :  { %6089 = vrcp.bf16 %v990_v17  ;;  %v988_v26 = vadd.bf16 1065369472, %v6070_v34 }
 0x287   :  { %v6072_v8 = vpop.eup %6071 }
 0x288   :  { %v6074_v4 = vpop.eup %6073  ;;  %6091 = vrcp.bf16 %v988_v26  ;;  %v991_v24 = vadd.bf16 1065369472, %v6072_v8 }
 0x289   :  { %v6076_v32 = vpop.eup %6075  ;;  %v400_v16 = vmul.bf16 1065369472, %v6074_v4 }
 0x28a   :  { %v6078_v12 = vpop.eup %6077  ;;  %6093 = vrcp.bf16 %v991_v24  ;;  %v1690_v46 = vmul.bf16 1065369472, %v6076_v32 }
 0x28b   :  { %v6080_v7 = vpop.eup %6079  ;;  %v989_v61 = vadd.bf16 1065369472, %v6078_v12  ;;  %v6881_v48 = vmul.bf16 %v400_v16, %v6812_v11 }
 0x28c   :  { %v6082_v44 = vpop.eup %6081  ;;  %v1692_v25 = vmul.bf16 1065369472, %v6080_v7  ;;  %v6873_v43 = vmul.bf16 %v1690_v46, %v6830_v6  ;;  %v6885_v6 = vrot.slane %v6738_v15, %v6576_v38 }
 0x28d   :  { %6095 = vrcp.bf16 %v989_v61  ;;  %v994_v39 = vadd.bf16 1065369472, %v6082_v44  ;;  %v6084_v56 = vpop.eup %6083  ;;  %v6888_v8 = vunpack.c.l.bf16 %v6881_v48 }
 0x28e   :  { %v6876_v3 = vmul.bf16 %v1692_v25, %v6837_v62  ;;  %v992_v27 = vadd.bf16 1065369472, %v6084_v56 }
 0x28f   :  { %v6086_v45 = vpop.eup %6085  ;;  %6097 = vrcp.bf16 %v994_v39  ;;  %v1250_v61 = vrot.slane %v6888_v8, 2  ;;  %v1251_v15 = vrot.slane %v6888_v8, 3 }
 0x290   :  { %v995_v63 = vadd.bf16 1065369472, %v6086_v45  ;;  %v5092_v10 = vcombine.low %v6873_v43, %v6876_v3  ;;  %6099 = vrcp.bf16 %v992_v27  ;;  %v1254_v27 = vrot.slane %v6888_v8, 6 }
 0x291   :  { %v6088_v28 = vpop.eup %6087 }
 0x292   :  { %6101 = vrcp.bf16 %v995_v63  ;;  %v993_v17 = vadd.bf16 1065369472, %v6088_v28 }
 0x294   :  { %v6090_v34 = vpop.eup %6089  ;;  %6103 = vrcp.bf16 %v993_v17 }
 0x295   :  { %v1001_v62 = vmul.bf16 1065369472, %v6090_v34 }
 0x296   :  { %v6092_v26 = vpop.eup %6091 }
 0x297   :  { %v1014_v4 = vmul.bf16 %v1001_v62, %v6841_v0  ;;  %v997_v24 = vmul.bf16 1065369472, %v6092_v26  ;;  %v1249_v0 = vrot.slane %v6888_v8, 1 }
 0x298   :  { %v6094_v32 = vpop.eup %6093 }
 0x299   :  { %v1194_v12 = vunpack.c.l.bf16 %v1014_v4  ;;  %v1012_v11 = vmul.bf16 %v997_v24, %v6845_v31  ;;  %v1003_v46 = vmul.bf16 1065369472, %v6094_v32  ;;  %v1026_v7 = vmul.bf16 %v6885_v6, %v1014_v4 }
 0x29b   :  { %v6096_v44 = vpop.eup %6095  ;;  %v1212_v25 = vrot.slane %v1194_v12, 4  ;;  %v1192_v39 = vunpack.c.l.bf16 %v1012_v11  ;;  %v1015_v56 = vmul.bf16 %v1003_v46, %v6849_v37  ;;  %v1034_v16 = vunpack.c.l.bf16 %v1026_v7 }
 0x29c   :  { %v999_v45 = vmul.bf16 1065369472, %v6096_v44  ;;  %v1024_v31 = vmul.bf16 %v6885_v6, %v1012_v11  ;;  %v1252_v37 = vrot.slane %v6888_v8, 4 }
 0x29d   :  { %v6098_v63 = vpop.eup %6097  ;;  %v1213_v28 = vadd.f32 %v1212_v25, %v1194_v12  ;;  %v1200_v17 = vrot.slane %v1192_v39, 4  ;;  %v1195_v34 = vunpack.c.l.bf16 %v1015_v56  ;;  %1044 = vadd.xlane.f32.xlu0 %v1034_v16  ;;  %v1027_v62 = vmul.bf16 %v6885_v6, %v1015_v56 }
 0x29e   :  { %v1013_v26 = vmul.bf16 %v999_v45, %v6853_v40  ;;  %v1009_v4 = vmul.bf16 1065369472, %v6098_v63  ;;  %v1032_v24 = vunpack.c.l.bf16 %v1024_v31  ;;  %v6100_v32 = vpop.eup %6099 }
 0x29f   :  { %v1214_v46 = vrot.slane %v1213_v28, 2  ;;  %v1201_v7 = vadd.f32 %v1200_v17, %v1192_v39  ;;  %v1218_v44 = vrot.slane %v1195_v34, 4  ;;  %v1035_v22 = vunpack.c.l.bf16 %v1027_v62 }
 0x2a0   :  { %v6102_v1 = vpop.eup %6101  ;;  %v1193_v11 = vunpack.c.l.bf16 %v1013_v26  ;;  %v1018_v12 = vmul.bf16 %v1009_v4, %v6857_v2  ;;  %v1005_v25 = vmul.bf16 1065369472, %v6100_v32  ;;  %1040 = vadd.xlane.f32.xlu1 %v1032_v24  ;;  %v1025_v16 = vmul.bf16 %v6885_v6, %v1013_v26 }
 0x2a1   :  { %v1215_v56 = vadd.f32 %v1214_v46, %v1213_v28  ;;  %v1202_v59 = vrot.slane %v1201_v7, 2  ;;  %v1219_v40 = vadd.f32 %v1218_v44, %v1195_v34  ;;  %v1011_v45 = vmul.bf16 1065369472, %v6102_v1 }
 0x2a2   :  { %v6104_v63 = vpop.eup %6103  ;;  %v1206_v52 = vrot.slane %v1193_v11, 4  ;;  %v1198_v31 = vunpack.c.l.bf16 %v1018_v12  ;;  %v1016_v57 = vmul.bf16 %v1005_v25, %v6862_v55  ;;  %v1033_v39 = vunpack.c.l.bf16 %v1025_v16 }
 0x2a3   :  { %v1216_v17 = vrot.slane %v1215_v56, 1  ;;  %v1203_v62 = vadd.f32 %v1202_v59, %v1201_v7  ;;  %v1220_v18 = vrot.slane %v1219_v40, 2  ;;  %v6906_v47 = vmul.bf16 %v1011_v45, %v6864_v14 }
 0x2a4   :  { %v1207_v2 = vadd.f32 %v1206_v52, %v1193_v11  ;;  %v1236_v4 = vrot.slane %v1198_v31, 4  ;;  %v1196_v24 = vunpack.c.l.bf16 %v1016_v57  ;;  %v1007_v26 = vmul.bf16 1065369472, %v6104_v63  ;;  %1042 = vadd.xlane.f32.xlu0 %v1033_v39  ;;  %1046 = vadd.xlane.f32.xlu1 %v1035_v22 }
 0x2a5   :  { %v1217_v28 = vadd.f32 %v1216_v17, %v1215_v56  ;;  %v1204_v1 = vrot.slane %v1203_v62, 1  ;;  %v1221_v34 = vadd.f32 %v1220_v18, %v1219_v40  ;;  %v1199_v32 = vunpack.c.l.bf16 %v6906_v47 }
 0x2a6   :  { %v1208_v46 = vrot.slane %v1207_v2, 2  ;;  %v1237_v55 = vadd.f32 %v1236_v4, %v1198_v31  ;;  %v1224_v44 = vrot.slane %v1196_v24, 4  ;;  %v1017_v59 = vmul.bf16 %v1007_v26, %v6869_v23 }
 0x2a7   :  { %v1266_v7 = vsub.f32 %v1217_v28, %v1250_v61  ;;  %v1205_v25 = vadd.f32 %v1204_v1, %v1203_v62  ;;  %v1222_v14 = vrot.slane %v1221_v34, 1  ;;  %v1242_v16 = vrot.slane %v1199_v32, 4 }
 0x2a8   :  { %v1209_v52 = vadd.f32 %v1208_v46, %v1207_v2  ;;  %v1238_v11 = vrot.slane %v1237_v55, 2  ;;  %v1225_v45 = vadd.f32 %v1224_v44, %v1196_v24  ;;  %v1197_v63 = vunpack.c.l.bf16 %v1017_v59 }
 0x2a9   :  { %v1264_v22 = vsub.f32 %v1205_v25, %v6888_v8  ;;  %v1223_v56 = vadd.f32 %v1222_v14, %v1221_v34  ;;  %v1243_v39 = vadd.f32 %v1242_v16, %v1199_v32  ;;  %v1255_v18 = vrot.slane %v6888_v8, 7 }
 0x2aa   :  { %v1210_v40 = vrot.slane %v1209_v52, 1  ;;  %v1239_v17 = vadd.f32 %v1238_v11, %v1237_v55  ;;  %v1226_v31 = vrot.slane %v1225_v45, 2  ;;  %v1230_v4 = vrot.slane %v1197_v63, 4 }
 0x2ab   :  { %v1267_v23 = vsub.f32 %v1223_v56, %v1251_v15  ;;  %v1244_v61 = vrot.slane %v1243_v39, 2  ;;  %v1030_v62 = vmul.bf16 %v6885_v6, %v1018_v12  ;;  %v1028_v32 = vmul.bf16 %v6885_v6, %v1016_v57 }
 0x2ac   :  { %v1211_v2 = vadd.f32 %v1210_v40, %v1209_v52  ;;  %v1240_v24 = vrot.slane %v1239_v17, 1  ;;  %v1227_v26 = vadd.f32 %v1226_v31, %v1225_v45  ;;  %v1231_v28 = vadd.f32 %v1230_v4, %v1197_v63 }
 0x2ad   :  { %v1245_v1 = vadd.f32 %v1244_v61, %v1243_v39  ;;  %v1038_v34 = vunpack.c.l.bf16 %v1030_v62  ;;  %v2122_v15 = vrot.slane %v1266_v7, 6  ;;  %v1029_v12 = vmul.bf16 %v6885_v6, %v1017_v59 }
 0x2ae   :  { %v1265_v46 = vsub.f32 %v1211_v2, %v1249_v0  ;;  %v1241_v55 = vadd.f32 %v1240_v24, %v1239_v17  ;;  %v1228_v44 = vrot.slane %v1227_v26, 1  ;;  %v1232_v25 = vrot.slane %v1231_v28, 2 }
 0x2af   :  { %v1246_v14 = vrot.slane %v1245_v1, 1  ;;  %1052 = vadd.xlane.f32.xlu0 %v1038_v34  ;;  %v1036_v63 = vunpack.c.l.bf16 %v1028_v32  ;;  %v1037_v56 = vunpack.c.l.bf16 %v1029_v12  ;;  %v1031_v0 = vmul.bf16 %v6885_v6, %v6906_v47 }
 0x2b0   :  { %v2120_v16 = vrot.slane %v1265_v46, 7  ;;  %v1270_v52 = vsub.f32 %v1241_v55, %v1254_v27  ;;  %v1229_v11 = vadd.f32 %v1228_v44, %v1227_v26  ;;  %v1233_v45 = vadd.f32 %v1232_v25, %v1231_v28 }
 0x2b1   :  { %v1247_v57 = vadd.f32 %v1246_v14, %v1245_v1  ;;  %v2124_v39 = vrot.slane %v1267_v23, 5  ;;  %1050 = vadd.xlane.f32.xlu1 %v1037_v56  ;;  %v1253_v61 = vrot.slane %v6888_v8, 5  ;;  %v1039_v47 = vunpack.c.l.bf16 %v1031_v0 }
 0x2b2   :  { %v2121_v7 = vsel %vm1098_vm1, %v2120_v16, %v1264_v22  ;;  %v1268_v40 = vsub.f32 %v1229_v11, %v1252_v37  ;;  %v1234_v59 = vrot.slane %v1233_v45, 1  ;;  %v1586_v8 = vrot.slane %v6815_v54, %v6576_v38 }
 0x2b3   :  { %v1271_v17 = vsub.f32 %v1247_v57, %v1255_v18  ;;  %1048 = vadd.xlane.f32.xlu0 %v1036_v63  ;;  %v2123_v27 = vsel %vm1100_vm2, %v2122_v15, %v2121_v7  ;;  %v2130_v18 = vrot.slane %v1270_v52, 2  ;;  %v1593_v1 = vrot.slane %v6817_v51, %v6576_v38 }
 0x2b4   :  { %v2126_v31 = vrot.slane %v1268_v40, 4  ;;  %v1235_v4 = vadd.f32 %v1234_v59, %v1233_v45  ;;  %v2125_v62 = vsel %vm1102_vm3, %v2124_v39, %v2123_v27  ;;  %v1600_v34 = vrot.slane %v6815_v54, %v6592_v58 }
 0x2b5   :  { %1054 = vadd.xlane.f32.xlu1 %v1039_v47  ;;  %v2132_v24 = vrot.slane %v1271_v17, 1  ;;  %v1607_v32 = vrot.slane %v6817_v51, %v6592_v58  ;;  %v1614_v46 = vrot.slane %v6815_v54, %v6673_v42  ;;  %v1621_v55 = vrot.slane %v6817_v51, %v6673_v42 }
 0x2b6   :  { %v1269_v23 = vsub.f32 %v1235_v4, %v1253_v61  ;;  %v2127_v22 = vsel %vm1104_vm4, %v2126_v31, %v2125_v62  ;;  %v1065_v25 = vand.u32 127, %v268_v33 }
 0x2b8   :  { %v2128_v37 = vrot.slane %v1269_v23, 3  ;;  %v6949_v14 = vsub.s32 %v1065_v25, %v6570_v35 }
 0x2ba   :  { %v2129_v2 = vsel %vm1106_vm5, %v2128_v37, %v2127_v22 }
 0x2bb   :  { %v2131_v26 = vsel %vm1108_vm6, %v2130_v18, %v2129_v2 }
 0x2bc   :  { %v6933_v28 = vsel %vm1110_vm7, %v2132_v24, %v2131_v26  ;;  %v8082_v24 = vadd.bf16 %v6694_v29, %v6601_v9 }
 0x2c9   :  { %1588 = vbcast.lane.c.b16.xlu0 %v1586_v8, 256 }
 0x2cd   :  { %1595 = vbcast.lane.c.b16.xlu0 %v1593_v1, 256 }
 0x2d1   :  { %1602 = vbcast.lane.c.b16.xlu0 %v1600_v34, 256  ;;  %v8083_v34 = vadd.bf16 %v6690_v20, %v6601_v9 }
 0x2d5   :  { %1609 = vbcast.lane.c.b16.xlu0 %v1607_v32, 256 }
 0x2d9   :  { %1616 = vbcast.lane.c.b16.xlu0 %v1614_v46, 256 }
 0x2dd   :  { %1623 = vbcast.lane.c.b16.xlu0 %v1621_v55, 256 }
 0x326   :  { %v1045_v44 = vpop.xlane.xlu0 %1044 }
 0x327   :  { %v1077_v57 = vrot.slane %v1045_v44, %v6949_v14  ;;  %v6317_v44 = vld [vmem:[%s8068_s2 + $0xa0] sm:$0xff]  }
 0x329   :  { %v1041_v12 = vpop.xlane.xlu1 %1040 }
 0x32a   :  { %v1069_v52 = vrot.slane %v1041_v12, %v6949_v14 }
 0x32d   :  { %v1043_v15 = vpop.xlane.xlu0 %1042  ;;  %v1047_v54 = vpop.xlane.xlu1 %1046 }
 0x32e   :  { %v1073_v16 = vrot.slane %v1043_v15, %v6949_v14  ;;  %v1081_v63 = vrot.slane %v1047_v54, %v6949_v14  ;;  %v8084_v15 = vadd.bf16 %v6705_v49, %v6601_v9 }
 0x330   :  { %v1099_v11 = vsel %vm1098_vm1, %v1073_v16, %v1069_v52 }
 0x331   :  { %v1101_v51 = vsel %vm1100_vm2, %v1077_v57, %v1099_v11  ;;  %v6318_v11 = vld [vmem:[%s8068_s2 + $0x98] sm:$0xff]  }
 0x332   :  { %v1103_v7 = vsel %vm1102_vm3, %v1081_v63, %v1101_v51 }
 0x338   :  { %v1053_v45 = vpop.xlane.xlu0 %1052 }
 0x339   :  { %v1093_v40 = vrot.slane %v1053_v45, %v6949_v14  ;;  %v8085_v45 = vadd.bf16 %v6697_v41, %v6601_v9 }
 0x33a   :  { %v1051_v56 = vpop.xlane.xlu1 %1050 }
 0x33b   :  { %v1089_v39 = vrot.slane %v1051_v56, %v6949_v14 }
 0x33c   :  { %v1049_v33 = vpop.xlane.xlu0 %1048 }
 0x33d   :  { %v1085_v0 = vrot.slane %v1049_v33, %v6949_v14  ;;  %v6319_v33 = vld [vmem:[%s8068_s2 + $0x90] sm:$0xff]  }
 0x33e   :  { %v1055_v31 = vpop.xlane.xlu1 %1054 }
 0x33f   :  { %v1105_v59 = vsel %vm1104_vm4, %v1085_v0, %v1103_v7  ;;  %v1097_v62 = vrot.slane %v1055_v31, %v6949_v14  ;;  %v8087_v31 = vmov 0.0  }
 0x340   :  { %v1107_v17 = vsel %vm1106_vm5, %v1089_v39, %v1105_v59  ;;  %v1589_v27 = vpop.permute.xlu0 %1588  ;;  %v8086_v39 = vadd.bf16 %v6710_v53, %v6601_v9  ;;  %v6321_v9 = vld [vmem:[%s8068_s2 + $0x80] sm:$0xff]  }
 0x341   :  { %v1627_v4 = vmul.bf16 %v1589_v27, %v6736_v13  ;;  %v1109_v61 = vsel %vm1108_vm6, %v1093_v40, %v1107_v17 }
 0x342   :  { %v6970_v23 = vsel %vm1110_vm7, %v1097_v62, %v1109_v61 }
 0x343   :  { %v1635_v47 = vadd.bf16 %v1627_v4, %v1556_v5  ;;  %5622 = vmatmul.mubr.msk.f32.vlgmr.msra.gmra.mxu1 %vm1113_vm8, %v6970_v23  ;;  %v6315_v5 = vld [vmem:[%s8068_s2 + $0xb0] sm:$0xff]  }
 0x344   :  { %v1596_v22 = vpop.permute.xlu0 %1595  ;;  %5650 = vmatprep.mubr.bf16.mxu1 %v5092_v10  ;;  %5635 = vmatpush3.bf16.msra.mxu1 %v6314_v60  ;;  %v6316_v10 = vld [vmem:[%s8068_s2 + $0xa8] sm:$0xff]  }
 0x345   :  { %v6975_v37 = vadd.bf16 %v1635_v47, %v6742_v30  ;;  %v1628_v18 = vmul.bf16 %v1596_v22, %v6736_v13  ;;  %5636 = vmatprep.subr.bf16.mxu1 %v6315_v5 }
 0x347   :  { %v5086_v2 = vmul.bf16 3216621497, %v6975_v37  ;;  %v1636_v26 = vadd.bf16 %v1628_v18, %v8082_v24 }
 0x348   :  { %v1603_v8 = vpop.permute.xlu0 %1602  ;;  %5637 = vmatpush3.bf16.msra.mxu1 %v6315_v5 }
 0x349   :  { %6105 = vpow.bf16 %v5086_v2  ;;  %v6992_v43 = vadd.bf16 %v1636_v26, %v6742_v30  ;;  %v1629_v3 = vmul.bf16 %v1603_v8, %v6736_v13  ;;  %5638 = vmatprep.subr.bf16.mxu1 %v6316_v10 }
 0x34b   :  { %v5087_v1 = vmul.bf16 3216621497, %v6992_v43  ;;  %v1637_v29 = vadd.bf16 %v1629_v3, %v8083_v34 }
 0x34c   :  { %v1610_v32 = vpop.permute.xlu0 %1609  ;;  %5639 = vmatpush3.bf16.msra.mxu1 %v6316_v10 }
 0x34d   :  { %6107 = vpow.bf16 %v5087_v1  ;;  %v7003_v46 = vadd.bf16 %v1637_v29, %v6742_v30  ;;  %v1630_v55 = vmul.bf16 %v1610_v32, %v6736_v13  ;;  %5640 = vmatprep.subr.bf16.mxu1 %v6317_v44 }
 0x34f   :  { %v5088_v25 = vmul.bf16 3216621497, %v7003_v46  ;;  %v1638_v20 = vadd.bf16 %v1630_v55, %v8084_v15 }
 0x350   :  { %v1617_v12 = vpop.permute.xlu0 %1616  ;;  %5641 = vmatpush3.bf16.msra.mxu1 %v6317_v44 }
 0x351   :  { %6109 = vpow.bf16 %v5088_v25  ;;  %v1646_v16 = vadd.bf16 %v1638_v20, %v6742_v30  ;;  %v1631_v52 = vmul.bf16 %v1617_v12, %v6736_v13  ;;  %5642 = vmatprep.subr.bf16.mxu1 %v6318_v11 }
 0x353   :  { %v5089_v54 = vmul.bf16 3216621497, %v1646_v16  ;;  %v1639_v57 = vadd.bf16 %v1631_v52, %v8085_v45 }
 0x354   :  { %v1624_v51 = vpop.permute.xlu0 %1623  ;;  %5643 = vmatpush3.bf16.msra.mxu1 %v6318_v11 }
 0x355   :  { %6111 = vpow.bf16 %v5089_v54  ;;  %v1647_v49 = vadd.bf16 %v1639_v57, %v6742_v30  ;;  %v1632_v63 = vmul.bf16 %v1624_v51, %v6736_v13  ;;  %5644 = vmatprep.subr.bf16.mxu1 %v6319_v33  ;;  %v6320_v13 = vld [vmem:[%s8068_s2 + $0x88] sm:$0xff]  }
 0x357   :  { %v6106_v56 = vpop.eup %6105  ;;  %v5090_v0 = vmul.bf16 3216621497, %v1647_v49  ;;  %v1640_v7 = vadd.bf16 %v1632_v63, %v8086_v39 }
 0x358   :  { %v1683_v41 = vadd.bf16 1065369472, %v6106_v56  ;;  %5645 = vmatpush3.bf16.msra.mxu1 %v6319_v33 }
 0x359   :  { %6113 = vpow.bf16 %v5090_v0  ;;  %v1648_v40 = vadd.bf16 %v1640_v7, %v6742_v30  ;;  %5646 = vmatprep.subr.bf16.mxu1 %v6320_v13 }
 0x35a   :  { %6115 = vrcp.bf16 %v1683_v41 }
 0x35b   :  { %v6108_v59 = vpop.eup %6107  ;;  %v5091_v17 = vmul.bf16 3216621497, %v1648_v40 }
 0x35c   :  { %v1684_v27 = vadd.bf16 1065369472, %v6108_v59  ;;  %5647 = vmatpush3.bf16.msra.mxu1 %v6320_v13 }
 0x35d   :  { %6117 = vpow.bf16 %v5091_v17  ;;  %5648 = vmatprep.subr.bf16.mxu1 %v6321_v9 }
 0x35e   :  { %6119 = vrcp.bf16 %v1684_v27 }
 0x35f   :  { %v6110_v53 = vpop.eup %6109 }
 0x360   :  { %v1685_v30 = vadd.bf16 1065369472, %v6110_v53  ;;  %5649 = vmatpush3.bf16.msra.mxu1 %v6321_v9 }
 0x361   :  { %5683 = vmatprep.subr.bf16.mxu1 %v8087_v31 }
 0x362   :  { %6121 = vrcp.bf16 %v1685_v30 }
 0x363   :  { %v6112_v4 = vpop.eup %6111 }
 0x364   :  { %v1686_v61 = vadd.bf16 1065369472, %v6112_v4 }
 0x366   :  { %6123 = vrcp.bf16 %v1686_v61 }
 0x367   :  { %v6114_v62 = vpop.eup %6113 }
 0x368   :  { %v6116_v47 = vpop.eup %6115  ;;  %v1687_v22 = vadd.bf16 1065369472, %v6114_v62 }
 0x369   :  { %v1694_v60 = vmul.bf16 1065369472, %v6116_v47 }
 0x36a   :  { %6125 = vrcp.bf16 %v1687_v22 }
 0x36b   :  { %v6118_v18 = vpop.eup %6117  ;;  %v1707_v26 = vmul.bf16 %v1694_v60, %v6975_v37 }
 0x36c   :  { %v6120_v5 = vpop.eup %6119  ;;  %v1688_v2 = vadd.bf16 1065369472, %v6118_v18 }
 0x36d   :  { %v1696_v24 = vmul.bf16 1065369472, %v6120_v5 }
 0x36e   :  { %6127 = vrcp.bf16 %v1688_v2 }
 0x36f   :  { %v1708_v8 = vmul.bf16 %v1696_v24, %v6992_v43 }
 0x370   :  { %v6122_v3 = vpop.eup %6121 }
 0x371   :  { %v5093_v10 = vcombine.low %v1707_v26, %v1708_v8  ;;  %v1698_v1 = vmul.bf16 1065369472, %v6122_v3 }
 0x373   :  { %5651 = vmatmul.mubr.bf16.vlgmr.msra.gmra.mxu1 %v5093_v10  ;;  %v1709_v32 = vmul.bf16 %v1698_v1, %v7003_v46 }
 0x374   :  { %v6124_v34 = vpop.eup %6123 }
 0x375   :  { %v1700_v29 = vmul.bf16 1065369472, %v6124_v34 }
 0x377   :  { %v1710_v55 = vmul.bf16 %v1700_v29, %v1646_v16 }
 0x378   :  { %v6126_v44 = vpop.eup %6125 }
 0x379   :  { %v5094_v25 = vcombine.low %v1709_v32, %v1710_v55  ;;  %v1702_v15 = vmul.bf16 1065369472, %v6126_v44 }
 0x37b   :  { %5654 = vmatprep.mubr.bf16.mxu1 %v5094_v25  ;;  %v1711_v52 = vmul.bf16 %v1702_v15, %v1647_v49 }
 0x37c   :  { %v6128_v20 = vpop.eup %6127 }
 0x37d   :  { %v1704_v12 = vmul.bf16 1065369472, %v6128_v20 }
 0x37f   :  { %v1712_v11 = vmul.bf16 %v1704_v12, %v1648_v40 }
 0x381   :  { %v5095_v37 = vcombine.low %v1711_v52, %v1712_v11 }
 0x383   :  { %5655 = vmatmul.mubr.bf16.gmra.mxu1 %v5095_v37 }
 0x384   :  { %5699 = vmatprep.mubr.msk.bf16.mxu1 %vm6383_vm0, %v8087_v31 }
 0x403   :  { %v7042_v43 = vpop.f32.mrf.mxu1 }
 0x405   :  { %v5623_v54 = vpop.f32.mrf.mxu1 }
 0x433   :  { %v5652_v45 = vpop.f32.mrf.mxu1 }
 0x434   :  { %v1780_v46 = vadd.f32 %v5652_v45, %v6808_v19 }
 0x435   :  { %v1771_v16 = vpop.f32.mrf.mxu1 }
 0x436   :  { %v1804_v57 = vpack.c.bf16 %v1780_v46, %v1780_v46  ;;  %v1772_v51 = vadd.f32 %v1771_v16, %v6808_v19 }
 0x437   :  { %v5653_v63 = vpop.f32.mrf.mxu1 }
 0x438   :  { %v5098_v33 = vmul.bf16 3216621497, %v1804_v57  ;;  %v1802_v56 = vpack.c.bf16 %v1772_v51, %v1772_v51  ;;  %v1783_v49 = vadd.f32 %v5653_v63, %v6808_v19 }
 0x439   :  { %v1774_v0 = vpop.f32.mrf.mxu1 }
 0x43a   :  { %6129 = vpow.bf16 %v5098_v33  ;;  %v5096_v39 = vmul.bf16 3216621497, %v1802_v56  ;;  %v7047_v7 = vpack.c.bf16 %v1783_v49, %v1783_v49  ;;  %v1775_v41 = vadd.f32 %v1774_v0, %v6808_v19 }
 0x43c   :  { %6131 = vpow.bf16 %v5096_v39  ;;  %v5099_v40 = vmul.bf16 3216621497, %v7047_v7  ;;  %v7051_v13 = vpack.c.bf16 %v1775_v41, %v1775_v41 }
 0x43e   :  { %6133 = vpow.bf16 %v5099_v40  ;;  %v5097_v59 = vmul.bf16 3216621497, %v7051_v13 }
 0x440   :  { %6135 = vpow.bf16 %v5097_v59 }
 0x443   :  { %v5656_v17 = vpop.f32.mrf.mxu1 }
 0x444   :  { %v1796_v27 = vadd.f32 %v5656_v17, %v6808_v19 }
 0x445   :  { %v1787_v9 = vpop.f32.mrf.mxu1 }
 0x446   :  { %v7055_v53 = vpack.c.bf16 %v1796_v27, %v1796_v27  ;;  %v1788_v30 = vadd.f32 %v1787_v9, %v6808_v19 }
 0x447   :  { %v5657_v4 = vpop.f32.mrf.mxu1 }
 0x448   :  { %v6130_v61 = vpop.eup %6129  ;;  %v5102_v62 = vmul.bf16 3216621497, %v7055_v53  ;;  %v7059_v47 = vpack.c.bf16 %v1788_v30, %v1788_v30  ;;  %v1799_v22 = vadd.f32 %v5657_v4, %v6808_v19 }
 0x449   :  { %v1844_v18 = vadd.bf16 1065369472, %v6130_v61  ;;  %v1790_v60 = vpop.f32.mrf.mxu1 }
 0x44a   :  { %v6132_v5 = vpop.eup %6131  ;;  %6137 = vpow.bf16 %v5102_v62  ;;  %v5100_v2 = vmul.bf16 3216621497, %v7059_v47  ;;  %v7063_v24 = vpack.c.bf16 %v1799_v22, %v1799_v22  ;;  %v1791_v26 = vadd.f32 %v1790_v60, %v6808_v19 }
 0x44b   :  { %6139 = vrcp.bf16 %v1844_v18  ;;  %v1842_v8 = vadd.bf16 1065369472, %v6132_v5 }
 0x44c   :  { %v6134_v3 = vpop.eup %6133  ;;  %6141 = vpow.bf16 %v5100_v2  ;;  %v5103_v10 = vmul.bf16 3216621497, %v7063_v24  ;;  %v7067_v1 = vpack.c.bf16 %v1791_v26, %v1791_v26 }
 0x44d   :  { %6143 = vrcp.bf16 %v1842_v8  ;;  %v1845_v34 = vadd.bf16 1065369472, %v6134_v3 }
 0x44e   :  { %v6136_v29 = vpop.eup %6135  ;;  %6145 = vpow.bf16 %v5103_v10  ;;  %v5101_v32 = vmul.bf16 3216621497, %v7067_v1 }
 0x44f   :  { %6147 = vrcp.bf16 %v1845_v34  ;;  %v1843_v55 = vadd.bf16 1065369472, %v6136_v29 }
 0x450   :  { %6149 = vpow.bf16 %v5101_v32 }
 0x451   :  { %6151 = vrcp.bf16 %v1843_v55 }
 0x458   :  { %v6138_v44 = vpop.eup %6137 }
 0x459   :  { %v6140_v19 = vpop.eup %6139  ;;  %v1848_v25 = vadd.bf16 1065369472, %v6138_v44 }
 0x45a   :  { %v6142_v15 = vpop.eup %6141  ;;  %v1855_v20 = vmul.bf16 1065369472, %v6140_v19 }
 0x45b   :  { %v6144_v12 = vpop.eup %6143  ;;  %6153 = vrcp.bf16 %v1848_v25  ;;  %v1846_v52 = vadd.bf16 1065369472, %v6142_v15 }
 0x45c   :  { %v6146_v11 = vpop.eup %6145  ;;  %v1868_v37 = vmul.bf16 %v1855_v20, %v1804_v57  ;;  %v1851_v54 = vmul.bf16 1065369472, %v6144_v12 }
 0x45d   :  { %v6148_v45 = vpop.eup %6147  ;;  %6155 = vrcp.bf16 %v1846_v52  ;;  %v1849_v46 = vadd.bf16 1065369472, %v6146_v11 }
 0x45e   :  { %v6150_v16 = vpop.eup %6149  ;;  %v2034_v51 = vunpack.c.l.bf16 %v1868_v37  ;;  %v1866_v63 = vmul.bf16 %v1851_v54, %v1802_v56  ;;  %v1857_v33 = vmul.bf16 1065369472, %v6148_v45  ;;  %v1876_v49 = vmul.bf16 %v1868_v37, %v6885_v6 }
 0x45f   :  { %v6152_v0 = vpop.eup %6151  ;;  %6157 = vrcp.bf16 %v1849_v46  ;;  %v1847_v39 = vadd.bf16 1065369472, %v6150_v16 }
 0x460   :  { %v2052_v41 = vrot.slane %v2034_v51, 4  ;;  %v2032_v40 = vunpack.c.l.bf16 %v1866_v63  ;;  %v1869_v59 = vmul.bf16 %v1857_v33, %v7047_v7  ;;  %v1853_v17 = vmul.bf16 1065369472, %v6152_v0 }
 0x461   :  { %6159 = vrcp.bf16 %v1847_v39  ;;  %v1884_v57 = vunpack.c.l.bf16 %v1876_v49  ;;  %v1874_v27 = vmul.bf16 %v1866_v63, %v6885_v6  ;;  %v7076_v7 = vunpack.c.h.bf16 %v6881_v48 }
 0x462   :  { %v2053_v9 = vadd.f32 %v2052_v41, %v2034_v51  ;;  %v2040_v30 = vrot.slane %v2032_v40, 4  ;;  %v2035_v4 = vunpack.c.l.bf16 %v1869_v59  ;;  %v1867_v56 = vmul.bf16 %v1853_v17, %v7051_v13 }
 0x463   :  { %1894 = vadd.xlane.f32.xlu1 %v1884_v57  ;;  %v1882_v61 = vunpack.c.l.bf16 %v1874_v27  ;;  %v1877_v62 = vmul.bf16 %v1869_v59, %v6885_v6  ;;  %v1114_v13 = vsel %vm1113_vm8, %v6970_v23, 0.0  ;;  %v2090_v48 = vrot.slane %v7076_v7, 2 }
 0x464   :  { %v2054_v22 = vrot.slane %v2053_v9, 2  ;;  %v2041_v18 = vadd.f32 %v2040_v30, %v2032_v40  ;;  %v2058_v60 = vrot.slane %v2035_v4, 4  ;;  %v2033_v5 = vunpack.c.l.bf16 %v1867_v56 }
 0x465   :  { %1890 = vadd.xlane.f32.xlu0 %v1882_v61  ;;  %v1885_v2 = vunpack.c.l.bf16 %v1877_v62  ;;  %v1875_v26 = vmul.bf16 %v1867_v56, %v6885_v6  ;;  %v2091_v0 = vrot.slane %v7076_v7, 3  ;;  %v2089_v30 = vrot.slane %v7076_v7, 1 }
 0x466   :  { %v2055_v8 = vadd.f32 %v2054_v22, %v2053_v9  ;;  %v2042_v3 = vrot.slane %v2041_v18, 2  ;;  %v2059_v10 = vadd.f32 %v2058_v60, %v2035_v4  ;;  %v2046_v34 = vrot.slane %v2033_v5, 4 }
 0x467   :  { %1896 = vadd.xlane.f32.xlu1 %v1885_v2  ;;  %v1883_v25 = vunpack.c.l.bf16 %v1875_v26 }
 0x468   :  { %v2056_v29 = vrot.slane %v2055_v8, 1  ;;  %v2043_v32 = vadd.f32 %v2042_v3, %v2041_v18  ;;  %v2060_v55 = vrot.slane %v2059_v10, 2  ;;  %v2047_v44 = vadd.f32 %v2046_v34, %v2033_v5 }
 0x469   :  { %v6154_v19 = vpop.eup %6153  ;;  %1115 = vadd.xlane.f32.xlu0 %v1114_v13 }
 0x46a   :  { %v2057_v15 = vadd.f32 %v2056_v29, %v2055_v8  ;;  %v2044_v20 = vrot.slane %v2043_v32, 1  ;;  %v2061_v12 = vadd.f32 %v2060_v55, %v2059_v10  ;;  %v2048_v52 = vrot.slane %v2047_v44, 2 }
 0x46b   :  { %v6156_v11 = vpop.eup %6155  ;;  %v1863_v37 = vmul.bf16 1065369472, %v6154_v19  ;;  %1892 = vadd.xlane.f32.xlu1 %v1883_v25 }
 0x46c   :  { %v2106_v54 = vsub.f32 %v2057_v15, %v2090_v48  ;;  %v2045_v45 = vadd.f32 %v2044_v20, %v2043_v32  ;;  %v2062_v46 = vrot.slane %v2061_v12, 1  ;;  %v2049_v23 = vadd.f32 %v2048_v52, %v2047_v44 }
 0x46d   :  { %v6158_v16 = vpop.eup %6157  ;;  %v1872_v51 = vmul.bf16 %v1863_v37, %v7055_v53  ;;  %v1859_v63 = vmul.bf16 1065369472, %v6156_v11 }
 0x46e   :  { %v2104_v33 = vsub.f32 %v2045_v45, %v7076_v7  ;;  %v2063_v49 = vadd.f32 %v2062_v46, %v2061_v12  ;;  %v2050_v39 = vrot.slane %v2049_v23, 1  ;;  %v1865_v17 = vmul.bf16 1065369472, %v6158_v16 }
 0x46f   :  { %v6160_v41 = vpop.eup %6159  ;;  %v2038_v40 = vunpack.c.l.bf16 %v1872_v51  ;;  %v1870_v59 = vmul.bf16 %v1859_v63, %v7059_v47  ;;  %v1880_v57 = vmul.bf16 %v1872_v51, %v6885_v6  ;;  %v2145_v26 = vrot.slane %v2106_v54, 6 }
 0x470   :  { %v2107_v27 = vsub.f32 %v2063_v49, %v2091_v0  ;;  %v2051_v9 = vadd.f32 %v2050_v39, %v2049_v23  ;;  %v1861_v4 = vmul.bf16 1065369472, %v6160_v41  ;;  %v1873_v61 = vmul.bf16 %v1865_v17, %v7063_v24 }
 0x471   :  { %v2076_v53 = vrot.slane %v2038_v40, 4  ;;  %v2036_v56 = vunpack.c.l.bf16 %v1870_v59  ;;  %v1888_v62 = vunpack.c.l.bf16 %v1880_v57  ;;  %v1878_v60 = vmul.bf16 %v1870_v59, %v6885_v6 }
 0x472   :  { %v2105_v22 = vsub.f32 %v2051_v9, %v2089_v30  ;;  %v1871_v18 = vmul.bf16 %v1861_v4, %v7067_v1  ;;  %v2039_v2 = vunpack.c.l.bf16 %v1873_v61  ;;  %v2147_v24 = vrot.slane %v2107_v27, 5 }
 0x473   :  { %v2077_v5 = vadd.f32 %v2076_v53, %v2038_v40  ;;  %v2064_v47 = vrot.slane %v2036_v56, 4  ;;  %1902 = vadd.xlane.f32.xlu1 %v1888_v62  ;;  %v1886_v10 = vunpack.c.l.bf16 %v1878_v60  ;;  %v1881_v20 = vmul.bf16 %v1873_v61, %v6885_v6 }
 0x474   :  { %v2143_v8 = vrot.slane %v2105_v22, 7  ;;  %v2037_v3 = vunpack.c.l.bf16 %v1871_v18  ;;  %v2082_v29 = vrot.slane %v2039_v2, 4  ;;  %v1879_v32 = vmul.bf16 %v1871_v18, %v6885_v6  ;;  %v5953_v18 = vld [vmem:[%s8068_s2 + $0xf8] sm:$0xff]  }
 0x475   :  { %v2078_v34 = vrot.slane %v2077_v5, 2  ;;  %v2065_v13 = vadd.f32 %v2064_v47, %v2036_v56  ;;  %v2094_v23 = vrot.slane %v7076_v7, 6  ;;  %v2092_v63 = vrot.slane %v7076_v7, 4  ;;  %5684 = vmatpush3.bf16.msra.mxu1 %v5953_v18  ;;  %v5954_v47 = vld [vmem:[%s8068_s2 + $0xf0] sm:$0xff]   ;;  %v5973_v18 = vld [vmem:[%s8068_s2 + $0x158] sm:$0xff]  }
 0x476   :  { %v2144_v55 = vsel %vm1098_vm1, %v2143_v8, %v2104_v33  ;;  %v2070_v44 = vrot.slane %v2037_v3, 4  ;;  %v2083_v48 = vadd.f32 %v2082_v29, %v2039_v2  ;;  %v1887_v54 = vunpack.c.l.bf16 %v1879_v32  ;;  %5685 = vmatprep.subr.bf16.mxu1 %v8087_v31  ;;  %v5956_v2 = vld [vmem:[%s8068_s2 + $0xe8] sm:$0xff]   ;;  %v5960_v8 = vld [vmem:[%s8068_s2 + $0xd8] sm:$0xff]  }
 0x477   :  { %v2079_v1 = vadd.f32 %v2078_v34, %v2077_v5  ;;  %v2066_v19 = vrot.slane %v2065_v13, 2  ;;  %1898 = vadd.xlane.f32.xlu1 %v1886_v10  ;;  %v2146_v25 = vsel %vm1100_vm2, %v2145_v26, %v2144_v55  ;;  %v1889_v6 = vunpack.c.l.bf16 %v1881_v20  ;;  %v5958_v26 = vld [vmem:[%s8068_s2 + $0xe0] sm:$0xff]   ;;  %v5964_v10 = vld [vmem:[%s8068_s2 + $0xc8] sm:$0xff]  }
 0x478   :  { %v2071_v15 = vadd.f32 %v2070_v44, %v2037_v3  ;;  %v2148_v12 = vsel %vm1102_vm3, %v2147_v24, %v2146_v25  ;;  %v2084_v37 = vrot.slane %v2083_v48, 2  ;;  %v2095_v17 = vrot.slane %v7076_v7, 7  ;;  %v5962_v3 = vld [vmem:[%s8068_s2 + $0xd0] sm:$0xff]   ;;  %v5966_v34 = vld [vmem:[%s8068_s2 + $0xc0] sm:$0xff]  }
 0x479   :  { %v2080_v52 = vrot.slane %v2079_v1, 1  ;;  %v2067_v11 = vadd.f32 %v2066_v19, %v2065_v13  ;;  %v2093_v27 = vrot.slane %v7076_v7, 5  ;;  %5686 = vmatpush3.bf16.msra.mxu1 %v5954_v47  ;;  %v6322_v55 = vld [vmem:[%s8066_s0] sm:$0xff]  ;;  %v5978_v47 = vld [vmem:[%s8070_s4 + $0x38] sm:$0xff]  }
 0x47a   :  { %v2072_v45 = vrot.slane %v2071_v15, 2  ;;  %v2085_v51 = vadd.f32 %v2084_v37, %v2083_v48  ;;  %5687 = vmatprep.subr.bf16.mxu1 %v8087_v31 }
 0x47b   :  { %v2081_v46 = vadd.f32 %v2080_v52, %v2079_v1  ;;  %v2068_v16 = vrot.slane %v2067_v11, 1  ;;  %1900 = vadd.xlane.f32.xlu1 %v1887_v54 }
 0x47c   :  { %v2073_v33 = vadd.f32 %v2072_v45, %v2071_v15  ;;  %v2086_v39 = vrot.slane %v2085_v51, 1 }
 0x47d   :  { %v2110_v49 = vsub.f32 %v2081_v46, %v2094_v23  ;;  %v2069_v0 = vadd.f32 %v2068_v16, %v2067_v11  ;;  %5688 = vmatpush3.bf16.msra.mxu1 %v5956_v2  ;;  %v5980_v2 = vld [vmem:[%s8070_s4 + $0x30] sm:$0xff]  }
 0x47e   :  { %v2074_v41 = vrot.slane %v2073_v33, 1  ;;  %v2087_v59 = vadd.f32 %v2086_v39, %v2085_v51  ;;  %5689 = vmatprep.subr.bf16.mxu1 %v8087_v31 }
 0x47f   :  { %v2108_v40 = vsub.f32 %v2069_v0, %v2092_v63  ;;  %1904 = vadd.xlane.f32.xlu1 %v1889_v6  ;;  %v2153_v61 = vrot.slane %v2110_v49, 2  ;;  %v5955_v0 = vld [vmem:[%s8068_s2 + $0x138] sm:$0xff]  }
 0x480   :  { %v2075_v57 = vadd.f32 %v2074_v41, %v2073_v33  ;;  %v2111_v30 = vsub.f32 %v2087_v59, %v2095_v17  ;;  %v5957_v41 = vld [vmem:[%s8068_s2 + $0x130] sm:$0xff]   ;;  %v5961_v59 = vld [vmem:[%s8068_s2 + $0x120] sm:$0xff]   ;;  %v5963_v17 = vld [vmem:[%s8068_s2 + $0x118] sm:$0xff]  }
 0x481   :  { %v2149_v9 = vrot.slane %v2108_v40, 4  ;;  %5690 = vmatpush3.bf16.msra.mxu1 %v5958_v26  ;;  %v5959_v40 = vld [vmem:[%s8068_s2 + $0x128] sm:$0xff]  }
 0x482   :  { %v2109_v4 = vsub.f32 %v2075_v57, %v2093_v27  ;;  %v2155_v22 = vrot.slane %v2111_v30, 1  ;;  %5691 = vmatprep.subr.bf16.mxu1 %v8087_v31  ;;  %v5965_v57 = vld [vmem:[%s8068_s2 + $0x110] sm:$0xff]   ;;  %v5967_v27 = vld [vmem:[%s8068_s2 + $0x108] sm:$0xff]  }
 0x483   :  { %v2150_v53 = vsel %vm1104_vm4, %v2149_v9, %v2148_v12  ;;  %v5968_v9 = vld [vmem:[%s8068_s2 + $0x100] sm:$0xff]   ;;  %v5982_v26 = vld [vmem:[%s8070_s4 + $0x28] sm:$0xff]  }
 0x484   :  { %v2151_v56 = vrot.slane %v2109_v4, 3 }
 0x485   :  { %5692 = vmatpush3.bf16.msra.mxu1 %v5960_v8  ;;  %v5984_v8 = vld [vmem:[%s8070_s4 + $0x20] sm:$0xff]  }
 0x486   :  { %v2152_v62 = vsel %vm1106_vm5, %v2151_v56, %v2150_v53  ;;  %5693 = vmatprep.subr.bf16.mxu1 %v8087_v31 }
 0x487   :  { %v2154_v60 = vsel %vm1108_vm6, %v2153_v61, %v2152_v62  ;;  %v5969_v61 = vld [vmem:[%s8068_s2 + $0x178] sm:$0xff]   ;;  %v5970_v62 = vld [vmem:[%s8068_s2 + $0x170] sm:$0xff]  }
 0x488   :  { %v7107_v5 = vsel %vm1110_vm7, %v2155_v22, %v2154_v60  ;;  %v5972_v22 = vld [vmem:[%s8068_s2 + $0x160] sm:$0xff]   ;;  %v5974_v60 = vld [vmem:[%s8068_s2 + $0x150] sm:$0xff]  }
 0x489   :  { %v2158_v7 = vpack.c.bf16 %v7107_v5, %v6933_v28  ;;  %5694 = vmatpush3.bf16.msra.mxu1 %v5962_v3  ;;  %v5971_v28 = vld [vmem:[%s8068_s2 + $0x168] sm:$0xff]   ;;  %v5986_v3 = vld [vmem:[%s8070_s4 + $0x18] sm:$0xff]  }
 0x48a   :  { %5695 = vmatprep.subr.bf16.mxu1 %v8087_v31  ;;  %v5975_v5 = vld [vmem:[%s8068_s2 + $0x148] sm:$0xff]  }
 0x48d   :  { %5696 = vmatpush3.bf16.msra.mxu1 %v5964_v10 }
 0x48e   :  { %5697 = vmatprep.subr.bf16.mxu1 %v8087_v31 }
 0x491   :  { %5698 = vmatpush3.bf16.msra.mxu1 %v5966_v34 }
 0x492   :  { %5723 = vmatprep.subr.bf16.mxu1 %v8087_v31 }
 0x494   :  { %5700 = vmatmul.mubr.bf16.vlgmr.msra.gmra.mxu1 %v6517_v21 }
 0x495   :  { %5739 = vmatprep.mubr.msk.bf16.mxu1 %vm6383_vm0, %v8087_v31  ;;  %5724 = vmatpush3.bf16.msra.mxu1 %v5978_v47  ;;  %v8088_v47 = vmov 1.0  }
 0x496   :  { %5725 = vmatprep.subr.bf16.mxu1 %v8087_v31 }
 0x499   :  { %5726 = vmatpush3.bf16.msra.mxu1 %v5980_v2  ;;  %v5993_v2 = vld [vmem:[%s8070_s4 + $0xb8] sm:$0xff]  }
 0x49a   :  { %5727 = vmatprep.subr.bf16.mxu1 %v8087_v31 }
 0x49d   :  { %5728 = vmatpush3.bf16.msra.mxu1 %v5982_v26  ;;  %v5994_v26 = vld [vmem:[%s8070_s4 + $0xb0] sm:$0xff]  }
 0x49e   :  { %5729 = vmatprep.subr.bf16.mxu1 %v8087_v31 }
 0x4a1   :  { %5730 = vmatpush3.bf16.msra.mxu1 %v5984_v8  ;;  %v5996_v8 = vld [vmem:[%s8070_s4 + $0xa0] sm:$0xff]  }
 0x4a2   :  { %5731 = vmatprep.subr.bf16.mxu1 %v8087_v31 }
 0x4a5   :  { %5732 = vmatpush3.bf16.msra.mxu1 %v5986_v3  ;;  %v5997_v3 = vld [vmem:[%s8070_s4 + $0x98] sm:$0xff]  }
 0x4a6   :  { %5733 = vmatprep.subr.bf16.mxu1 %v8087_v31 }
 0x4ec   :  { %v1895_v13 = vpop.xlane.xlu1 %1894 }
 0x4ed   :  { %v1925_v12 = vrot.slane %v1895_v13, %v6949_v14  ;;  %v8081_v13 = vsub.s32 4, %v6570_v35 }
 0x4ee   :  { %v1891_v29 = vpop.xlane.xlu0 %1890 }
 0x4ef   :  { %v1917_v20 = vrot.slane %v1891_v29, %v6949_v14  ;;  %v6323_v29 = vld [vmem:[%s8069_s3] sm:$0x3f] }
 0x4f0   :  { %v1897_v32 = vpop.xlane.xlu1 %1896 }
 0x4f1   :  { %v1929_v54 = vrot.slane %v1897_v32, %v6949_v14  ;;  %v2357_v32 = vrot.slane %v6323_v29, %v8081_v13 }
 0x4f2   :  { %v1116_v24 = vpop.xlane.xlu0 %1115 }
 0x4f3   :  { %v1117_v44 = vmul.f32 %v6322_v55, %v1116_v24 }
 0x4f4   :  { %v1893_v48 = vpop.xlane.xlu1 %1892 }
 0x4f5   :  { %v1118_v1 = vadd.f32 %v6322_v55, %v1117_v44  ;;  %v1921_v25 = vrot.slane %v1893_v48, %v6949_v14 }
 0x4f7   :  { %v7147_v19 = vsub.f32 %v1118_v1, %v7042_v43  ;;  %v1946_v43 = vsel %vm1098_vm1, %v1921_v25, %v1917_v20 }
 0x4f8   :  { %v1947_v11 = vsel %vm1100_vm2, %v1925_v12, %v1946_v43 }
 0x4f9   :  { %4933 = vst [vmem:[%s8072_s6] sm:$0xff] %v7147_v19  ;;  %v7155_v21 = vmul.f32 %v7147_v19, %v7147_v19  ;;  %v1948_v46 = vsel %vm1102_vm3, %v1929_v54, %v1947_v11 }
 0x4fb   :  { %2931 = vadd.xlane.f32.xlu1 %v7155_v21 }
 0x4fc   :  { %v1903_v15 = vpop.xlane.xlu1 %1902 }
 0x4fd   :  { %v1941_v63 = vrot.slane %v1903_v15, %v6949_v14 }
 0x500   :  { %v1899_v52 = vpop.xlane.xlu1 %1898 }
 0x501   :  { %v1933_v37 = vrot.slane %v1899_v52, %v6949_v14 }
 0x503   :  { %v1949_v16 = vsel %vm1104_vm4, %v1933_v37, %v1948_v46 }
 0x504   :  { %v1901_v45 = vpop.xlane.xlu1 %1900 }
 0x505   :  { %v1937_v23 = vrot.slane %v1901_v45, %v6949_v14 }
 0x507   :  { %v1950_v51 = vsel %vm1106_vm5, %v1937_v23, %v1949_v16 }
 0x508   :  { %v1905_v33 = vpop.xlane.xlu1 %1904  ;;  %v1951_v39 = vsel %vm1108_vm6, %v1941_v63, %v1950_v51  ;;  %v5977_v51 = vld [vmem:[%s8070_s4 + $0x78] sm:$0xff]  }
 0x509   :  { %v1945_v49 = vrot.slane %v1905_v33, %v6949_v14  ;;  %v5979_v33 = vld [vmem:[%s8070_s4 + $0x70] sm:$0xff]  }
 0x50b   :  { %v7176_v6 = vsel %vm1110_vm7, %v1945_v49, %v1951_v39  ;;  %v5981_v49 = vld [vmem:[%s8070_s4 + $0x68] sm:$0xff]   ;;  %v5985_v39 = vld [vmem:[%s8070_s4 + $0x58] sm:$0xff]  }
 0x50c   :  { %5661 = vmatmul.mubr.msk.f32.vlgmr.msra.gmra.mxu0 %vm1113_vm8, %v7176_v6 }
 0x50d   :  { %5664 = vmatpush3.bf16.msra.mxu0 %v5955_v0  ;;  %5679 = vmatprep.mubr.msk.bf16.mxu0 %vm6383_vm0, %v8087_v31  ;;  %v5983_v0 = vld [vmem:[%s8070_s4 + $0x60] sm:$0xff]  }
 0x50e   :  { %5665 = vmatprep.subr.bf16.mxu0 %v8087_v31 }
 0x511   :  { %5666 = vmatpush3.bf16.msra.mxu0 %v5957_v41  ;;  %v5987_v41 = vld [vmem:[%s8070_s4 + $0x50] sm:$0xff]  }
 0x512   :  { %5667 = vmatprep.subr.bf16.mxu0 %v8087_v31 }
 0x515   :  { %5668 = vmatpush3.bf16.msra.mxu0 %v5959_v40  ;;  %v5988_v40 = vld [vmem:[%s8070_s4 + $0x10] sm:$0xff]  }
 0x516   :  { %5669 = vmatprep.subr.bf16.mxu0 %v8087_v31  ;;  %5734 = vmatpush3.bf16.msra.mxu1 %v5988_v40 }
 0x517   :  { %5735 = vmatprep.subr.bf16.mxu1 %v8087_v31 }
 0x519   :  { %5670 = vmatpush3.bf16.msra.mxu0 %v5961_v59  ;;  %v5989_v59 = vld [vmem:[%s8070_s4 + $0x48] sm:$0xff]  }
 0x51a   :  { %5671 = vmatprep.subr.bf16.mxu0 %v8087_v31 }
 0x51d   :  { %5672 = vmatpush3.bf16.msra.mxu0 %v5963_v17  ;;  %v5990_v17 = vld [vmem:[%s8070_s4 + $0x8] sm:$0xff]  }
 0x51e   :  { %5673 = vmatprep.subr.bf16.mxu0 %v8087_v31  ;;  %5736 = vmatpush3.bf16.msra.mxu1 %v5990_v17 }
 0x51f   :  { %5737 = vmatprep.subr.bf16.mxu1 %v8087_v31 }
 0x521   :  { %5674 = vmatpush3.bf16.msra.mxu0 %v5965_v57  ;;  %v5991_v57 = vld [vmem:[%s8070_s4 + $0x40] sm:$0xff]  }
 0x522   :  { %5675 = vmatprep.subr.bf16.mxu0 %v8087_v31 }
 0x525   :  { %5676 = vmatpush3.bf16.msra.mxu0 %v5967_v27  ;;  %v5992_v27 = vld [vmem:[%s8070_s4] sm:$0xff]  }
 0x526   :  { %5677 = vmatprep.subr.bf16.mxu0 %v8087_v31  ;;  %5738 = vmatpush3.bf16.msra.mxu1 %v5992_v27 }
 0x527   :  { %5763 = vmatprep.subr.bf16.mxu1 %v8087_v31 }
 0x529   :  { %5678 = vmatpush3.bf16.msra.mxu0 %v5968_v9  ;;  %v8080_v9 = vsub.s32 5, %v6570_v35 }
 0x52a   :  { %5703 = vmatprep.subr.bf16.mxu0 %v8087_v31 }
 0x52c   :  { %5680 = vmatmul.mubr.bf16.vlgmr.msra.gmra.mxu0 %v2158_v7  ;;  %v5976_v7 = vld [vmem:[%s8068_s2 + $0x140] sm:$0xff]  }
 0x52d   :  { %5719 = vmatprep.mubr.msk.bf16.mxu0 %vm6383_vm0, %v8087_v31  ;;  %5704 = vmatpush3.bf16.msra.mxu0 %v5969_v61 }
 0x52e   :  { %5705 = vmatprep.subr.bf16.mxu0 %v8087_v31 }
 0x531   :  { %5706 = vmatpush3.bf16.msra.mxu0 %v5970_v62 }
 0x532   :  { %5707 = vmatprep.subr.bf16.mxu0 %v8087_v31 }
 0x535   :  { %5708 = vmatpush3.bf16.msra.mxu0 %v5971_v28 }
 0x536   :  { %5709 = vmatprep.subr.bf16.mxu0 %v8087_v31 }
 0x539   :  { %5710 = vmatpush3.bf16.msra.mxu0 %v5972_v22  ;;  %v6325_v22 = vld [vmem:[%s8067_s1 + $0x8] sm:$0xff] }
 0x53a   :  { %5711 = vmatprep.subr.bf16.mxu0 %v8087_v31 }
 0x53d   :  { %5712 = vmatpush3.bf16.msra.mxu0 %v5973_v18 }
 0x53e   :  { %5713 = vmatprep.subr.bf16.mxu0 %v8087_v31 }
 0x541   :  { %5714 = vmatpush3.bf16.msra.mxu0 %v5974_v60 }
 0x542   :  { %5715 = vmatprep.subr.bf16.mxu0 %v8087_v31 }
 0x545   :  { %5716 = vmatpush3.bf16.msra.mxu0 %v5975_v5 }
 0x546   :  { %5717 = vmatprep.subr.bf16.mxu0 %v8087_v31 }
 0x549   :  { %5718 = vmatpush3.bf16.msra.mxu0 %v5976_v7 }
 0x54a   :  { %5743 = vmatprep.subr.bf16.mxu0 %v8087_v31 }
 0x554   :  { %v2347_v30 = vpop.f32.mrf.mxu1 }
 0x556   :  { %v5701_v4 = vpop.f32.mrf.mxu1 }
 0x558   :  { %v2350_v53 = vpop.f32.mrf.mxu1 }
 0x55a   :  { %v5702_v56 = vpop.f32.mrf.mxu1 }
 0x5cc   :  { %v7268_v10 = vpop.f32.mrf.mxu0 }
 0x5ce   :  { %v5662_v34 = vpop.f32.mrf.mxu0 }
 0x5cf   :  { %v5998_v34 = vld [vmem:[%s8070_s4 + $0x90] sm:$0xff]  }
 0x5ec   :  { %v2258_v24 = vpop.f32.mrf.mxu0 }
 0x5ed   :  { %v2348_v55 = vadd.f32 %v2347_v30, %v2258_v24  ;;  %v2486_v30 = vrot.slane %v6323_v29, %v8080_v9  ;;  %v5999_v29 = vld [vmem:[%s8070_s4 + $0x88] sm:$0xff]  }
 0x5ee   :  { %v5681_v44 = vpop.f32.mrf.mxu0 }
 0x5ef   :  { %v2358_v1 = vadd.f32 %v2357_v32, %v2348_v55 }
 0x5f0   :  { %v2261_v48 = vpop.f32.mrf.mxu0 }
 0x5f1   :  { %v5137_v25 = vmul.f32 -1.442695, %v2358_v1  ;;  %v2351_v15 = vadd.f32 %v2350_v53, %v2261_v48  ;;  %v6324_v53 = vld [vmem:[%s8067_s1] sm:$0xff] }
 0x5f2   :  { %v5682_v20 = vpop.f32.mrf.mxu0 }
 0x5f3   :  { %6161 = vpow2.f32 %v5137_v25  ;;  %v2359_v43 = vadd.f32 %v2357_v32, %v2351_v15  ;;  %v6000_v32 = vld [vmem:[%s8070_s4 + $0x80] sm:$0xff]  }
 0x5f5   :  { %v5138_v12 = vmul.f32 -1.442695, %v2359_v43 }
 0x5f7   :  { %6163 = vpow2.f32 %v5138_v12 }
 0x600   :  { %v6162_v52 = vpop.eup %6161 }
 0x601   :  { %v2366_v11 = vadd.f32 1.0, %v6162_v52 }
 0x603   :  { %6165 = vrcp.f32 %v2366_v11 }
 0x604   :  { %v6164_v37 = vpop.eup %6163 }
 0x605   :  { %v2367_v54 = vadd.f32 1.0, %v6164_v37 }
 0x607   :  { %6167 = vrcp.f32 %v2367_v54 }
 0x610   :  { %v6166_v45 = vpop.eup %6165 }
 0x611   :  { %v2372_v23 = vmul.f32 %v6166_v45, %v2358_v1  ;;  %v7390_v1 = vld [vmem:[%s8071_s5] sm:$0x3f] }
 0x614   :  { %v6168_v46 = vpop.eup %6167 }
 0x615   :  { %v2373_v16 = vmul.f32 %v6168_v46, %v2359_v43  ;;  %v2725_v43 = vrot.slane %v7390_v1, %v6576_v38 }
 0x617   :  { %v2374_v63 = vpack.c.bf16 %v2373_v16, %v2372_v23 }
 0x619   :  { %5720 = vmatmul.mubr.bf16.vlgmr.msra.gmra.mxu0 %v2374_v63 }
 0x61a   :  { %5744 = vmatpush3.bf16.msra.mxu0 %v5977_v51  ;;  %5759 = vmatprep.mubr.msk.bf16.mxu0 %vm6383_vm0, %v8087_v31 }
 0x61b   :  { %5745 = vmatprep.subr.bf16.mxu0 %v8087_v31 }
 0x61e   :  { %5746 = vmatpush3.bf16.msra.mxu0 %v5979_v33 }
 0x61f   :  { %5747 = vmatprep.subr.bf16.mxu0 %v8087_v31 }
 0x622   :  { %5748 = vmatpush3.bf16.msra.mxu0 %v5981_v49 }
 0x623   :  { %5749 = vmatprep.subr.bf16.mxu0 %v8087_v31 }
 0x626   :  { %5750 = vmatpush3.bf16.msra.mxu0 %v5983_v0 }
 0x627   :  { %5751 = vmatprep.subr.bf16.mxu0 %v8087_v31 }
 0x62a   :  { %5752 = vmatpush3.bf16.msra.mxu0 %v5985_v39 }
 0x62b   :  { %5753 = vmatprep.subr.bf16.mxu0 %v8087_v31 }
 0x62e   :  { %5754 = vmatpush3.bf16.msra.mxu0 %v5987_v41 }
 0x62f   :  { %5755 = vmatprep.subr.bf16.mxu0 %v8087_v31 }
 0x632   :  { %5756 = vmatpush3.bf16.msra.mxu0 %v5989_v59 }
 0x633   :  { %5757 = vmatprep.subr.bf16.mxu0 %v8087_v31 }
 0x636   :  { %5758 = vmatpush3.bf16.msra.mxu0 %v5991_v57 }
 0x637   :  { %5783 = vmatprep.subr.mxu0 %v8087_v31 }
 0x6d9   :  { %v2474_v4 = vpop.f32.mrf.mxu0 }
 0x6da   :  { %v2481_v56 = vadd.f32 %v6324_v53, %v2474_v4 }
 0x6db   :  { %v5721_v61 = vpop.f32.mrf.mxu0 }
 0x6dc   :  { %v7328_v62 = vadd.f32 %v2486_v30, %v2481_v56 }
 0x6dd   :  { %v2477_v28 = vpop.f32.mrf.mxu0 }
 0x6de   :  { %4935 = vst [vmem:[#allocation2] sm:$0xff] %v7328_v62  ;;  %v2482_v18 = vadd.f32 %v6325_v22, %v2477_v28 }
 0x6df   :  { %v5722_v60 = vpop.f32.mrf.mxu0 }
 0x6e0   :  { %v7334_v5 = vadd.f32 %v2486_v30, %v2482_v18 }
 0x6e2   :  { %v7338_v7 = vpack.c.bf16 %v7334_v5, %v7328_v62  ;;  %4936 = vst [vmem:[#allocation2 + $0x8] sm:$0xff] %v7334_v5 }
 0x6e4   :  { %5740 = vmatmul.mubr.bf16.vlgmr.msra.gmra.mxu1 %v7338_v7  ;;  %5760 = vmatmul.mubr.bf16.vlgmr.msra.gmra.mxu0 %v7338_v7 }
 0x6e5   :  { %5784 = vmatpush3.xpose.msra.mxu0 %v7147_v19  ;;  %5785 = vmatprep.mubr.msk.f32.mxu0 %vm6383_vm0, %v8087_v31 }
 0x6e6   :  { %5788 = vmatprep.subr.mxu0 %v8087_v31  ;;  %5779 = vmatprep.mubr.msk.bf16.mxu1 %vm6383_vm0, %v8087_v31 }
 0x6e7   :  { %5764 = vmatpush3.bf16.msra.mxu1 %v5993_v2 }
 0x6e8   :  { %5765 = vmatprep.subr.bf16.mxu1 %v8087_v31 }
 0x6eb   :  { %5766 = vmatpush3.bf16.msra.mxu1 %v5994_v26 }
 0x6ec   :  { %5786 = vmatmul.mubr.f32.vlgmr.msra.gmra.mxu0 %v7147_v19  ;;  %5767 = vmatprep.subr.bf16.mxu1 %v8087_v31 }
 0x6ed   :  { %5789 = vmatpush3.xpose.msra.mxu0 %v7155_v21  ;;  %5790 = vmatprep.mubr.msk.f32.mxu0 %vm6383_vm0, %v8087_v31  ;;  %v5995_v21 = vld [vmem:[%s8070_s4 + $0xa8] sm:$0xff]  }
 0x6ee   :  { %5793 = vmatprep.subr.bf16.mxu0 %v5993_v2 }
 0x6ef   :  { %5768 = vmatpush3.bf16.msra.mxu1 %v5995_v21 }
 0x6f0   :  { %5791 = vmatmul.mubr.f32.vlgmr.msra.gmra.mxu0 %v8088_v47  ;;  %5769 = vmatprep.subr.bf16.mxu1 %v8087_v31 }
 0x6f1   :  { %5794 = vmatpush3.bf16.msra.mxu0 %v5993_v2 }
 0x6f2   :  { %5795 = vmatprep.subr.bf16.mxu0 %v5994_v26 }
 0x6f3   :  { %5770 = vmatpush3.bf16.msra.mxu1 %v5996_v8 }
 0x6f4   :  { %5771 = vmatprep.subr.bf16.mxu1 %v8087_v31 }
 0x6f5   :  { %5796 = vmatpush3.bf16.msra.mxu0 %v5994_v26 }
 0x6f6   :  { %5797 = vmatprep.subr.bf16.mxu0 %v5995_v21 }
 0x6f7   :  { %5772 = vmatpush3.bf16.msra.mxu1 %v5997_v3 }
 0x6f8   :  { %5773 = vmatprep.subr.bf16.mxu1 %v8087_v31 }
 0x6f9   :  { %5798 = vmatpush3.bf16.msra.mxu0 %v5995_v21 }
 0x6fa   :  { %5799 = vmatprep.subr.bf16.mxu0 %v5996_v8 }
 0x6fb   :  { %5774 = vmatpush3.bf16.msra.mxu1 %v5998_v34 }
 0x6fc   :  { %5775 = vmatprep.subr.bf16.mxu1 %v8087_v31 }
 0x6fd   :  { %5800 = vmatpush3.bf16.msra.mxu0 %v5996_v8 }
 0x6fe   :  { %5801 = vmatprep.subr.bf16.mxu0 %v5997_v3 }
 0x6ff   :  { %5776 = vmatpush3.bf16.msra.mxu1 %v5999_v29 }
 0x700   :  { %5777 = vmatprep.subr.bf16.mxu1 %v8087_v31 }
 0x701   :  { %5802 = vmatpush3.bf16.msra.mxu0 %v5997_v3 }
 0x702   :  { %5803 = vmatprep.subr.bf16.mxu0 %v5998_v34 }
 0x703   :  { %5778 = vmatpush3.bf16.msra.mxu1 %v6000_v32 }
 0x704   :  { %5817 = vmatprep.subr.mxu1 %v8087_v31 }
 0x705   :  { %5804 = vmatpush3.bf16.msra.mxu0 %v5998_v34 }
 0x706   :  { %5805 = vmatprep.subr.bf16.mxu0 %v5999_v29 }
 0x709   :  { %5806 = vmatpush3.bf16.msra.mxu0 %v5999_v29 }
 0x70a   :  { %5807 = vmatprep.subr.bf16.mxu0 %v6000_v32 }
 0x70d   :  { %5808 = vmatpush3.bf16.msra.mxu0 %v6000_v32 }
 0x70e   :  { %5856 = vmatprep.subr.mxu0 %v8087_v31 }
 0x7a4   :  { %v2590_v24 = vpop.f32.mrf.mxu1  ;;  %v2696_v55 = vpop.f32.mrf.mxu0 }
 0x7a5   :  { %v2858_v44 = vpack.c.bf16 %v2590_v24, %v2590_v24  ;;  %v2720_v20 = vadd.f32 %v2696_v55, %v2590_v24  ;;  %v7398_v59 = vpack.c.bf16 %v2696_v55, %v2696_v55  ;;  %v2932_v24 = vpop.xlane.xlu1 %2931 }
 0x7a6   :  { %v5741_v48 = vpop.f32.mrf.mxu1  ;;  %v5761_v25 = vpop.f32.mrf.mxu0 }
 0x7a7   :  { %v3018_v15 = vrot.slane %v2858_v44, %v6573_v36  ;;  %v2726_v49 = vadd.f32 %v2725_v43, %v2720_v20 }
 0x7a8   :  { %v2593_v12 = vpop.f32.mrf.mxu1  ;;  %v2699_v52 = vpop.f32.mrf.mxu0 }
 0x7a9   :  { %v3019_v11 = vcombine.high %v3018_v15, %v3018_v15  ;;  %v3026_v37 = vrot.slane %v3018_v15, %v6573_v36  ;;  %v3716_v54 = vpack.c.bf16 %v2593_v12, %v2593_v12  ;;  %v2721_v45 = vadd.f32 %v2699_v52, %v2593_v12 }
 0x7aa   :  { %v5742_v46 = vpop.f32.mrf.mxu1  ;;  %v5762_v23 = vpop.f32.mrf.mxu0  ;;  %v7400_v17 = vpack.c.bf16 %v2699_v52, %v2699_v52 }
 0x7ab   :  { %v3033_v16 = vrot.slane %v3019_v11, %v6573_v36  ;;  %v3037_v51 = vunpack.i.h.s16 %v3026_v37  ;;  %v5237_v63 = vpack.i.b16 %v3026_v37, %v3026_v37  ;;  %v3034_v33 = vcombine.high %v3026_v37, %v3026_v37 }
 0x7ac   :  { %v3876_v0 = vrot.slane %v3716_v54, %v6573_v36  ;;  %v2727_v39 = vadd.f32 %v2725_v43, %v2721_v45  ;;  %v2926_v41 = vpop.f32.mrf.mxu0 }
 0x7ad   :  { %v3045_v40 = vpack.i.b16 %v3037_v51, %v3037_v51  ;;  %v3055_v57 = vrot.slane %v5237_v63, %v6588_v50  ;;  %v3039_v56 = vunpack.i.h.s16 %v3033_v16  ;;  %v3035_v61 = vcombine.high %v3033_v16, %v3033_v16 }
 0x7ae   :  { %v3877_v27 = vcombine.high %v3876_v0, %v3876_v0  ;;  %v7404_v30 = vrot.slane %v3876_v0, %v6573_v36  ;;  %v7406_v4 = vpack.c.bf16 %v2727_v39, %v2726_v49  ;;  %v5787_v53 = vpop.f32.mrf.mxu0  ;;  %v5238_v18 = vpack.i.b16 %v3033_v16, %v3033_v16 }
 0x7af   :  { %v3085_v28 = vpack.i.b16 %v3055_v57, %v3055_v57  ;;  %v3059_v22 = vrot.slane %v3045_v40, %v6588_v50  ;;  %v3008_v26 = vmul.f32 2.0, %v2926_v41  ;;  %v3041_v8 = vunpack.i.h.s16 %v3034_v33 }
 0x7b0   :  { %v7410_v60 = vrot.slane %v3877_v27, %v6573_v36  ;;  %v3895_v2 = vunpack.i.h.s16 %v7404_v30  ;;  %v2999_v21 = vpop.f32.mrf.mxu0  ;;  %v5211_v3 = vmul.bf16 3216621497, %v7406_v4  ;;  %v5262_v55 = vpack.i.b16 %v7404_v30, %v7404_v30 }
 0x7b1   :  { %v3006_v34 = vrot.slane %v2999_v21, %v6588_v50  ;;  %v7416_v29 = vrot.slane %v3085_v28, %v6588_v50  ;;  %v3092_v32 = vpack.i.b16 %v3059_v22, %v3059_v22  ;;  %v3047_v48 = vpack.i.b16 %v3039_v56, %v3039_v56 }
 0x7b2   :  { %v3903_v44 = vpack.i.b16 %v3895_v2, %v3895_v2  ;;  %v5792_v36 = vpop.f32.mrf.mxu0  ;;  %v3063_v25 = vrot.slane %v5238_v18, %v6588_v50  ;;  %6169 = vpow.bf16 %v5211_v3  ;;  %v3049_v11 = vpack.i.b16 %v3041_v8, %v3041_v8 }
 0x7b3   :  { %v3007_v15 = vadd.f32 %v3006_v34, %v2932_v24  ;;  %v3140_v20 = vadd.bf16 %v7416_v29, %v7398_v59  ;;  %v7424_v43 = vrot.slane %v3092_v32, %v6588_v50  ;;  %v3067_v12 = vrot.slane %v3047_v48, %v6588_v50 }
 0x7b4   :  { %v3099_v52 = vpack.i.b16 %v3063_v25, %v3063_v25  ;;  %v5239_v37 = vpack.i.b16 %v3034_v33, %v3034_v33  ;;  %v3043_v46 = vunpack.i.h.s16 %v3035_v61  ;;  %v5240_v23 = vpack.i.b16 %v3035_v61, %v3035_v61 }
 0x7b5   :  { %v3009_v54 = vsub.f32 %v3007_v15, %v3008_v26  ;;  %v3141_v45 = vadd.bf16 %v7424_v43, %v7398_v59  ;;  %v3106_v16 = vpack.i.b16 %v3067_v12, %v3067_v12  ;;  %v3075_v63 = vrot.slane %v3049_v11, %v6588_v50 }
 0x7b6   :  { %v7430_v51 = vrot.slane %v3099_v52, %v6588_v50  ;;  %v3071_v49 = vrot.slane %v5239_v37, %v6588_v50  ;;  %v3051_v39 = vpack.i.b16 %v3043_v46, %v3043_v46  ;;  %v3079_v41 = vrot.slane %v5240_v23, %v6588_v50 }
 0x7b7   :  { %v3010_v0 = vmax.f32 %v3009_v54, 0.0  ;;  %v3913_v33 = vrot.slane %v5262_v55, %v6588_v50  ;;  %v7437_v40 = vrot.slane %v3106_v16, %v6588_v50  ;;  %v3120_v27 = vpack.i.b16 %v3075_v63, %v3075_v63 }
 0x7b8   :  { %v3142_v57 = vadd.bf16 %v7430_v51, %v7398_v59  ;;  %v3113_v53 = vpack.i.b16 %v3071_v49, %v3071_v49  ;;  %v3083_v61 = vrot.slane %v3051_v39, %v6588_v50  ;;  %v3127_v28 = vpack.i.b16 %v3079_v41, %v3079_v41 }
 0x7b9   :  { %v3148_v56 = vpack.c.bf16 %v3010_v0, %v3010_v0  ;;  %v3943_v22 = vpack.i.b16 %v3913_v33, %v3913_v33  ;;  %v3143_v18 = vadd.bf16 %v7437_v40, %v7398_v59  ;;  %v7445_v2 = vrot.slane %v3120_v27, %v6588_v50 }
 0x7ba   :  { %v7448_v26 = vrot.slane %v3113_v53, %v6588_v50  ;;  %v3917_v21 = vrot.slane %v3903_v44, %v6588_v50  ;;  %v3134_v34 = vpack.i.b16 %v3083_v61, %v3083_v61  ;;  %v7454_v32 = vrot.slane %v3127_v28, %v6588_v50 }
 0x7bb   :  { %v7451_v8 = vpack.i.b16 %v3148_v56, %v3148_v56  ;;  %v3159_v3 = vshrl.u32 %v3148_v56, 16  ;;  %v3145_v24 = vadd.bf16 %v7445_v2, %v7398_v59  ;;  %v7461_v36 = vrot.slane %v3943_v22, %v6588_v50 }
 0x7bc   :  { %v3144_v55 = vadd.bf16 %v7448_v26, %v7398_v59  ;;  %v3950_v48 = vpack.i.b16 %v3917_v21, %v3917_v21  ;;  %v3892_v44 = vcombine.high %v7404_v30, %v7404_v30  ;;  %v3893_v25 = vcombine.high %v7410_v60, %v7410_v60 }
 0x7bd   :  { %v3160_v15 = vpack.i.b16 %v3159_v3, %v3159_v3  ;;  %v3155_v12 = vrot.slane %v7451_v8, %v6588_v50  ;;  %v7470_v52 = vrot.slane %v3134_v34, %v6588_v50  ;;  %v3146_v11 = vadd.bf16 %v7454_v32, %v7398_v59 }
 0x7be   :  { %v3998_v37 = vadd.bf16 %v7461_v36, %v7400_v17  ;;  %v3172_v46 = vrot.slane %v7451_v8, %v6576_v38  ;;  %v7483_v16 = vrot.slane %v3950_v48, %v6588_v50  ;;  %v3897_v63 = vunpack.i.h.s16 %v7410_v60 }
 0x7bf   :  { %3157 = vbcast.lane.c.b16.xlu0 %v3155_v12, 256  ;;  %v3165_v54 = vrot.slane %v3160_v15, %v6588_v50  ;;  %v3179_v30 = vrot.slane %v3160_v15, %v6576_v38  ;;  %v3147_v23 = vadd.bf16 %v7470_v52, %v7398_v59  ;;  %v5263_v49 = vpack.i.b16 %v7410_v60, %v7410_v60 }
 0x7c0   :  { %v6170_v0 = vpop.eup %6169  ;;  %v3899_v39 = vunpack.i.h.s16 %v3892_v44  ;;  %v5264_v41 = vpack.i.b16 %v3892_v44, %v3892_v44  ;;  %v3901_v33 = vunpack.i.h.s16 %v3893_v25  ;;  %v5265_v27 = vpack.i.b16 %v3893_v25, %v3893_v25 }
 0x7c1   :  { %3167 = vbcast.lane.c.b16.xlu1 %v3165_v54, 256  ;;  %v2733_v53 = vadd.bf16 1065369472, %v6170_v0  ;;  %v3905_v61 = vpack.i.b16 %v3897_v63, %v3897_v63  ;;  %v3921_v28 = vrot.slane %v5263_v49, %v6588_v50  ;;  %v3193_v34 = vrot.slane %v3160_v15, %v6592_v58 }
 0x7c2   :  { %v3907_v22 = vpack.i.b16 %v3899_v39, %v3899_v39  ;;  %v3929_v21 = vrot.slane %v5264_v41, %v6588_v50  ;;  %v3909_v3 = vpack.i.b16 %v3901_v33, %v3901_v33  ;;  %v3937_v60 = vrot.slane %v5265_v27, %v6588_v50 }
 0x7c3   :  { %3181 = vbcast.lane.c.b16.xlu0 %v3179_v30, 256  ;;  %6171 = vrcp.bf16 %v2733_v53  ;;  %v3925_v48 = vrot.slane %v3905_v61, %v6588_v50  ;;  %v3957_v44 = vpack.i.b16 %v3921_v28, %v3921_v28  ;;  %v3186_v30 = vrot.slane %v7451_v8, %v6592_v58 }
 0x7c4   :  { %v3933_v25 = vrot.slane %v3907_v22, %v6588_v50  ;;  %v3971_v12 = vpack.i.b16 %v3929_v21, %v3929_v21  ;;  %v3941_v54 = vrot.slane %v3909_v3, %v6588_v50  ;;  %v3985_v63 = vpack.i.b16 %v3937_v60, %v3937_v60 }
 0x7c5   :  { %3174 = vbcast.lane.c.b16.xlu1 %v3172_v46, 256  ;;  %v3964_v49 = vpack.i.b16 %v3925_v48, %v3925_v48  ;;  %v7500_v0 = vrot.slane %v3957_v44, %v6588_v50  ;;  %v3207_v27 = vrot.slane %v3160_v15, %v6673_v42  ;;  %v3200_v60 = vrot.slane %v7451_v8, %v6673_v42 }
 0x7c6   :  { %v3978_v39 = vpack.i.b16 %v3933_v25, %v3933_v25  ;;  %v7503_v41 = vrot.slane %v3971_v12, %v6588_v50  ;;  %v3992_v33 = vpack.i.b16 %v3941_v54, %v3941_v54  ;;  %v7506_v46 = vrot.slane %v3985_v63, %v6588_v50 }
 0x7c7   :  { %3195 = vbcast.lane.c.b16.xlu0 %v3193_v34, 256  ;;  %v7510_v53 = vrot.slane %v3964_v49, %v6588_v50  ;;  %v1954_v8 = vsel %vm1113_vm8, %v7176_v6, 0.0  ;;  %v2490_v54 = vpack.c.bf16 %v7390_v1, %v7390_v1 }
 0x7c8   :  { %v7515_v28 = vrot.slane %v3978_v39, %v6588_v50  ;;  %v7520_v21 = vrot.slane %v3992_v33, %v6588_v50 }
 0x7c9   :  { %3188 = vbcast.lane.c.b16.xlu1 %v3186_v30, 256  ;;  %v3212_v63 = vpack.i.b16 %v2490_v54, %v2490_v54  ;;  %v3234_v30 = vshrl.u32 %v2490_v54, 16  ;;  %v8090_v36 = vadd.bf16 %v7510_v53, %v7400_v17 }
 0x7cb   :  { %3209 = vbcast.lane.c.b16.xlu0 %v3207_v27, 256  ;;  %v7542_v49 = vrot.slane %v3212_v63, %v6588_v50 }
 0x7cd   :  { %3202 = vbcast.lane.c.b16.xlu1 %v3200_v60, 256 }
 0x7d1   :  { %v6172_v44 = vpop.eup %6171 }
 0x7d2   :  { %v2735_v25 = vmul.bf16 1065369472, %v6172_v44 }
 0x7d4   :  { %v2736_v12 = vmul.bf16 %v2735_v25, %v7406_v4  ;;  %v7544_v4 = vpack.i.b16 %v3234_v30, %v3234_v30 }
 0x7d6   :  { %5780 = vmatmul.mubr.bf16.vlgmr.msra.gmra.mxu1 %v2736_v12  ;;  %v7548_v39 = vrot.slane %v7544_v4, %v6588_v50 }
 0x7d7   :  { %5818 = vmatpush3.msra.mxu1 %v7147_v19  ;;  %5819 = vmatprep.mubr.msk.f32.mxu1 %vm6383_vm0, %v8087_v31 }
 0x7d8   :  { %5822 = vmatprep.subr.mxu1 %v8087_v31 }
 0x7f1   :  { %1955 = vadd.xlane.f32.xlu1 %v1954_v8 }
 0x831   :  { %v3158_v19 = vpop.permute.xlu0 %3157 }
 0x832   :  { %v3218_v33 = vmul.bf16 %v7542_v49, %v3158_v19 }
 0x833   :  { %v3168_v27 = vpop.permute.xlu1 %3167 }
 0x834   :  { %v3226_v6 = vadd.bf16 %v3218_v33, %v3140_v20  ;;  %v3219_v60 = vmul.bf16 %v7542_v49, %v3168_v27 }
 0x835   :  { %v3182_v44 = vpop.permute.xlu0 %3181 }
 0x836   :  { %v7556_v25 = vadd.bf16 %v7548_v39, %v3226_v6  ;;  %v3227_v12 = vadd.bf16 %v3219_v60, %v3141_v45  ;;  %v3221_v8 = vmul.bf16 %v7542_v49, %v3182_v44 }
 0x837   :  { %v3175_v54 = vpop.permute.xlu1 %3174 }
 0x838   :  { %v5241_v63 = vmul.bf16 3216621497, %v7556_v25  ;;  %v7564_v30 = vadd.bf16 %v7548_v39, %v3227_v12  ;;  %v3229_v29 = vadd.bf16 %v3221_v8, %v3143_v18  ;;  %v3220_v20 = vmul.bf16 %v7542_v49, %v3175_v54 }
 0x839   :  { %v3196_v19 = vpop.permute.xlu0 %3195 }
 0x83a   :  { %6173 = vpow.bf16 %v5241_v63  ;;  %v5242_v33 = vmul.bf16 3216621497, %v7564_v30  ;;  %v7572_v43 = vadd.bf16 %v7548_v39, %v3229_v29  ;;  %v3228_v45 = vadd.bf16 %v3220_v20, %v3142_v57 }
 0x83b   :  { %v3223_v27 = vmul.bf16 %v7542_v49, %v3196_v19  ;;  %v3189_v6 = vpop.permute.xlu1 %3188 }
 0x83c   :  { %6175 = vpow.bf16 %v5242_v33  ;;  %v5244_v40 = vmul.bf16 3216621497, %v7572_v43  ;;  %v3243_v18 = vadd.bf16 %v7548_v39, %v3228_v45  ;;  %v3222_v60 = vmul.bf16 %v7542_v49, %v3189_v6 }
 0x83d   :  { %v3231_v44 = vadd.bf16 %v3223_v27, %v3145_v24  ;;  %v3210_v12 = vpop.permute.xlu0 %3209 }
 0x83e   :  { %6177 = vpow.bf16 %v5244_v40  ;;  %v5243_v8 = vmul.bf16 3216621497, %v3243_v18  ;;  %v3230_v51 = vadd.bf16 %v3222_v60, %v3144_v55  ;;  %v3225_v57 = vmul.bf16 %v7542_v49, %v3210_v12 }
 0x83f   :  { %v7589_v54 = vadd.bf16 %v7548_v39, %v3231_v44  ;;  %v3203_v63 = vpop.permute.xlu1 %3202 }
 0x840   :  { %6179 = vpow.bf16 %v5243_v8  ;;  %v3245_v29 = vadd.bf16 %v7548_v39, %v3230_v51  ;;  %v3233_v2 = vadd.bf16 %v3225_v57, %v3147_v23  ;;  %v3224_v24 = vmul.bf16 %v7542_v49, %v3203_v63 }
 0x841   :  { %v5246_v20 = vmul.bf16 3216621497, %v7589_v54 }
 0x842   :  { %v5245_v19 = vmul.bf16 3216621497, %v3245_v29  ;;  %v3248_v26 = vadd.bf16 %v7548_v39, %v3233_v2  ;;  %v3232_v55 = vadd.bf16 %v3224_v24, %v3146_v11 }
 0x843   :  { %6181 = vpow.bf16 %v5246_v20 }
 0x844   :  { %6183 = vpow.bf16 %v5245_v19  ;;  %v5248_v33 = vmul.bf16 3216621497, %v3248_v26  ;;  %v3247_v45 = vadd.bf16 %v7548_v39, %v3232_v55 }
 0x846   :  { %6185 = vpow.bf16 %v5248_v33  ;;  %v5247_v27 = vmul.bf16 3216621497, %v3247_v45 }
 0x848   :  { %v6174_v52 = vpop.eup %6173  ;;  %6187 = vpow.bf16 %v5247_v27 }
 0x849   :  { %v3281_v23 = vadd.bf16 1065369472, %v6174_v52 }
 0x84a   :  { %v6176_v6 = vpop.eup %6175 }
 0x84b   :  { %6189 = vrcp.bf16 %v3281_v23  ;;  %v3282_v40 = vadd.bf16 1065369472, %v6176_v6 }
 0x84c   :  { %v6178_v60 = vpop.eup %6177 }
 0x84d   :  { %6191 = vrcp.bf16 %v3282_v40  ;;  %v3284_v44 = vadd.bf16 1065369472, %v6178_v60 }
 0x84e   :  { %v6180_v12 = vpop.eup %6179 }
 0x84f   :  { %6193 = vrcp.bf16 %v3284_v44  ;;  %v3283_v59 = vadd.bf16 1065369472, %v6180_v12 }
 0x851   :  { %v6182_v32 = vpop.eup %6181  ;;  %6195 = vrcp.bf16 %v3283_v59 }
 0x852   :  { %v6184_v11 = vpop.eup %6183  ;;  %v3286_v8 = vadd.bf16 1065369472, %v6182_v32 }
 0x853   :  { %v3285_v51 = vadd.bf16 1065369472, %v6184_v11 }
 0x854   :  { %v6186_v57 = vpop.eup %6185  ;;  %6197 = vrcp.bf16 %v3286_v8 }
 0x855   :  { %6199 = vrcp.bf16 %v3285_v51  ;;  %v3288_v63 = vadd.bf16 1065369472, %v6186_v57 }
 0x856   :  { %v6188_v2 = vpop.eup %6187 }
 0x857   :  { %6201 = vrcp.bf16 %v3288_v63  ;;  %v3287_v24 = vadd.bf16 1065369472, %v6188_v2 }
 0x859   :  { %v6190_v20 = vpop.eup %6189  ;;  %6203 = vrcp.bf16 %v3287_v24 }
 0x85a   :  { %v3290_v19 = vmul.bf16 1065369472, %v6190_v20 }
 0x85b   :  { %v6192_v55 = vpop.eup %6191 }
 0x85c   :  { %v3292_v33 = vmul.bf16 1065369472, %v6192_v55  ;;  %v3305_v23 = vmul.bf16 %v3290_v19, %v7556_v25 }
 0x85d   :  { %v6194_v27 = vpop.eup %6193 }
 0x85e   :  { %v3296_v52 = vmul.bf16 1065369472, %v6194_v27  ;;  %v3306_v6 = vmul.bf16 %v3292_v33, %v7564_v30 }
 0x85f   :  { %v6196_v40 = vpop.eup %6195 }
 0x860   :  { %v3294_v60 = vmul.bf16 1065369472, %v6196_v40  ;;  %v5249_v44 = vcombine.low %v3305_v23, %v3306_v6  ;;  %v3308_v59 = vmul.bf16 %v3296_v52, %v7572_v43 }
 0x862   :  { %v6198_v12 = vpop.eup %6197  ;;  %v3307_v32 = vmul.bf16 %v3294_v60, %v3243_v18  ;;  %5809 = vmatprep.mubr.bf16.mxu0 %v5249_v44  ;;  %v6326_v18 = vld [vmem:[%s8066_s0 + $0x8] sm:$0xff] }
 0x863   :  { %v6200_v11 = vpop.eup %6199  ;;  %v3300_v8 = vmul.bf16 1065369472, %v6198_v12 }
 0x864   :  { %v5250_v51 = vcombine.low %v3307_v32, %v3308_v59  ;;  %v3298_v57 = vmul.bf16 1065369472, %v6200_v11 }
 0x865   :  { %v6202_v63 = vpop.eup %6201  ;;  %v3310_v24 = vmul.bf16 %v3300_v8, %v7589_v54 }
 0x866   :  { %5810 = vmatmul.mubr.bf16.vlgmr.msra.gmra.mxu0 %v5250_v51  ;;  %v3309_v2 = vmul.bf16 %v3298_v57, %v3245_v29  ;;  %v3304_v25 = vmul.bf16 1065369472, %v6202_v63 }
 0x867   :  { %v6204_v20 = vpop.eup %6203 }
 0x868   :  { %v5251_v30 = vcombine.low %v3309_v2, %v3310_v24  ;;  %v3302_v19 = vmul.bf16 1065369472, %v6204_v20  ;;  %v3312_v33 = vmul.bf16 %v3304_v25, %v3248_v26 }
 0x86a   :  { %5813 = vmatprep.mubr.bf16.mxu0 %v5251_v30  ;;  %v3311_v55 = vmul.bf16 %v3302_v19, %v3247_v45  ;;  %v7622_v45 = vrot.slane %v7390_v1, %v6592_v58 }
 0x86c   :  { %v5252_v27 = vcombine.low %v3311_v55, %v3312_v33 }
 0x86e   :  { %5814 = vmatmul.mubr.bf16.gmra.mxu0 %v5252_v27 }
 0x86f   :  { %5858 = vmatprep.mubr.msk.f32.mxu0 %vm6383_vm0, %v8087_v31 }
 0x87a   :  { %v1956_v43 = vpop.xlane.xlu1 %1955 }
 0x87b   :  { %v1957_v29 = vmul.f32 %v6326_v18, %v1956_v43 }
 0x87d   :  { %v1958_v52 = vadd.f32 %v6326_v18, %v1957_v29 }
 0x87f   :  { %v7612_v54 = vsub.f32 %v1958_v52, %v7268_v10 }
 0x881   :  { %4934 = vst [vmem:[%s8072_s6 + $0x8] sm:$0xff] %v7612_v54  ;;  %5857 = vmatpush3.msra.mxu0 %v7612_v54 }
 0x882   :  { %5861 = vmatprep.subr.bf16.mxu0 %v8087_v31 }
 0x896   :  { %v2840_v26 = vpop.f32.mrf.mxu1 }
 0x897   :  { %v2841_v40 = vadd.f32 %v2840_v26, %v7622_v45 }
 0x898   :  { %v5781_v23 = vpop.f32.mrf.mxu1 }
 0x89a   :  { %v2843_v6 = vpop.f32.mrf.mxu1 }
 0x89b   :  { %v2844_v10 = vadd.f32 %v2843_v6, %v7622_v45 }
 0x89c   :  { %v5782_v60 = vpop.f32.mrf.mxu1 }
 0x89d   :  { %v7626_v44 = vpack.c.bf16 %v2844_v10, %v2841_v40 }
 0x89f   :  { %v5236_v12 = vmul.bf16 3216621497, %v7626_v44 }
 0x8a1   :  { %6205 = vpow.bf16 %v5236_v12 }
 0x8af   :  { %v6206_v55 = vpop.eup %6205 }
 0x8b0   :  { %v2852_v23 = vadd.bf16 1065369472, %v6206_v55 }
 0x926   :  { %v5811_v59 = vpop.f32.mrf.mxu0 }
 0x927   :  { %v3380_v32 = vadd.f32 %v5811_v59, %v7622_v45 }
 0x928   :  { %v3371_v11 = vpop.f32.mrf.mxu0 }
 0x929   :  { %v7630_v8 = vpack.c.bf16 %v3380_v32, %v3380_v32  ;;  %v3372_v1 = vadd.f32 %v3371_v11, %v7622_v45 }
 0x92a   :  { %v5812_v51 = vpop.f32.mrf.mxu0 }
 0x92b   :  { %v5255_v57 = vmul.bf16 3216621497, %v7630_v8  ;;  %v7634_v63 = vpack.c.bf16 %v3372_v1, %v3372_v1  ;;  %v3383_v2 = vadd.f32 %v5812_v51, %v7622_v45 }
 0x92c   :  { %v3374_v24 = vpop.f32.mrf.mxu0 }
 0x92d   :  { %6207 = vpow.bf16 %v5255_v57  ;;  %v5253_v25 = vmul.bf16 3216621497, %v7634_v63  ;;  %v7638_v20 = vpack.c.bf16 %v3383_v2, %v3383_v2  ;;  %v3375_v30 = vadd.f32 %v3374_v24, %v7622_v45 }
 0x92e   :  { %v5815_v19 = vpop.f32.mrf.mxu0 }
 0x92f   :  { %6209 = vpow.bf16 %v5253_v25  ;;  %v5256_v33 = vmul.bf16 3216621497, %v7638_v20  ;;  %v7642_v27 = vpack.c.bf16 %v3375_v30, %v3375_v30  ;;  %v3396_v43 = vadd.f32 %v5815_v19, %v7622_v45 }
 0x930   :  { %v3387_v18 = vpop.f32.mrf.mxu0 }
 0x931   :  { %6211 = vpow.bf16 %v5256_v33  ;;  %v5254_v29 = vmul.bf16 3216621497, %v7642_v27  ;;  %v7646_v52 = vpack.c.bf16 %v3396_v43, %v3396_v43  ;;  %v3388_v26 = vadd.f32 %v3387_v18, %v7622_v45 }
 0x932   :  { %v5816_v6 = vpop.f32.mrf.mxu0 }
 0x933   :  { %6213 = vpow.bf16 %v5254_v29  ;;  %v5259_v40 = vmul.bf16 3216621497, %v7646_v52  ;;  %v7650_v10 = vpack.c.bf16 %v3388_v26, %v3388_v26  ;;  %v3399_v60 = vadd.f32 %v5816_v6, %v7622_v45 }
 0x934   :  { %v3390_v12 = vpop.f32.mrf.mxu0 }
 0x935   :  { %6215 = vpow.bf16 %v5259_v40  ;;  %v5257_v59 = vmul.bf16 3216621497, %v7650_v10  ;;  %v7654_v32 = vpack.c.bf16 %v3399_v60, %v3399_v60  ;;  %v3391_v11 = vadd.f32 %v3390_v12, %v7622_v45 }
 0x936   :  { %6217 = vrcp.bf16 %v2852_v23 }
 0x937   :  { %6219 = vpow.bf16 %v5257_v59  ;;  %v5260_v1 = vmul.bf16 3216621497, %v7654_v32  ;;  %v7658_v51 = vpack.c.bf16 %v3391_v11, %v3391_v11 }
 0x939   :  { %6221 = vpow.bf16 %v5260_v1  ;;  %v5258_v57 = vmul.bf16 3216621497, %v7658_v51 }
 0x93b   :  { %v6208_v2 = vpop.eup %6207  ;;  %6223 = vpow.bf16 %v5258_v57 }
 0x93c   :  { %v3444_v24 = vadd.bf16 1065369472, %v6208_v2  ;;  %v7666_v2 = vrot.slane %v7544_v4, %v6576_v38 }
 0x93d   :  { %v6210_v25 = vpop.eup %6209 }
 0x93e   :  { %6225 = vrcp.bf16 %v3444_v24  ;;  %v3442_v30 = vadd.bf16 1065369472, %v6210_v25 }
 0x93f   :  { %v6212_v19 = vpop.eup %6211 }
 0x940   :  { %6227 = vrcp.bf16 %v3442_v30  ;;  %v3445_v55 = vadd.bf16 1065369472, %v6212_v19 }
 0x941   :  { %v6214_v33 = vpop.eup %6213 }
 0x942   :  { %6229 = vrcp.bf16 %v3445_v55  ;;  %v3443_v43 = vadd.bf16 1065369472, %v6214_v33 }
 0x943   :  { %v6216_v18 = vpop.eup %6215 }
 0x944   :  { %v6218_v29 = vpop.eup %6217  ;;  %6231 = vrcp.bf16 %v3443_v43  ;;  %v3448_v26 = vadd.bf16 1065369472, %v6216_v18 }
 0x945   :  { %v6220_v23 = vpop.eup %6219  ;;  %v2854_v60 = vmul.bf16 1065369472, %v6218_v29 }
 0x946   :  { %6233 = vrcp.bf16 %v3448_v26  ;;  %v3446_v6 = vadd.bf16 1065369472, %v6220_v23 }
 0x947   :  { %v6222_v40 = vpop.eup %6221  ;;  %v7662_v57 = vmul.bf16 %v2854_v60, %v7626_v44 }
 0x948   :  { %6235 = vrcp.bf16 %v3446_v6  ;;  %v3449_v12 = vadd.bf16 1065369472, %v6222_v40 }
 0x949   :  { %v6224_v59 = vpop.eup %6223  ;;  %v7670_v33 = vunpack.c.l.bf16 %v7662_v57 }
 0x94a   :  { %6237 = vrcp.bf16 %v3449_v12  ;;  %v3447_v11 = vadd.bf16 1065369472, %v6224_v59 }
 0x94c   :  { %v6226_v1 = vpop.eup %6225  ;;  %6239 = vrcp.bf16 %v3447_v11  ;;  %v7679_v11 = vmul.f32 %v7612_v54, %v7612_v54 }
 0x94d   :  { %v3455_v24 = vmul.bf16 1065369472, %v6226_v1 }
 0x94e   :  { %v6228_v25 = vpop.eup %6227 }
 0x94f   :  { %v3468_v30 = vmul.bf16 %v3455_v24, %v7630_v8  ;;  %v3451_v19 = vmul.bf16 1065369472, %v6228_v25  ;;  %v3694_v8 = vrot.slane %v7670_v33, 2 }
 0x950   :  { %v6230_v55 = vpop.eup %6229 }
 0x951   :  { %v3638_v43 = vunpack.c.l.bf16 %v3468_v30  ;;  %v3466_v18 = vmul.bf16 %v3451_v19, %v7634_v63  ;;  %v3457_v29 = vmul.bf16 1065369472, %v6230_v55  ;;  %v3480_v44 = vmul.bf16 %v7666_v2, %v3468_v30 }
 0x952   :  { %v6232_v26 = vpop.eup %6231  ;;  %v3695_v19 = vrot.slane %v7670_v33, 3 }
 0x953   :  { %v3656_v23 = vrot.slane %v3638_v43, 4  ;;  %v3636_v6 = vunpack.c.l.bf16 %v3466_v18  ;;  %v3469_v4 = vmul.bf16 %v3457_v29, %v7638_v20  ;;  %v3453_v40 = vmul.bf16 1065369472, %v6232_v26 }
 0x954   :  { %v6234_v60 = vpop.eup %6233  ;;  %v3488_v12 = vunpack.c.l.bf16 %v3480_v44  ;;  %v3478_v59 = vmul.bf16 %v7666_v2, %v3466_v18 }
 0x955   :  { %v3657_v63 = vadd.f32 %v3656_v23, %v3638_v43  ;;  %v3644_v1 = vrot.slane %v3636_v6, 4  ;;  %v3639_v24 = vunpack.c.l.bf16 %v3469_v4  ;;  %v3467_v25 = vmul.bf16 %v3453_v40, %v7642_v27 }
 0x956   :  { %v6236_v30 = vpop.eup %6235  ;;  %v3463_v20 = vmul.bf16 1065369472, %v6234_v60  ;;  %3498 = vadd.xlane.f32.xlu0 %v3488_v12  ;;  %v3486_v55 = vunpack.c.l.bf16 %v3478_v59  ;;  %v3481_v29 = vmul.bf16 %v7666_v2, %v3469_v4 }
 0x957   :  { %v3658_v44 = vrot.slane %v3657_v63, 2  ;;  %v3645_v26 = vadd.f32 %v3644_v1, %v3636_v6  ;;  %v3662_v18 = vrot.slane %v3639_v24, 4  ;;  %v3637_v9 = vunpack.c.l.bf16 %v3467_v25 }
 0x958   :  { %v6238_v13 = vpop.eup %6237  ;;  %v3472_v3 = vmul.bf16 %v3463_v20, %v7646_v52  ;;  %v3459_v43 = vmul.bf16 1065369472, %v6236_v30  ;;  %3494 = vadd.xlane.f32.xlu1 %v3486_v55  ;;  %v3479_v23 = vmul.bf16 %v7666_v2, %v3467_v25  ;;  %v3489_v27 = vunpack.c.l.bf16 %v3481_v29 }
 0x959   :  { %v3659_v40 = vadd.f32 %v3658_v44, %v3657_v63  ;;  %v3646_v48 = vrot.slane %v3645_v26, 2  ;;  %v3663_v22 = vadd.f32 %v3662_v18, %v3639_v24  ;;  %v3650_v60 = vrot.slane %v3637_v9, 4 }
 0x95a   :  { %v6240_v12 = vpop.eup %6239  ;;  %v3642_v59 = vunpack.c.l.bf16 %v3472_v3  ;;  %v3470_v4 = vmul.bf16 %v3459_v43, %v7650_v10  ;;  %v3465_v34 = vmul.bf16 1065369472, %v6238_v13  ;;  %v3487_v6 = vunpack.c.l.bf16 %v3479_v23 }
 0x95b   :  { %v3660_v1 = vrot.slane %v3659_v40, 1  ;;  %v3647_v61 = vadd.f32 %v3646_v48, %v3645_v26  ;;  %v3664_v15 = vrot.slane %v3663_v22, 2  ;;  %v3651_v56 = vadd.f32 %v3650_v60, %v3637_v9 }
 0x95c   :  { %v3680_v52 = vrot.slane %v3642_v59, 4  ;;  %v3640_v30 = vunpack.c.l.bf16 %v3470_v4  ;;  %v7688_v20 = vmul.bf16 %v3465_v34, %v7654_v32  ;;  %v3461_v25 = vmul.bf16 1065369472, %v6240_v12  ;;  %3496 = vadd.xlane.f32.xlu0 %v3487_v6  ;;  %3500 = vadd.xlane.f32.xlu1 %v3489_v27 }
 0x95d   :  { %v3661_v63 = vadd.f32 %v3660_v1, %v3659_v40  ;;  %v3648_v24 = vrot.slane %v3647_v61, 1  ;;  %v3665_v55 = vadd.f32 %v3664_v15, %v3663_v22  ;;  %v3652_v29 = vrot.slane %v3651_v56, 2 }
 0x95e   :  { %v3681_v44 = vadd.f32 %v3680_v52, %v3642_v59  ;;  %v3668_v10 = vrot.slane %v3640_v30, 4  ;;  %v3643_v13 = vunpack.c.l.bf16 %v7688_v20  ;;  %v3471_v48 = vmul.bf16 %v3461_v25, %v7658_v51 }
 0x95f   :  { %v3710_v26 = vsub.f32 %v3661_v63, %v3694_v8  ;;  %v3649_v9 = vadd.f32 %v3648_v24, %v3647_v61  ;;  %v3666_v18 = vrot.slane %v3665_v55, 1  ;;  %v3653_v43 = vadd.f32 %v3652_v29, %v3651_v56 }
 0x960   :  { %v3682_v23 = vrot.slane %v3681_v44, 2  ;;  %v3669_v34 = vadd.f32 %v3668_v10, %v3640_v30  ;;  %v3686_v32 = vrot.slane %v3643_v13, 4  ;;  %v3641_v60 = vunpack.c.l.bf16 %v3471_v48 }
 0x961   :  { %v3708_v27 = vsub.f32 %v3649_v9, %v7670_v33  ;;  %v3667_v40 = vadd.f32 %v3666_v18, %v3665_v55  ;;  %v3654_v12 = vrot.slane %v3653_v43, 1  ;;  %v3693_v22 = vrot.slane %v7670_v33, 1 }
 0x962   :  { %v3683_v15 = vadd.f32 %v3682_v23, %v3681_v44  ;;  %v3670_v59 = vrot.slane %v3669_v34, 2  ;;  %v3687_v6 = vadd.f32 %v3686_v32, %v3643_v13  ;;  %v3674_v1 = vrot.slane %v3641_v60, 4 }
 0x963   :  { %v3711_v52 = vsub.f32 %v3667_v40, %v3695_v19  ;;  %v3655_v51 = vadd.f32 %v3654_v12, %v3653_v43  ;;  %v3482_v61 = vmul.bf16 %v7666_v2, %v3470_v4  ;;  %v3484_v56 = vmul.bf16 %v7666_v2, %v3472_v3 }
 0x964   :  { %v3684_v8 = vrot.slane %v3683_v15, 1  ;;  %v3671_v30 = vadd.f32 %v3670_v59, %v3669_v34  ;;  %v3688_v25 = vrot.slane %v3687_v6, 2  ;;  %v3675_v63 = vadd.f32 %v3674_v1, %v3641_v60 }
 0x965   :  { %v3709_v24 = vsub.f32 %v3655_v51, %v3693_v22  ;;  %v3698_v55 = vrot.slane %v7670_v33, 6  ;;  %v3490_v29 = vunpack.c.l.bf16 %v3482_v61  ;;  %v3492_v10 = vunpack.c.l.bf16 %v3484_v56 }
 0x966   :  { %v3685_v9 = vadd.f32 %v3684_v8, %v3683_v15  ;;  %v3672_v44 = vrot.slane %v3671_v30, 1  ;;  %v3689_v18 = vadd.f32 %v3688_v25, %v3687_v6  ;;  %v3676_v13 = vrot.slane %v3675_v63, 2 }
 0x967   :  { %v4564_v23 = vrot.slane %v3709_v24, 7  ;;  %v3696_v19 = vrot.slane %v7670_v33, 4  ;;  %v3699_v4 = vrot.slane %v7670_v33, 7  ;;  %3502 = vadd.xlane.f32.xlu0 %v3490_v29  ;;  %3506 = vadd.xlane.f32.xlu1 %v3492_v10  ;;  %v3483_v3 = vmul.bf16 %v7666_v2, %v3471_v48 }
 0x968   :  { %v3714_v43 = vsub.f32 %v3685_v9, %v3698_v55  ;;  %v3673_v34 = vadd.f32 %v3672_v44, %v3671_v30  ;;  %v3690_v32 = vrot.slane %v3689_v18, 1  ;;  %v3677_v60 = vadd.f32 %v3676_v13, %v3675_v63 }
 0x969   :  { %v4566_v40 = vrot.slane %v3710_v26, 6  ;;  %v4565_v12 = vsel %vm1098_vm1, %v4564_v23, %v3708_v27  ;;  %v3491_v22 = vunpack.c.l.bf16 %v3483_v3  ;;  %v3485_v15 = vmul.bf16 %v7666_v2, %v7688_v20 }
 0x96a   :  { %v4568_v59 = vrot.slane %v3711_v52, 5  ;;  %v3712_v6 = vsub.f32 %v3673_v34, %v3696_v19  ;;  %v3691_v1 = vadd.f32 %v3690_v32, %v3689_v18  ;;  %v3678_v51 = vrot.slane %v3677_v60, 1 }
 0x96b   :  { %v3697_v61 = vrot.slane %v7670_v33, 5  ;;  %3504 = vadd.xlane.f32.xlu0 %v3491_v22  ;;  %3789 = vadd.xlane.f32.xlu1 %v7679_v11  ;;  %v4567_v48 = vsel %vm1100_vm2, %v4566_v40, %v4565_v12  ;;  %v3493_v30 = vunpack.c.l.bf16 %v3485_v15  ;;  %v4574_v63 = vrot.slane %v3714_v43, 2 }
 0x96c   :  { %v4570_v56 = vrot.slane %v3712_v6, 4  ;;  %v3715_v8 = vsub.f32 %v3691_v1, %v3699_v4  ;;  %v3679_v26 = vadd.f32 %v3678_v51, %v3677_v60  ;;  %v4569_v27 = vsel %vm1102_vm3, %v4568_v59, %v4567_v48 }
 0x96e   :  { %v3713_v25 = vsub.f32 %v3679_v26, %v3697_v61  ;;  %v4571_v20 = vsel %vm1104_vm4, %v4570_v56, %v4569_v27  ;;  %v4576_v33 = vrot.slane %v3715_v8, 1  ;;  %v6327_v56 = vld [vmem:[%s8070_s4 + $0xb8] sm:$0xff]   ;;  %v6328_v8 = vld [vmem:[%s8070_s4 + $0xb0] sm:$0xff]   ;;  %v6333_v27 = vld [vmem:[%s8070_s4 + $0x88] sm:$0xff]  }
 0x96f   :  { %3508 = vadd.xlane.f32.xlu0 %v3493_v30  ;;  %v6332_v26 = vld [vmem:[%s8070_s4 + $0x90] sm:$0xff]   ;;  %v6334_v30 = vld [vmem:[%s8070_s4 + $0x80] sm:$0xff]  }
 0x970   :  { %v4572_v52 = vrot.slane %v3713_v25, 3 }
 0x972   :  { %v4573_v24 = vsel %vm1106_vm5, %v4572_v52, %v4571_v20 }
 0x973   :  { %v4575_v55 = vsel %vm1108_vm6, %v4574_v63, %v4573_v24 }
 0x974   :  { %v7711_v29 = vsel %vm1110_vm7, %v4576_v33, %v4575_v55 }
 0x9df   :  { %v3499_v10 = vpop.xlane.xlu0 %3498 }
 0x9e0   :  { %v3529_v19 = vrot.slane %v3499_v10, %v6949_v14 }
 0x9e1   :  { %v3495_v44 = vpop.xlane.xlu1 %3494 }
 0x9e2   :  { %v3521_v13 = vrot.slane %v3495_v44, %v6949_v14 }
 0x9e5   :  { %v3497_v9 = vpop.xlane.xlu0 %3496  ;;  %v3501_v4 = vpop.xlane.xlu1 %3500 }
 0x9e6   :  { %v3525_v18 = vrot.slane %v3497_v9, %v6949_v14  ;;  %v3533_v34 = vrot.slane %v3501_v4, %v6949_v14 }
 0x9e8   :  { %v3550_v23 = vsel %vm1098_vm1, %v3525_v18, %v3521_v13 }
 0x9e9   :  { %v3551_v3 = vsel %vm1100_vm2, %v3529_v19, %v3550_v23 }
 0x9ea   :  { %v3552_v60 = vsel %vm1102_vm3, %v3533_v34, %v3551_v3 }
 0x9f0   :  { %v3503_v43 = vpop.xlane.xlu0 %3502  ;;  %v3507_v12 = vpop.xlane.xlu1 %3506 }
 0x9f1   :  { %v3537_v32 = vrot.slane %v3503_v43, %v6949_v14  ;;  %v3545_v6 = vrot.slane %v3507_v12, %v6949_v14 }
 0x9f3   :  { %v3553_v15 = vsel %vm1104_vm4, %v3537_v32, %v3552_v60 }
 0x9f4   :  { %v3505_v40 = vpop.xlane.xlu0 %3504  ;;  %v3790_v55 = vpop.xlane.xlu1 %3789 }
 0x9f5   :  { %v3541_v22 = vrot.slane %v3505_v40, %v6949_v14 }
 0x9f7   :  { %v3554_v59 = vsel %vm1106_vm5, %v3541_v22, %v3553_v15 }
 0x9f8   :  { %v3509_v1 = vpop.xlane.xlu0 %3508  ;;  %v3555_v61 = vsel %vm1108_vm6, %v3545_v6, %v3554_v59 }
 0x9f9   :  { %v3549_v51 = vrot.slane %v3509_v1, %v6949_v14 }
 0x9fb   :  { %v7728_v48 = vsel %vm1110_vm7, %v3549_v51, %v3555_v61  ;;  %v8089_v61 = vadd.bf16 %v7483_v16, %v7400_v17 }
 0x9fc   :  { %5820 = vmatmul.mubr.msk.f32.vlgmr.msra.gmra.mxu1 %vm1113_vm8, %v7728_v48 }
 0x9fd   :  { %5823 = vmatpush3.xpose.msra.mxu1 %v7612_v54  ;;  %5824 = vmatprep.mubr.msk.f32.mxu1 %vm6383_vm0, %v8087_v31 }
 0x9fe   :  { %5827 = vmatprep.subr.mxu1 %v8087_v31 }
 0xa00   :  { %5825 = vmatmul.mubr.f32.vlgmr.msra.gmra.mxu1 %v7612_v54  ;;  %v6329_v54 = vld [vmem:[%s8070_s4 + $0xa8] sm:$0xff]  }
 0xa01   :  { %5828 = vmatpush3.xpose.msra.mxu1 %v7679_v11  ;;  %5829 = vmatprep.mubr.msk.f32.mxu1 %vm6383_vm0, %v8087_v31  ;;  %v6330_v11 = vld [vmem:[%s8070_s4 + $0xa0] sm:$0xff]  }
 0xa02   :  { %5832 = vmatprep.subr.bf16.mxu1 %v6327_v56 }
 0xa04   :  { %5830 = vmatmul.mubr.f32.vlgmr.msra.gmra.mxu1 %v8088_v47  ;;  %v6331_v47 = vld [vmem:[%s8070_s4 + $0x98] sm:$0xff]  }
 0xa05   :  { %5833 = vmatpush3.bf16.msra.mxu1 %v6327_v56 }
 0xa06   :  { %5834 = vmatprep.subr.bf16.mxu1 %v6328_v8 }
 0xa09   :  { %5835 = vmatpush3.bf16.msra.mxu1 %v6328_v8 }
 0xa0a   :  { %5836 = vmatprep.subr.bf16.mxu1 %v6329_v54 }
 0xa0d   :  { %5837 = vmatpush3.bf16.msra.mxu1 %v6329_v54 }
 0xa0e   :  { %5838 = vmatprep.subr.bf16.mxu1 %v6330_v11 }
 0xa11   :  { %5839 = vmatpush3.bf16.msra.mxu1 %v6330_v11 }
 0xa12   :  { %5840 = vmatprep.subr.bf16.mxu1 %v6331_v47 }
 0xa15   :  { %5841 = vmatpush3.bf16.msra.mxu1 %v6331_v47 }
 0xa16   :  { %5842 = vmatprep.subr.bf16.mxu1 %v6332_v26 }
 0xa19   :  { %5843 = vmatpush3.bf16.msra.mxu1 %v6332_v26 }
 0xa1a   :  { %5844 = vmatprep.subr.bf16.mxu1 %v6333_v27 }
 0xa1d   :  { %5845 = vmatpush3.bf16.msra.mxu1 %v6333_v27 }
 0xa1e   :  { %5846 = vmatprep.subr.bf16.mxu1 %v6334_v30 }
 0xa21   :  { %5847 = vmatpush3.bf16.msra.mxu1 %v6334_v30  ;;  %v8091_v30 = vadd.bf16 %v7500_v0, %v7400_v17  ;;  %v8093_v0 = vadd.bf16 %v7503_v41, %v7400_v17 }
 0xa22   :  { %5881 = vmatprep.subr.bf16.mxu1 %v8087_v31 }
 0xabc   :  { %v7766_v25 = vpop.f32.mrf.mxu1 }
 0xabe   :  { %v5821_v20 = vpop.f32.mrf.mxu1 }
 0xac0   :  { %v3784_v52 = vpop.f32.mrf.mxu1 }
 0xac1   :  { %v3866_v9 = vmul.f32 2.0, %v3784_v52 }
 0xac2   :  { %v5826_v63 = vpop.f32.mrf.mxu1 }
 0xac4   :  { %v3857_v24 = vpop.f32.mrf.mxu1 }
 0xac5   :  { %v3864_v33 = vrot.slane %v3857_v24, %v6588_v50 }
 0xac6   :  { %v5831_v10 = vpop.f32.mrf.mxu1 }
 0xac7   :  { %v3865_v44 = vadd.f32 %v3864_v33, %v3790_v55  ;;  %v8092_v55 = vadd.bf16 %v7515_v28, %v7400_v17  ;;  %v8094_v28 = vadd.bf16 %v7520_v21, %v7400_v17 }
 0xac9   :  { %v3867_v18 = vsub.f32 %v3865_v44, %v3866_v9 }
 0xacb   :  { %v3868_v13 = vmax.f32 %v3867_v18, 0.0 }
 0xacd   :  { %v4006_v23 = vpack.c.bf16 %v3868_v13, %v3868_v13 }
 0xacf   :  { %v4008_v19 = vpack.i.b16 %v4006_v23, %v4006_v23  ;;  %v4017_v4 = vshrl.u32 %v4006_v23, 16 }
 0xad1   :  { %v4018_v3 = vpack.i.b16 %v4017_v4, %v4017_v4  ;;  %v4013_v43 = vrot.slane %v4008_v19, %v6588_v50  ;;  %v4030_v60 = vrot.slane %v4008_v19, %v6576_v38  ;;  %v4044_v12 = vrot.slane %v4008_v19, %v6592_v58 }
 0xad2   :  { %v4058_v15 = vrot.slane %v4008_v19, %v6673_v42 }
 0xad3   :  { %4015 = vbcast.lane.c.b16.xlu0 %v4013_v43, 256  ;;  %v4023_v34 = vrot.slane %v4018_v3, %v6588_v50  ;;  %v4037_v32 = vrot.slane %v4018_v3, %v6576_v38  ;;  %v4051_v40 = vrot.slane %v4018_v3, %v6592_v58  ;;  %v4065_v22 = vrot.slane %v4018_v3, %v6673_v42 }
 0xad5   :  { %4025 = vbcast.lane.c.b16.xlu1 %v4023_v34, 256 }
 0xad7   :  { %4039 = vbcast.lane.c.b16.xlu0 %v4037_v32, 256 }
 0xad9   :  { %4032 = vbcast.lane.c.b16.xlu1 %v4030_v60, 256  ;;  %v8095_v60 = vadd.bf16 %v7506_v46, %v7400_v17 }
 0xadb   :  { %4053 = vbcast.lane.c.b16.xlu0 %v4051_v40, 256 }
 0xadd   :  { %4046 = vbcast.lane.c.b16.xlu1 %v4044_v12, 256 }
 0xadf   :  { %4067 = vbcast.lane.c.b16.xlu0 %v4065_v22, 256 }
 0xae1   :  { %4060 = vbcast.lane.c.b16.xlu1 %v4058_v15, 256 }
 0xb45   :  { %v4016_v50 = vpop.permute.xlu0 %4015 }
 0xb46   :  { %v4069_v59 = vmul.bf16 %v4016_v50, %v7542_v49 }
 0xb47   :  { %v4026_v6 = vpop.permute.xlu1 %4025 }
 0xb48   :  { %v4077_v38 = vadd.bf16 %v4069_v59, %v3998_v37  ;;  %v4070_v1 = vmul.bf16 %v4026_v6, %v7542_v49 }
 0xb49   :  { %v4040_v51 = vpop.permute.xlu0 %4039 }
 0xb4a   :  { %v7783_v58 = vadd.bf16 %v4077_v38, %v7548_v39  ;;  %v4078_v56 = vadd.bf16 %v4070_v1, %v8089_v61  ;;  %v4072_v42 = vmul.bf16 %v4040_v51, %v7542_v49 }
 0xb4b   :  { %v4033_v8 = vpop.permute.xlu1 %4032 }
 0xb4c   :  { %v5266_v54 = vmul.bf16 3216621497, %v7783_v58  ;;  %v7791_v11 = vadd.bf16 %v4078_v56, %v7548_v39  ;;  %v4080_v37 = vadd.bf16 %v4072_v42, %v8090_v36  ;;  %v4071_v47 = vmul.bf16 %v4033_v8, %v7542_v49 }
 0xb4d   :  { %v4054_v26 = vpop.permute.xlu0 %4053 }
 0xb4e   :  { %6241 = vpow.bf16 %v5266_v54  ;;  %v5267_v27 = vmul.bf16 3216621497, %v7791_v11  ;;  %v7799_v16 = vadd.bf16 %v4080_v37, %v7548_v39  ;;  %v4079_v20 = vadd.bf16 %v4071_v47, %v8091_v30 }
 0xb4f   :  { %v4074_v52 = vmul.bf16 %v4054_v26, %v7542_v49  ;;  %v4047_v63 = vpop.permute.xlu1 %4046 }
 0xb50   :  { %6243 = vpow.bf16 %v5267_v27  ;;  %v5269_v53 = vmul.bf16 3216621497, %v7799_v16  ;;  %v4087_v24 = vadd.bf16 %v4079_v20, %v7548_v39  ;;  %v4073_v33 = vmul.bf16 %v4047_v63, %v7542_v49 }
 0xb51   :  { %v4082_v10 = vadd.bf16 %v4074_v52, %v8092_v55  ;;  %v4068_v9 = vpop.permute.xlu0 %4067 }
 0xb52   :  { %6245 = vpow.bf16 %v5269_v53  ;;  %v5268_v44 = vmul.bf16 3216621497, %v4087_v24  ;;  %v4081_v18 = vadd.bf16 %v4073_v33, %v8093_v0  ;;  %v4076_v13 = vmul.bf16 %v4068_v9, %v7542_v49  ;;  %v6001_v0 = vld [vmem:[%s8070_s4 + $0xf8] sm:$0xff]  }
 0xb53   :  { %v7816_v23 = vadd.bf16 %v4082_v10, %v7548_v39  ;;  %v4061_v19 = vpop.permute.xlu1 %4060 }
 0xb54   :  { %6247 = vpow.bf16 %v5268_v44  ;;  %v4089_v4 = vadd.bf16 %v4081_v18, %v7548_v39  ;;  %v4084_v3 = vadd.bf16 %v4076_v13, %v8094_v28  ;;  %v4075_v43 = vmul.bf16 %v4061_v19, %v7542_v49 }
 0xb55   :  { %v5271_v34 = vmul.bf16 3216621497, %v7816_v23 }
 0xb56   :  { %v5270_v32 = vmul.bf16 3216621497, %v4089_v4  ;;  %v7825_v41 = vadd.bf16 %v4084_v3, %v7548_v39  ;;  %v4083_v40 = vadd.bf16 %v4075_v43, %v8095_v60 }
 0xb57   :  { %6249 = vpow.bf16 %v5271_v34 }
 0xb58   :  { %6251 = vpow.bf16 %v5270_v32  ;;  %v5273_v12 = vmul.bf16 3216621497, %v7825_v41  ;;  %v4091_v22 = vadd.bf16 %v4083_v40, %v7548_v39  ;;  %v6004_v40 = vld [vmem:[%s8070_s4 + $0xe0] sm:$0xff]  }
 0xb5a   :  { %6253 = vpow.bf16 %v5273_v12  ;;  %v5272_v21 = vmul.bf16 3216621497, %v4091_v22  ;;  %v6006_v12 = vld [vmem:[%s8070_s4 + $0xd0] sm:$0xff]  }
 0xb5c   :  { %v6242_v15 = vpop.eup %6241  ;;  %6255 = vpow.bf16 %v5272_v21  ;;  %v6008_v21 = vld [vmem:[%s8070_s4 + $0xc0] sm:$0xff]  }
 0xb5d   :  { %v4125_v49 = vadd.bf16 1065369472, %v6242_v15 }
 0xb5e   :  { %v6244_v50 = vpop.eup %6243 }
 0xb5f   :  { %6257 = vrcp.bf16 %v4125_v49  ;;  %v4126_v59 = vadd.bf16 1065369472, %v6244_v50 }
 0xb60   :  { %v6246_v6 = vpop.eup %6245 }
 0xb61   :  { %6259 = vrcp.bf16 %v4126_v59  ;;  %v4128_v38 = vadd.bf16 1065369472, %v6246_v6 }
 0xb62   :  { %v6248_v1 = vpop.eup %6247 }
 0xb63   :  { %6261 = vrcp.bf16 %v4128_v38  ;;  %v4127_v17 = vadd.bf16 1065369472, %v6248_v1 }
 0xb65   :  { %v6250_v46 = vpop.eup %6249  ;;  %6263 = vrcp.bf16 %v4127_v17 }
 0xb66   :  { %v6252_v51 = vpop.eup %6251  ;;  %v4130_v61 = vadd.bf16 1065369472, %v6250_v46 }
 0xb67   :  { %v4129_v56 = vadd.bf16 1065369472, %v6252_v51 }
 0xb68   :  { %v6254_v39 = vpop.eup %6253  ;;  %6265 = vrcp.bf16 %v4130_v61 }
 0xb69   :  { %6267 = vrcp.bf16 %v4129_v56  ;;  %v4132_v42 = vadd.bf16 1065369472, %v6254_v39 }
 0xb6a   :  { %v6256_v8 = vpop.eup %6255 }
 0xb6b   :  { %6269 = vrcp.bf16 %v4132_v42  ;;  %v4131_v54 = vadd.bf16 1065369472, %v6256_v8 }
 0xb6d   :  { %v6258_v36 = vpop.eup %6257  ;;  %6271 = vrcp.bf16 %v4131_v54 }
 0xb6e   :  { %v4134_v37 = vmul.bf16 1065369472, %v6258_v36 }
 0xb6f   :  { %v6260_v47 = vpop.eup %6259 }
 0xb70   :  { %v4136_v26 = vmul.bf16 1065369472, %v6260_v47  ;;  %v4149_v20 = vmul.bf16 %v4134_v37, %v7783_v58 }
 0xb71   :  { %v6262_v27 = vpop.eup %6261 }
 0xb72   :  { %v4140_v30 = vmul.bf16 1065369472, %v6262_v27  ;;  %v4150_v52 = vmul.bf16 %v4136_v26, %v7791_v11 }
 0xb73   :  { %v6264_v63 = vpop.eup %6263 }
 0xb74   :  { %v4138_v53 = vmul.bf16 1065369472, %v6264_v63  ;;  %v5274_v33 = vcombine.low %v4149_v20, %v4150_v52  ;;  %v4152_v10 = vmul.bf16 %v4140_v30, %v7799_v16  ;;  %v6002_v16 = vld [vmem:[%s8070_s4 + $0xf0] sm:$0xff]  }
 0xb76   :  { %v6266_v55 = vpop.eup %6265  ;;  %v4151_v9 = vmul.bf16 %v4138_v53, %v4087_v24  ;;  %5848 = vmatprep.mubr.bf16.mxu1 %v5274_v33 }
 0xb77   :  { %v6268_v44 = vpop.eup %6267  ;;  %v4144_v18 = vmul.bf16 1065369472, %v6266_v55 }
 0xb78   :  { %v5275_v13 = vcombine.low %v4151_v9, %v4152_v10  ;;  %v4142_v19 = vmul.bf16 1065369472, %v6268_v44 }
 0xb79   :  { %v6270_v28 = vpop.eup %6269  ;;  %v4154_v11 = vmul.bf16 %v4144_v18, %v7816_v23  ;;  %v6003_v23 = vld [vmem:[%s8070_s4 + $0xe8] sm:$0xff]  }
 0xb7a   :  { %5849 = vmatmul.mubr.bf16.vlgmr.msra.gmra.mxu1 %v5275_v13  ;;  %v4153_v58 = vmul.bf16 %v4142_v19, %v4089_v4  ;;  %v4148_v3 = vmul.bf16 1065369472, %v6270_v28 }
 0xb7b   :  { %v6272_v43 = vpop.eup %6271  ;;  %5882 = vmatpush3.bf16.msra.mxu1 %v6001_v0 }
 0xb7c   :  { %5883 = vmatprep.subr.bf16.mxu1 %v8087_v31  ;;  %v5276_v24 = vcombine.low %v4153_v58, %v4154_v11  ;;  %v4146_v34 = vmul.bf16 1065369472, %v6272_v43  ;;  %v4156_v60 = vmul.bf16 %v4148_v3, %v7825_v41  ;;  %v6005_v41 = vld [vmem:[%s8070_s4 + $0xd8] sm:$0xff]  }
 0xb7e   :  { %5852 = vmatprep.mubr.bf16.mxu1 %v5276_v24  ;;  %v4155_v32 = vmul.bf16 %v4146_v34, %v4091_v22  ;;  %v6007_v22 = vld [vmem:[%s8070_s4 + $0xc8] sm:$0xff]  }
 0xb7f   :  { %5884 = vmatpush3.bf16.msra.mxu1 %v6002_v16 }
 0xb80   :  { %5885 = vmatprep.subr.bf16.mxu1 %v8087_v31  ;;  %v5277_v4 = vcombine.low %v4155_v32, %v4156_v60 }
 0xb82   :  { %5853 = vmatmul.mubr.bf16.gmra.mxu1 %v5277_v4 }
 0xb83   :  { %5886 = vmatpush3.bf16.msra.mxu1 %v6003_v23  ;;  %5897 = vmatprep.mubr.msk.bf16.mxu1 %vm6383_vm0, %v8087_v31 }
 0xb84   :  { %5887 = vmatprep.subr.bf16.mxu1 %v8087_v31 }
 0xb87   :  { %5888 = vmatpush3.bf16.msra.mxu1 %v6004_v40 }
 0xb88   :  { %5889 = vmatprep.subr.bf16.mxu1 %v8087_v31 }
 0xb8b   :  { %5890 = vmatpush3.bf16.msra.mxu1 %v6005_v41 }
 0xb8c   :  { %5891 = vmatprep.subr.bf16.mxu1 %v8087_v31 }
 0xb8f   :  { %5892 = vmatpush3.bf16.msra.mxu1 %v6006_v12 }
 0xb90   :  { %5893 = vmatprep.subr.bf16.mxu1 %v8087_v31 }
 0xb93   :  { %5894 = vmatpush3.bf16.msra.mxu1 %v6007_v22 }
 0xb94   :  { %5895 = vmatprep.subr.bf16.mxu1 %v8087_v31 }
 0xb97   :  { %5896 = vmatpush3.bf16.msra.mxu1 %v6008_v21 }
 0xb9a   :  { %5898 = vmatmul.mubr.bf16.vlgmr.msra.gmra.mxu1 %v7338_v7 }
 0xc3a   :  { %v5850_v15 = vpop.f32.mrf.mxu1 }
 0xc3b   :  { %v4224_v49 = vadd.f32 %v5850_v15, %v7622_v45 }
 0xc3c   :  { %v4215_v50 = vpop.f32.mrf.mxu1 }
 0xc3d   :  { %v7872_v59 = vpack.c.bf16 %v4224_v49, %v4224_v49  ;;  %v4216_v6 = vadd.f32 %v4215_v50, %v7622_v45 }
 0xc3e   :  { %v5851_v38 = vpop.f32.mrf.mxu1 }
 0xc3f   :  { %v5280_v1 = vmul.bf16 3216621497, %v7872_v59  ;;  %v7876_v17 = vpack.c.bf16 %v4216_v6, %v4216_v6  ;;  %v4227_v46 = vadd.f32 %v5851_v38, %v7622_v45  ;;  %v7909_v38 = vunpack.c.h.bf16 %v7662_v57 }
 0xc40   :  { %v4218_v51 = vpop.f32.mrf.mxu1 }
 0xc41   :  { %6273 = vpow.bf16 %v5280_v1  ;;  %v5278_v61 = vmul.bf16 3216621497, %v7876_v17  ;;  %v7880_v7 = vpack.c.bf16 %v4227_v46, %v4227_v46  ;;  %v4219_v56 = vadd.f32 %v4218_v51, %v7622_v45 }
 0xc42   :  { %v5854_v39 = vpop.f32.mrf.mxu1 }
 0xc43   :  { %6275 = vpow.bf16 %v5278_v61  ;;  %v5281_v42 = vmul.bf16 3216621497, %v7880_v7  ;;  %v7884_v8 = vpack.c.bf16 %v4219_v56, %v4219_v56  ;;  %v4240_v54 = vadd.f32 %v5854_v39, %v7622_v45 }
 0xc44   :  { %v4231_v36 = vpop.f32.mrf.mxu1 }
 0xc45   :  { %6277 = vpow.bf16 %v5281_v42  ;;  %v5279_v37 = vmul.bf16 3216621497, %v7884_v8  ;;  %v7888_v47 = vpack.c.bf16 %v4240_v54, %v4240_v54  ;;  %v4232_v26 = vadd.f32 %v4231_v36, %v7622_v45 }
 0xc46   :  { %v5855_v27 = vpop.f32.mrf.mxu1 }
 0xc47   :  { %6279 = vpow.bf16 %v5279_v37  ;;  %v5284_v30 = vmul.bf16 3216621497, %v7888_v47  ;;  %v7892_v20 = vpack.c.bf16 %v4232_v26, %v4232_v26  ;;  %v4243_v52 = vadd.f32 %v5855_v27, %v7622_v45 }
 0xc48   :  { %v4234_v63 = vpop.f32.mrf.mxu1  ;;  %v4535_v26 = vrot.slane %v7909_v38, 3 }
 0xc49   :  { %6281 = vpow.bf16 %v5284_v30  ;;  %v5282_v53 = vmul.bf16 3216621497, %v7892_v20  ;;  %v7896_v33 = vpack.c.bf16 %v4243_v52, %v4243_v52  ;;  %v4235_v55 = vadd.f32 %v4234_v63, %v7622_v45 }
 0xc4b   :  { %6283 = vpow.bf16 %v5282_v53  ;;  %v5285_v10 = vmul.bf16 3216621497, %v7896_v33  ;;  %v7900_v9 = vpack.c.bf16 %v4235_v55, %v4235_v55  ;;  %v4533_v55 = vrot.slane %v7909_v38, 1 }
 0xc4d   :  { %6285 = vpow.bf16 %v5285_v10  ;;  %v5283_v44 = vmul.bf16 3216621497, %v7900_v9 }
 0xc4f   :  { %v6274_v0 = vpop.eup %6273  ;;  %6287 = vpow.bf16 %v5283_v44 }
 0xc50   :  { %v4288_v18 = vadd.bf16 1065369472, %v6274_v0 }
 0xc51   :  { %v6276_v13 = vpop.eup %6275 }
 0xc52   :  { %6289 = vrcp.bf16 %v4288_v18  ;;  %v4286_v19 = vadd.bf16 1065369472, %v6276_v13 }
 0xc53   :  { %v6278_v28 = vpop.eup %6277 }
 0xc54   :  { %6291 = vrcp.bf16 %v4286_v19  ;;  %v4289_v58 = vadd.bf16 1065369472, %v6278_v28 }
 0xc55   :  { %v6280_v11 = vpop.eup %6279 }
 0xc56   :  { %6293 = vrcp.bf16 %v4289_v58  ;;  %v4287_v45 = vadd.bf16 1065369472, %v6280_v11 }
 0xc57   :  { %v6282_v3 = vpop.eup %6281 }
 0xc58   :  { %6295 = vrcp.bf16 %v4287_v45  ;;  %v4292_v43 = vadd.bf16 1065369472, %v6282_v3 }
 0xc59   :  { %v6284_v16 = vpop.eup %6283 }
 0xc5a   :  { %6297 = vrcp.bf16 %v4292_v43  ;;  %v4290_v24 = vadd.bf16 1065369472, %v6284_v16  ;;  %v7903_v34 = vpop.f32.mrf.mxu1 }
 0xc5b   :  { %v6286_v32 = vpop.eup %6285 }
 0xc5c   :  { %6299 = vrcp.bf16 %v4290_v24  ;;  %v4293_v60 = vadd.bf16 1065369472, %v6286_v32  ;;  %v5899_v23 = vpop.f32.mrf.mxu1 }
 0xc5d   :  { %v6288_v4 = vpop.eup %6287 }
 0xc5e   :  { %6301 = vrcp.bf16 %v4293_v60  ;;  %v4291_v40 = vadd.bf16 1065369472, %v6288_v4  ;;  %v7905_v41 = vpop.f32.mrf.mxu1 }
 0xc60   :  { %v6290_v12 = vpop.eup %6289  ;;  %6303 = vrcp.bf16 %v4291_v40  ;;  %v5900_v22 = vpop.f32.mrf.mxu1 }
 0xc61   :  { %v4299_v21 = vmul.bf16 1065369472, %v6290_v12 }
 0xc62   :  { %v6292_v15 = vpop.eup %6291 }
 0xc63   :  { %v4312_v49 = vmul.bf16 %v4299_v21, %v7872_v59  ;;  %v4295_v50 = vmul.bf16 1065369472, %v6292_v15  ;;  %v4534_v59 = vrot.slane %v7909_v38, 2 }
 0xc64   :  { %v6294_v6 = vpop.eup %6293 }
 0xc65   :  { %v4478_v1 = vunpack.c.l.bf16 %v4312_v49  ;;  %v4310_v46 = vmul.bf16 %v4295_v50, %v7876_v17  ;;  %v4301_v51 = vmul.bf16 1065369472, %v6294_v6  ;;  %v4320_v61 = vmul.bf16 %v4312_v49, %v7666_v2 }
 0xc66   :  { %v6296_v56 = vpop.eup %6295 }
 0xc67   :  { %v4496_v39 = vrot.slane %v4478_v1, 4  ;;  %v4476_v42 = vunpack.c.l.bf16 %v4310_v46  ;;  %v4313_v54 = vmul.bf16 %v4301_v51, %v7880_v7  ;;  %v4297_v36 = vmul.bf16 1065369472, %v6296_v56 }
 0xc68   :  { %v6298_v37 = vpop.eup %6297  ;;  %v4328_v27 = vunpack.c.l.bf16 %v4320_v61  ;;  %v4318_v57 = vmul.bf16 %v4310_v46, %v7666_v2 }
 0xc69   :  { %v4497_v30 = vadd.f32 %v4496_v39, %v4478_v1  ;;  %v4484_v52 = vrot.slane %v4476_v42, 4  ;;  %v4479_v17 = vunpack.c.l.bf16 %v4313_v54  ;;  %v4311_v63 = vmul.bf16 %v4297_v36, %v7884_v8 }
 0xc6a   :  { %v6300_v53 = vpop.eup %6299  ;;  %v4307_v10 = vmul.bf16 1065369472, %v6298_v37  ;;  %4338 = vadd.xlane.f32.xlu0 %v4328_v27  ;;  %v4326_v7 = vunpack.c.l.bf16 %v4318_v57  ;;  %v4321_v44 = vmul.bf16 %v4313_v54, %v7666_v2 }
 0xc6b   :  { %v4498_v0 = vrot.slane %v4497_v30, 2  ;;  %v4485_v18 = vadd.f32 %v4484_v52, %v4476_v42  ;;  %v4502_v13 = vrot.slane %v4479_v17, 4  ;;  %v4477_v19 = vunpack.c.l.bf16 %v4311_v63 }
 0xc6c   :  { %v6302_v28 = vpop.eup %6301  ;;  %v7921_v58 = vmul.bf16 %v4307_v10, %v7888_v47  ;;  %v4303_v11 = vmul.bf16 1065369472, %v6300_v53  ;;  %4334 = vadd.xlane.f32.xlu1 %v4326_v7  ;;  %v4319_v8 = vmul.bf16 %v4311_v63, %v7666_v2  ;;  %v4329_v45 = vunpack.c.l.bf16 %v4321_v44 }
 0xc6d   :  { %v4499_v3 = vadd.f32 %v4498_v0, %v4497_v30  ;;  %v4486_v43 = vrot.slane %v4485_v18, 2  ;;  %v4503_v16 = vadd.f32 %v4502_v13, %v4479_v17  ;;  %v4490_v24 = vrot.slane %v4477_v19, 4 }
 0xc6e   :  { %v6304_v32 = vpop.eup %6303  ;;  %v4482_v60 = vunpack.c.l.bf16 %v7921_v58  ;;  %v4314_v23 = vmul.bf16 %v4303_v11, %v7892_v20  ;;  %v4309_v4 = vmul.bf16 1065369472, %v6302_v28  ;;  %v4327_v40 = vunpack.c.l.bf16 %v4319_v8 }
 0xc6f   :  { %v4500_v12 = vrot.slane %v4499_v3, 1  ;;  %v4487_v22 = vadd.f32 %v4486_v43, %v4485_v18  ;;  %v4504_v47 = vrot.slane %v4503_v16, 2  ;;  %v4491_v21 = vadd.f32 %v4490_v24, %v4477_v19 }
 0xc70   :  { %v4520_v15 = vrot.slane %v4482_v60, 4  ;;  %v4480_v49 = vunpack.c.l.bf16 %v4314_v23  ;;  %v4317_v50 = vmul.bf16 %v4309_v4, %v7896_v33  ;;  %v4305_v6 = vmul.bf16 1065369472, %v6304_v32  ;;  %4336 = vadd.xlane.f32.xlu0 %v4327_v40  ;;  %4340 = vadd.xlane.f32.xlu1 %v4329_v45 }
 0xc71   :  { %v4501_v1 = vadd.f32 %v4500_v12, %v4499_v3  ;;  %v4488_v46 = vrot.slane %v4487_v22, 1  ;;  %v4505_v51 = vadd.f32 %v4504_v47, %v4503_v16  ;;  %v4492_v61 = vrot.slane %v4491_v21, 2 }
 0xc72   :  { %v4521_v56 = vadd.f32 %v4520_v15, %v4482_v60  ;;  %v4508_v39 = vrot.slane %v4480_v49, 4  ;;  %v4483_v20 = vunpack.c.l.bf16 %v4317_v50  ;;  %v4315_v42 = vmul.bf16 %v4305_v6, %v7900_v9 }
 0xc73   :  { %v4550_v54 = vsub.f32 %v4501_v1, %v4534_v59  ;;  %v4489_v36 = vadd.f32 %v4488_v46, %v4487_v22  ;;  %v4506_v37 = vrot.slane %v4505_v51, 1  ;;  %v4493_v27 = vadd.f32 %v4492_v61, %v4491_v21 }
 0xc74   :  { %v4522_v57 = vrot.slane %v4521_v56, 2  ;;  %v4509_v30 = vadd.f32 %v4508_v39, %v4480_v49  ;;  %v4526_v52 = vrot.slane %v4483_v20, 4  ;;  %v4481_v33 = vunpack.c.l.bf16 %v4315_v42 }
 0xc75   :  { %v4548_v17 = vsub.f32 %v4489_v36, %v7909_v38  ;;  %v4507_v63 = vadd.f32 %v4506_v37, %v4505_v51  ;;  %v4494_v53 = vrot.slane %v4493_v27, 1  ;;  %v4538_v10 = vrot.slane %v7909_v38, 6 }
 0xc76   :  { %v4523_v7 = vadd.f32 %v4522_v57, %v4521_v56  ;;  %v4510_v44 = vrot.slane %v4509_v30, 2  ;;  %v4527_v0 = vadd.f32 %v4526_v52, %v4483_v20  ;;  %v4514_v18 = vrot.slane %v4481_v33, 4 }
 0xc77   :  { %v4551_v9 = vsub.f32 %v4507_v63, %v4535_v26  ;;  %v4495_v59 = vadd.f32 %v4494_v53, %v4493_v27  ;;  %v4322_v13 = vmul.bf16 %v4314_v23, %v7666_v2  ;;  %v4323_v19 = vmul.bf16 %v4315_v42, %v7666_v2 }
 0xc78   :  { %v4524_v28 = vrot.slane %v4523_v7, 1  ;;  %v4511_v11 = vadd.f32 %v4510_v44, %v4509_v30  ;;  %v4528_v8 = vrot.slane %v4527_v0, 2  ;;  %v4515_v45 = vadd.f32 %v4514_v18, %v4481_v33 }
 0xc79   :  { %v4549_v3 = vsub.f32 %v4495_v59, %v4533_v55  ;;  %v4536_v43 = vrot.slane %v7909_v38, 4  ;;  %v4330_v16 = vunpack.c.l.bf16 %v4322_v13  ;;  %v4331_v24 = vunpack.c.l.bf16 %v4323_v19 }
 0xc7a   :  { %v4525_v32 = vadd.f32 %v4524_v28, %v4523_v7  ;;  %v4512_v60 = vrot.slane %v4511_v11, 1  ;;  %v4529_v4 = vadd.f32 %v4528_v8, %v4527_v0  ;;  %v4516_v26 = vrot.slane %v4515_v45, 2 }
 0xc7b   :  { %v4587_v40 = vrot.slane %v4549_v3, 7  ;;  %v4539_v23 = vrot.slane %v7909_v38, 7  ;;  %4342 = vadd.xlane.f32.xlu0 %v4330_v16  ;;  %4344 = vadd.xlane.f32.xlu1 %v4331_v24  ;;  %v4324_v12 = vmul.bf16 %v7921_v58, %v7666_v2  ;;  %v4325_v22 = vmul.bf16 %v4317_v50, %v7666_v2 }
 0xc7c   :  { %v4554_v47 = vsub.f32 %v4525_v32, %v4538_v10  ;;  %v4513_v55 = vadd.f32 %v4512_v60, %v4511_v11  ;;  %v4530_v21 = vrot.slane %v4529_v4, 1  ;;  %v4517_v15 = vadd.f32 %v4516_v26, %v4515_v45  ;;  %v6009_v60 = vld [vmem:[%s8070_s4 + $0x138] sm:$0xff]  }
 0xc7d   :  { %v4589_v49 = vrot.slane %v4550_v54, 6  ;;  %v4588_v6 = vsel %vm1098_vm1, %v4587_v40, %v4548_v17  ;;  %v4332_v1 = vunpack.c.l.bf16 %v4324_v12  ;;  %v4333_v46 = vunpack.c.l.bf16 %v4325_v22 }
 0xc7e   :  { %v4591_v51 = vrot.slane %v4551_v9, 5  ;;  %v4552_v61 = vsub.f32 %v4513_v55, %v4536_v43  ;;  %v4531_v56 = vadd.f32 %v4530_v21, %v4529_v4  ;;  %v4518_v39 = vrot.slane %v4517_v15, 1  ;;  %v6011_v21 = vld [vmem:[%s8070_s4 + $0x128] sm:$0xff]  }
 0xc7f   :  { %v4537_v20 = vrot.slane %v7909_v38, 5  ;;  %4346 = vadd.xlane.f32.xlu0 %v4332_v1  ;;  %4348 = vadd.xlane.f32.xlu1 %v4333_v46  ;;  %v4590_v58 = vsel %vm1100_vm2, %v4589_v49, %v4588_v6  ;;  %v3558_v37 = vsel %vm1113_vm8, %v7728_v48, 0.0  ;;  %v4597_v30 = vrot.slane %v4554_v47, 2  ;;  %v6014_v49 = vld [vmem:[%s8070_s4 + $0x110] sm:$0xff]   ;;  %v6015_v6 = vld [vmem:[%s8070_s4 + $0x108] sm:$0xff]   ;;  %v6016_v1 = vld [vmem:[%s8070_s4 + $0x100] sm:$0xff]  }
 0xc80   :  { %v4593_v2 = vrot.slane %v4552_v61, 4  ;;  %v4555_v50 = vsub.f32 %v4531_v56, %v4539_v23  ;;  %v4519_v42 = vadd.f32 %v4518_v39, %v4517_v15  ;;  %v4592_v36 = vsel %vm1102_vm3, %v4591_v51, %v4590_v58  ;;  %v6335_v23 = vld [vmem:[%s8072_s6] sm:$0xff]  ;;  %v6017_v46 = vld [vmem:[%s8070_s4 + $0x178] sm:$0xff]   ;;  %v6018_v51 = vld [vmem:[%s8070_s4 + $0x170] sm:$0xff]  }
 0xc81   :  { %v6012_v15 = vld [vmem:[%s8070_s4 + $0x120] sm:$0xff]   ;;  %v6019_v61 = vld [vmem:[%s8070_s4 + $0x168] sm:$0xff]   ;;  %v6021_v39 = vld [vmem:[%s8070_s4 + $0x158] sm:$0xff]  }
 0xc82   :  { %v4553_v54 = vsub.f32 %v4519_v42, %v4537_v20  ;;  %v4594_v27 = vsel %vm1104_vm4, %v4593_v2, %v4592_v36  ;;  %v4599_v52 = vrot.slane %v4555_v50, 1  ;;  %v6020_v56 = vld [vmem:[%s8070_s4 + $0x160] sm:$0xff]   ;;  %v6022_v20 = vld [vmem:[%s8070_s4 + $0x150] sm:$0xff]   ;;  %v6023_v58 = vld [vmem:[%s8070_s4 + $0x148] sm:$0xff]  }
 0xc83   :  { %3559 = vadd.xlane.f32.xlu0 %v3558_v37  ;;  %v6024_v2 = vld [vmem:[%s8070_s4 + $0x140] sm:$0xff]   ;;  %v6336_v42 = vld [vmem:[%s8072_s6 + $0x8] sm:$0xff] }
 0xc84   :  { %v4595_v57 = vrot.slane %v4553_v54, 3 }
 0xc86   :  { %v4596_v38 = vsel %vm1106_vm5, %v4595_v57, %v4594_v27 }
 0xc87   :  { %v4598_v33 = vsel %vm1108_vm6, %v4597_v30, %v4596_v38  ;;  %v6337_v30 = vld [vmem:[%s8071_s5] sm:$0x3f] }
 0xc88   :  { %v4600_v17 = vsel %vm1110_vm7, %v4599_v52, %v4598_v33 }
 0xc89   :  { %v4602_v63 = vpack.c.bf16 %v4600_v17, %v7711_v29 }
 0xcf3   :  { %v4339_v53 = vpop.xlane.xlu0 %4338 }
 0xcf4   :  { %v4369_v18 = vrot.slane %v4339_v53, %v6949_v14 }
 0xcf5   :  { %v4335_v10 = vpop.xlane.xlu1 %4334 }
 0xcf6   :  { %v4361_v48 = vrot.slane %v4335_v10, %v6949_v14 }
 0xcf9   :  { %v4337_v7 = vpop.xlane.xlu0 %4336  ;;  %v4341_v9 = vpop.xlane.xlu1 %4340 }
 0xcfa   :  { %v4365_v44 = vrot.slane %v4337_v7, %v6949_v14  ;;  %v4373_v13 = vrot.slane %v4341_v9, %v6949_v14 }
 0xcfc   :  { %v4390_v0 = vsel %vm1098_vm1, %v4365_v44, %v4361_v48 }
 0xcfd   :  { %v4391_v59 = vsel %vm1100_vm2, %v4369_v18, %v4390_v0 }
 0xcfe   :  { %v4392_v19 = vsel %vm1102_vm3, %v4373_v13, %v4391_v59 }
 0xd04   :  { %v4343_v28 = vpop.xlane.xlu0 %4342  ;;  %v4345_v29 = vpop.xlane.xlu1 %4344 }
 0xd05   :  { %v4377_v11 = vrot.slane %v4343_v28, %v6949_v14  ;;  %v4381_v8 = vrot.slane %v4345_v29, %v6949_v14 }
 0xd07   :  { %v4393_v45 = vsel %vm1104_vm4, %v4377_v11, %v4392_v19 }
 0xd08   :  { %v4394_v3 = vsel %vm1106_vm5, %v4381_v8, %v4393_v45  ;;  %v4347_v43 = vpop.xlane.xlu0 %4346  ;;  %v4349_v16 = vpop.xlane.xlu1 %4348 }
 0xd09   :  { %v4385_v24 = vrot.slane %v4347_v43, %v6949_v14  ;;  %v4389_v32 = vrot.slane %v4349_v16, %v6949_v14  ;;  %v6010_v14 = vld [vmem:[%s8070_s4 + $0x130] sm:$0xff]  }
 0xd0b   :  { %v4395_v4 = vsel %vm1108_vm6, %v4385_v24, %v4394_v3 }
 0xd0c   :  { %v4396_v26 = vsel %vm1110_vm7, %v4389_v32, %v4395_v4  ;;  %v3560_v40 = vpop.xlane.xlu0 %3559 }
 0xd0d   :  { %v3561_v12 = vmul.f32 %v6335_v23, %v3560_v40  ;;  %5859 = vmatmul.mubr.msk.f32.vlgmr.msra.gmra.mxu0 %vm1113_vm8, %v4396_v26  ;;  %v4398_v22 = vsel %vm1113_vm8, %v4396_v26, 0.0 }
 0xd0e   :  { %5862 = vmatpush3.bf16.msra.mxu0 %v6009_v60  ;;  %4399 = vadd.xlane.f32.xlu1 %v4398_v22 }
 0xd0f   :  { %v3562_v47 = vadd.f32 %v6335_v23, %v3561_v12  ;;  %5863 = vmatprep.subr.bf16.mxu0 %v8087_v31  ;;  %5877 = vmatprep.mubr.msk.bf16.mxu0 %vm6383_vm0, %v8087_v31 }
 0xd11   :  { %v3635_v55 = vsub.f32 %v3562_v47, %v7766_v25  ;;  %v6013_v25 = vld [vmem:[%s8070_s4 + $0x118] sm:$0xff]   ;;  %s6386_s4 = smov [#allocation2]  }
 0xd12   :  { %5864 = vmatpush3.bf16.msra.mxu0 %v6010_v14  ;;  %s4948_s5 = sshll.u32 %s6386_s4, 4  ;;  %s4949_s5 = int_to_ptr.vmem [resolvable:$true] %s4948_s5 }
 0xd13   :  { %4937 = vst [vmem:[%s8074_s8] sm:$0xff] %v3635_v55  ;;  %5865 = vmatprep.subr.bf16.mxu0 %v8087_v31  ;;  %s6338_s6 = scalar_lea.vmem %s4949_s5, 256  ;;  %p6343_p1 = scmp.lt.s32.totalorder %s4949_s5, %s4949_s5 }
 0xd14   :  { %p6339_p0 = scmp.ne.s32.totalorder %s4949_s5, %s6338_s6  ;;  %p6344_p2 = scmp.lt.s32.totalorder %s6338_s6, %s6338_s6 }
 0xd16   :  { %5866 = vmatpush3.bf16.msra.mxu0 %v6011_v21  ;;  %p6345_p3 = por %p6344_p2, %p6343_p1 }
 0xd17   :  { %5867 = vmatprep.subr.bf16.mxu0 %v8087_v31 }
 0xd18   :  { %p6346_p4 = pnand %p6345_p3, %p6339_p0 }
 0xd1a   :  { %5868 = vmatpush3.bf16.msra.mxu0 %v6012_v15 }
 0xd1b   :  { %5869 = vmatprep.subr.bf16.mxu0 %v8087_v31 }
 0xd1e   :  { %5870 = vmatpush3.bf16.msra.mxu0 %v6013_v25 }
 0xd1f   :  { %5871 = vmatprep.subr.bf16.mxu0 %v8087_v31 }
 0xd22   :  { %5872 = vmatpush3.bf16.msra.mxu0 %v6014_v49 }
 0xd23   :  { %5873 = vmatprep.subr.bf16.mxu0 %v8087_v31 }
 0xd26   :  { %5874 = vmatpush3.bf16.msra.mxu0 %v6015_v6 }
 0xd27   :  { %5875 = vmatprep.subr.bf16.mxu0 %v8087_v31 }
 0xd2a   :  { %5876 = vmatpush3.bf16.msra.mxu0 %v6016_v1 }
 0xd2b   :  { %5901 = vmatprep.subr.bf16.mxu0 %v8087_v31 }
 0xd2d   :  { %5878 = vmatmul.mubr.bf16.vlgmr.msra.gmra.mxu0 %v4602_v63 }
 0xd2e   :  { %5917 = vmatprep.mubr.msk.bf16.mxu0 %vm6383_vm0, %v8087_v31  ;;  %5902 = vmatpush3.bf16.msra.mxu0 %v6017_v46 }
 0xd2f   :  { %5903 = vmatprep.subr.bf16.mxu0 %v8087_v31 }
 0xd32   :  { %5904 = vmatpush3.bf16.msra.mxu0 %v6018_v51 }
 0xd33   :  { %5905 = vmatprep.subr.bf16.mxu0 %v8087_v31 }
 0xd36   :  { %5906 = vmatpush3.bf16.msra.mxu0 %v6019_v61 }
 0xd37   :  { %5907 = vmatprep.subr.bf16.mxu0 %v8087_v31 }
 0xd3a   :  { %5908 = vmatpush3.bf16.msra.mxu0 %v6020_v56 }
 0xd3b   :  { %5909 = vmatprep.subr.bf16.mxu0 %v8087_v31 }
 0xd3e   :  { %5910 = vmatpush3.bf16.msra.mxu0 %v6021_v39 }
 0xd3f   :  { %5911 = vmatprep.subr.bf16.mxu0 %v8087_v31 }
 0xd42   :  { %5912 = vmatpush3.bf16.msra.mxu0 %v6022_v20 }
 0xd43   :  { %5913 = vmatprep.subr.bf16.mxu0 %v8087_v31 }
 0xd46   :  { %5914 = vmatpush3.bf16.msra.mxu0 %v6023_v58 }
 0xd47   :  { %5915 = vmatprep.subr.bf16.mxu0 %v8087_v31  ;;  %v8096_v31 = vsub.s32 4, %v6570_v35 }
 0xd49   :  { %v4801_v38 = vrot.slane %v6337_v30, %v8096_v31 }
 0xd4a   :  { %5916 = vmatpush3.bf16.msra.mxu0 %v6024_v2 }
 0xd97   :  { %v4400_v50 = vpop.xlane.xlu1 %4399 }
 0xd98   :  { %v4401_v36 = vmul.f32 %v6336_v42, %v4400_v50 }
 0xd9a   :  { %v4402_v54 = vadd.f32 %v6336_v42, %v4401_v36 }
 0xdcd   :  { %v4471_v37 = vpop.f32.mrf.mxu0 }
 0xdce   :  { %v4475_v27 = vsub.f32 %v4402_v54, %v4471_v37 }
 0xdcf   :  { %v5860_v57 = vpop.f32.mrf.mxu0 }
 0xdd0   :  { %4938 = vst [vmem:[%s8074_s8 + $0x8] sm:$0xff] %v4475_v27 }
 0xded   :  { %v4702_v52 = vpop.f32.mrf.mxu0 }
 0xdee   :  { %v4792_v33 = vadd.f32 %v7903_v34, %v4702_v52 }
 0xdef   :  { %v5879_v17 = vpop.f32.mrf.mxu0 }
 0xdf0   :  { %v4802_v63 = vadd.f32 %v4801_v38, %v4792_v33 }
 0xdf1   :  { %v4705_v53 = vpop.f32.mrf.mxu0 }
 0xdf2   :  { %v5319_v10 = vmul.f32 -1.442695, %v4802_v63  ;;  %v4795_v7 = vadd.f32 %v7905_v41, %v4705_v53 }
 0xdf3   :  { %v5880_v44 = vpop.f32.mrf.mxu0 }
 0xdf4   :  { %6305 = vpow2.f32 %v5319_v10  ;;  %v4803_v48 = vadd.f32 %v4801_v38, %v4795_v7 }
 0xdf6   :  { %v5320_v0 = vmul.f32 -1.442695, %v4803_v48 }
 0xdf8   :  { %6307 = vpow2.f32 %v5320_v0 }
 0xe01   :  { %v6306_v18 = vpop.eup %6305 }
 0xe02   :  { %v4810_v9 = vadd.f32 1.0, %v6306_v18 }
 0xe04   :  { %6309 = vrcp.f32 %v4810_v9 }
 0xe05   :  { %v6308_v59 = vpop.eup %6307 }
 0xe06   :  { %v4811_v13 = vadd.f32 1.0, %v6308_v59 }
 0xe08   :  { %6311 = vrcp.f32 %v4811_v13 }
 0xe11   :  { %v6310_v19 = vpop.eup %6309 }
 0xe12   :  { %v4816_v34 = vmul.f32 %v6310_v19, %v4802_v63 }
 0xe15   :  { %v6312_v28 = vpop.eup %6311 }
 0xe16   :  { %v4817_v29 = vmul.f32 %v6312_v28, %v4803_v48 }
 0xe18   :  { %v4818_v11 = vpack.c.bf16 %v4817_v29, %v4816_v34 }
 0xe1a   :  { %5918 = vmatmul.mubr.bf16.vlgmr.msra.gmra.mxu0 %v4818_v11 }
 0xe1b   :  { %6349 = shalt.err (!%p6346_p4)
}
 0xe1c   :  { %s6387_s8 = smov 128   ;;  %s6388_s3 = smov 8   ;;  %v8097_v41 = vsub.s32 5, %v6570_v35 }
 0xe1d   :  { %4954 = dma.vmem_to_hbm [thread:$0]  %s4949_s5, 256, %s8073_s7, [#allocation3], %s6387_s8, %s6387_s8, %s6388_s3  }
 0xe1e   :  { %v4930_v8 = vrot.slane %v6337_v30, %v8097_v41  ;;  %s6389_s23 = smov [#allocation4]  }
 0xe1f   :  { %s4962_s1 = sshll.u32 %s6389_s23, 4  ;;  %s4963_s1 = int_to_ptr.vmem [resolvable:$true] %s4962_s1 }
 0xe20   :  { %s6358_s24 = scalar_lea.vmem %s4963_s1, 256  ;;  %p6363_p6 = scmp.lt.s32.totalorder %s4963_s1, %s4963_s1 }
 0xe21   :  { %p6359_p5 = scmp.ne.s32.totalorder %s4963_s1, %s6358_s24  ;;  %p6364_p7 = scmp.lt.s32.totalorder %s6358_s24, %s6358_s24 }
 0xe23   :  { %p6365_p8 = por %p6364_p7, %p6363_p6 }
 0xe25   :  { %p6366_p9 = pnand %p6365_p8, %p6359_p5 }
 0xeda   :  { %v4918_v45 = vpop.f32.mrf.mxu0 }
 0xedb   :  { %v4925_v3 = vadd.f32 %v4918_v45, %v7328_v62 }
 0xedc   :  { %v5919_v43 = vpop.f32.mrf.mxu0 }
 0xedd   :  { %v4931_v16 = vadd.f32 %v4930_v8, %v4925_v3 }
 0xede   :  { %v4921_v24 = vpop.f32.mrf.mxu0 }
 0xedf   :  { %4939 = vst [vmem:[#allocation4] sm:$0xff] %v4931_v16  ;;  %v4926_v32 = vadd.f32 %v4921_v24, %v7334_v5 }
 0xee0   :  { %v5920_v60 = vpop.f32.mrf.mxu0 }
 0xee1   :  { %v4932_v4 = vadd.f32 %v4930_v8, %v4926_v32 }
 0xee3   :  { %4940 = vst [vmem:[#allocation4 + $0x8] sm:$0xff] %v4932_v4 }
 0xee4   :  { %6369 = shalt.err (!%p6366_p9)
}
 0xee5   :  { %4968 = dma.vmem_to_hbm [thread:$0]  %s4963_s1, 256, %s8075_s9, [#allocation5], %s6387_s8, %s6387_s8, %s6388_s3  }
 0xee6   :  { %6378 = dma.done.wait [#allocation3], 256  }
 0xee7   :  { %6379 = vsyncadd [#allocation3], 4294967040 }
 0xee8   :  { %6380 = dma.done.wait [#allocation5], 256  }
 0xee9   :  { %6381 = vsyncadd [#allocation5], 4294967040 }
 0xeea   :  { %4979 = vsyncpa [#allocation3], 1 }
 0xeeb   :  { %4980 = vsyncpa [#allocation5], 1 }

</bundles_post_ra>
